<compile_context>
chip_gen: v6e
topology: v6e:2x2x1
jax: 0.10.0
libtpu: 0.0.40
codegen_flags: <defaults>
</compile_context>

<pallas_src>
import jax
import jax.numpy as jnp
from jax import lax
from jax.experimental import pallas as pl
from jax.experimental.pallas import tpu as pltpu


# ----------------------------------------------------------------------------
# Helpers
# ----------------------------------------------------------------------------
def _resident_spec(block_shape, index_map):
    """BlockSpec for grid-invariant (weight) inputs: single-buffered so the pipeline
    does not allocate two VMEM copies of weights whose block never changes.  Falls
    back to a default (double-buffered) spec on jax versions without pipeline_mode."""
    try:
        return pl.BlockSpec(block_shape, index_map, pipeline_mode=pl.Buffered(1))
    except (TypeError, AttributeError):
        return pl.BlockSpec(block_shape, index_map)


def _vmem_capacity_bytes():
    """Per-core VMEM capacity; conservative (v7x-sized) fallback if unavailable."""
    try:
        return int(pltpu.get_tpu_info().vmem_capacity_bytes)
    except Exception:
        return 64 * 1024 * 1024


# ----------------------------------------------------------------------------
# Generic Linear kernel:  out = x @ W + b   (tiled over rows/cols, weights resident)
# ----------------------------------------------------------------------------
def _linear_kernel(x_ref, w_ref, b_ref, o_ref):
    acc = jnp.dot(x_ref[...].astype(jnp.bfloat16), w_ref[...],
                  preferred_element_type=jnp.float32)
    o_ref[...] = (acc + b_ref[...]).astype(o_ref.dtype)


def linear(x, w_bf16, b_row, out_dtype=jnp.float32, tile_m=512, tile_n=2048):
    """x: (M, K) any float dtype, w_bf16: (K, N) bf16, b_row: (1, N) f32 -> (M, N)."""
    M, K = x.shape
    N = w_bf16.shape[1]
    tm = M if M <= tile_m else tile_m
    tn = N if N <= tile_n else tile_n
    grid = (pl.cdiv(M, tm), pl.cdiv(N, tn))
    if grid[1] == 1:
        # Weight/bias blocks are grid-invariant -> single-buffer them.
        w_spec = _resident_spec((K, tn), lambda i, j: (0, j))
        b_spec = _resident_spec((1, tn), lambda i, j: (0, j))
    else:
        w_spec = pl.BlockSpec((K, tn), lambda i, j: (0, j))
        b_spec = pl.BlockSpec((1, tn), lambda i, j: (0, j))
    return pl.pallas_call(
        _linear_kernel,
        out_shape=jax.ShapeDtypeStruct((M, N), out_dtype),
        grid=grid,
        in_specs=[pl.BlockSpec((tm, K), lambda i, j: (i, 0)), w_spec, b_spec],
        out_specs=pl.BlockSpec((tm, tn), lambda i, j: (i, j)),
        compiler_params=pltpu.CompilerParams(
            dimension_semantics=("parallel", "parallel")),
    )(x, w_bf16, b_row)


# ----------------------------------------------------------------------------
# Single-layer LSTM recurrence (PyTorch gate order i, f, g, o), zero init state.
# Input projection gates_x[t] = x[t] @ W_ih + (b_ih + b_hh) is precomputed (one big
# parallel matmul); only h @ W_hh runs on the serial path.  Each grid iteration
# consumes a block of Kt time steps (statically unrolled) with h/c carried in VMEM.
# ----------------------------------------------------------------------------
def _lstm_kernel(gx_ref, whh_ref, o_ref, h_scr, c_scr):
    blk = pl.program_id(0)

    @pl.when(blk == 0)
    def _():
        h_scr[...] = jnp.zeros_like(h_scr)
        c_scr[...] = jnp.zeros_like(c_scr)

    H = h_scr.shape[-1]
    Kt = gx_ref.shape[0]
    for k in range(Kt):                                   # static unroll, Kt <= 16
        gates = gx_ref[k] + jnp.dot(h_scr[...].astype(jnp.bfloat16), whh_ref[...],
                                    preferred_element_type=jnp.float32)   # (B, 4H)
        # NOTE: at real sizes H is a multiple of 128, so these slices are lane-aligned.
        i_g = jax.nn.sigmoid(gates[:, 0 * H:1 * H])
        f_g = jax.nn.sigmoid(gates[:, 1 * H:2 * H])
        g_g = jnp.tanh(gates[:, 2 * H:3 * H])
        o_g = jax.nn.sigmoid(gates[:, 3 * H:4 * H])
        c_new = f_g * c_scr[...] + i_g * g_g
        h_new = o_g * jnp.tanh(c_new)
        c_scr[...] = c_new
        h_scr[...] = h_new
        o_ref[k] = h_new.astype(o_ref.dtype)


def lstm(gates_x, w_hh_bf16, block_steps=16):
    """gates_x: (L, B, 4H) time-major pre-projected inputs; w_hh: (H, 4H) bf16 -> (L, B, H)."""
    L, B, G4 = gates_x.shape
    H = G4 // 4
    Kt = L if L <= block_steps else block_steps
    return pl.pallas_call(
        _lstm_kernel,
        out_shape=jax.ShapeDtypeStruct((L, B, H), jnp.float32),
        grid=(pl.cdiv(L, Kt),),
        in_specs=[
            pl.BlockSpec((Kt, B, G4), lambda t: (t, 0, 0)),
            _resident_spec((H, G4), lambda t: (0, 0)),
        ],
        out_specs=pl.BlockSpec((Kt, B, H), lambda t: (t, 0, 0)),
        scratch_shapes=[pltpu.VMEM((B, H), jnp.float32),
                        pltpu.VMEM((B, H), jnp.float32)],
        compiler_params=pltpu.CompilerParams(dimension_semantics=("arbitrary",)),
    )(gates_x, w_hh_bf16)


# ----------------------------------------------------------------------------
# Fused JointNet + log_softmax + blank/label gather kernel.
# Inputs are already projected into the joint inner dimension J (forward_layer folded
# into the enc/dec output projections), so per (T, U) tile the kernel computes
#   h = tanh(enc_J[t] + dec_J[u] + b_f)                       (tT, tU, J)
#   logits = h @ W_p + b_p                                    (tT, tU, V)   VMEM-only
#   blank_lp = logits[..., 0] - lse,  lab_lp = h . W_p[:, tgt[u]] + b_p[tgt[u]] - lse
# Only the two (tT, tU) maps go back to HBM; the label column uses rows of W_p^T that
# were gathered by target id in the wrapper (no V-sized one-hot work).
# ----------------------------------------------------------------------------
def _joint_kernel(enc_ref, dec_ref, wlab_ref, blab_ref, bf_ref, wp_ref, bp_ref,
                  blank_ref, lab_ref):
    enc = enc_ref[0].astype(jnp.float32)                          # (tT, J)
    dec = dec_ref[0].astype(jnp.float32)                          # (tU, J)
    h = jnp.tanh(enc[:, None, :] + dec[None, :, :] + bf_ref[...])  # (tT, tU, J) f32
    tT, tU, J = h.shape
    V = wp_ref.shape[1]
    h_bf = h.astype(jnp.bfloat16)

    logits = jnp.dot(h_bf.reshape(tT * tU, J), wp_ref[...],
                     preferred_element_type=jnp.float32) + bp_ref[...]
    logits = logits.reshape(tT, tU, V)
    m = jnp.max(logits, axis=-1)
    lse = m + jnp.log(jnp.sum(jnp.exp(logits - m[..., None]), axis=-1))   # (tT, tU)
    blank_ref[0] = (logits[:, :, 0] - lse).astype(blank_ref.dtype)

    wlab = wlab_ref[0].astype(jnp.float32)                         # (tU, J)
    lab_logit = jnp.sum(h_bf.astype(jnp.float32) * wlab[None, :, :], axis=-1) \
        + blab_ref[0, 0]                                           # (tT, tU)
    lab_ref[0] = (lab_logit - lse).astype(lab_ref.dtype)


def _joint_tiles(T, U1, V, J, budget_bytes):
    """Pick (tT, tU) so the f32 logits tile (4B*V per cell) plus the h tile (~6B*J per
    cell) fits the per-call VMEM budget, respecting (8,128) block-shape rules."""
    tU = U1 if U1 <= 128 else 128
    per_cell = 4 * V + 6 * J
    tT = max(8, budget_bytes // (per_cell * tU))
    if tT >= T:
        tT = T
    else:
        tT = max(8, min(512, (tT // 8) * 8))
    return tT, tU


def joint_fused(enc_J, dec_J, wlab, blab, b_f_row, w_p, b_p_row):
    """enc_J: (B,T,J) bf16, dec_J: (B,U+1,J) bf16, wlab: (B,U+1,J) bf16 (gathered W_p^T
    rows), blab: (B,1,U+1) f32 (gathered b_p), b_f_row: (1,J) f32, w_p: (J,V) bf16,
    b_p_row: (1,V) f32.  Returns (blank_lp, lab_lp), each (B,T,U+1) f32 (last U column
    of lab_lp unused)."""
    B, T, J = enc_J.shape
    _, U1, _ = dec_J.shape
    V = w_p.shape[1]

    cap = _vmem_capacity_bytes()
    tT, tU = _joint_tiles(T, U1, V, J, budget_bytes=cap // 8)
    vmem_limit = min(cap * 3 // 4, 96 * 1024 * 1024)

    # Leading grid axis = T tiles, so on v7x both TensorCores get work even when B == 1.
    grid = (pl.cdiv(T, tT), B, pl.cdiv(U1, tU))

    blank_lp, lab_lp = pl.pallas_call(
        _joint_kernel,
        out_shape=(jax.ShapeDtypeStruct((B, T, U1), jnp.float32),
                   jax.ShapeDtypeStruct((B, T, U1), jnp.float32)),
        grid=grid,
        in_specs=[
            pl.BlockSpec((1, tT, J), lambda ti, b, ui: (b, ti, 0)),
            pl.BlockSpec((1, tU, J), lambda ti, b, ui: (b, ui, 0)),
            pl.BlockSpec((1, tU, J), lambda ti, b, ui: (b, ui, 0)),
            pl.BlockSpec((1, 1, tU), lambda ti, b, ui: (b, 0, ui)),
            _resident_spec((1, J), lambda ti, b, ui: (0, 0)),
            _resident_spec((J, V), lambda ti, b, ui: (0, 0)),
            _resident_spec((1, V), lambda ti, b, ui: (0, 0)),
        ],
        out_specs=[
            pl.BlockSpec((1, tT, tU), lambda ti, b, ui: (b, ti, ui)),
            pl.BlockSpec((1, tT, tU), lambda ti, b, ui: (b, ti, ui)),
        ],
        compiler_params=pltpu.CompilerParams(
            dimension_semantics=("parallel", "parallel", "parallel"),
            vmem_limit_bytes=int(vmem_limit)),
    )(enc_J, dec_J, wlab, blab, b_f_row, w_p, b_p_row)
    return blank_lp, lab_lp


# ----------------------------------------------------------------------------
# RNNT loss (forward alpha recursion, log domain), f32 throughout.
#   alpha[t,u] = cumlab[t,u] + logcumsumexp_u(alpha[t-1,:] + blank[t-1,:] - cumlab[t,:])
# (algebraically equal to the Graves recursion).  Implemented as a fori_loop over time
# with dynamic slices on the joint's native (B,T,U+1) layout — no transposes and no
# materialized (T,B,U+1) alpha tensor; the per-batch log-likelihood is picked up on the
# fly at t == input_length-1, u == target_length.
# ----------------------------------------------------------------------------
def rnnt_loss(blank_lp, lab_lp, input_lengths, target_lengths):
    B, T, U1 = blank_lp.shape
    blank_lp = blank_lp.astype(jnp.float32)
    lab_lp = lab_lp.astype(jnp.float32)

    cum_inc = jnp.cumsum(lab_lp, axis=-1)
    cumlab = jnp.concatenate(
        [jnp.zeros((B, T, 1), jnp.float32), cum_inc[..., :-1]], axis=-1)  # exclusive prefix

    b_idx = jnp.arange(B)
    t_end = input_lengths - 1
    u_end = target_lengths

    alpha0 = cumlab[:, 0, :]                                              # (B, U1)
    ll0 = alpha0[b_idx, u_end] + blank_lp[b_idx, 0, u_end]
    ll_init = jnp.where(t_end == 0, ll0, jnp.zeros_like(ll0))

    def body(t, carry):
        alpha_prev, ll = carry
        blank_prev = lax.dynamic_slice_in_dim(blank_lp, t - 1, 1, axis=1)[:, 0, :]
        blank_t = lax.dynamic_slice_in_dim(blank_lp, t, 1, axis=1)[:, 0, :]
        cumlab_t = lax.dynamic_slice_in_dim(cumlab, t, 1, axis=1)[:, 0, :]
        c = alpha_prev + blank_prev - cumlab_t
        lcse = lax.associative_scan(jnp.logaddexp, c, axis=-1)
        alpha_t = cumlab_t + lcse
        ll_t = alpha_t[b_idx, u_end] + blank_t[b_idx, u_end]
        ll = jnp.where(t_end == t, ll_t, ll)
        return (alpha_t, ll)

    _, ll = lax.fori_loop(1, T, body, (alpha0, ll_init))
    return -jnp.mean(ll)


# ----------------------------------------------------------------------------
# Transducer forward
# ----------------------------------------------------------------------------
def transducer_forward(prepared, inputs, inputs_length, targets, targets_length):
    B, T, F = inputs.shape

    # --- Encoder: pre_linear -> (Conformer blocks) -> folded output projection (-> J) ---
    x = linear(inputs.reshape(B * T, F), prepared["enc_pre_w"], prepared["enc_pre_b"])
    # TODO(synk): ConformerBlock stack is an external dependency (lucidrains conformer);
    #             treated as identity here.
    enc_J = linear(x, prepared["enc_outJ_w"], prepared["enc_outJ_b"],
                   out_dtype=jnp.bfloat16).reshape(B, T, -1)              # (B, T, J)

    # --- Decoder: pad blank, embed (time-major), hoisted input proj, LSTM, folded proj ---
    concat_targets = jnp.pad(targets, ((0, 0), (1, 0)), constant_values=0)   # (B, U+1)
    emb_t = jnp.take(prepared["dec_emb"], concat_targets.T, axis=0)          # (U+1, B, H)
    L, Bb, Hd = emb_t.shape
    gates_x = linear(emb_t.reshape(L * Bb, Hd), prepared["dec_wih"],
                     prepared["dec_b"]).reshape(L, Bb, 4 * Hd)
    h_t = lstm(gates_x, prepared["dec_whh"])                                 # (U+1, B, H)
    dec_J = linear(h_t.reshape(L * Bb, Hd), prepared["dec_outJ_w"],
                   prepared["dec_outJ_b"], out_dtype=jnp.bfloat16).reshape(L, Bb, -1)
    dec_J = jnp.transpose(dec_J, (1, 0, 2))                                  # (B, U+1, J)

    # --- Joint (fused log-softmax + blank/label gather) -----------------------
    tgt_pad = jnp.pad(targets, ((0, 0), (0, 1)), constant_values=0)          # (B, U+1)
    wlab = jnp.take(prepared["j_p_wT"], tgt_pad, axis=0)                     # (B, U+1, J) bf16
    blab = jnp.take(prepared["j_p_b"], tgt_pad, axis=0)[:, None, :]          # (B, 1, U+1) f32
    blank_lp, lab_lp = joint_fused(enc_J, dec_J, wlab, blab,
                                   prepared["j_f_b"], prepared["j_p_w"],
                                   prepared["j_p_b_row"])

    # --- RNNT loss -------------------------------------------------------------
    return rnnt_loss(blank_lp, lab_lp,
                     inputs_length.astype(jnp.int32), targets_length.astype(jnp.int32))


# ----------------------------------------------------------------------------
# Parameter construction (synthetic, deterministic) and one-time preparation:
# fold the joint forward_layer into enc/dec output projections and pre-cast weights.
# ----------------------------------------------------------------------------
def init_params(key, feat, enc_h, enc_o, dec_h, dec_o, joint_inner, vocab):
    keys = jax.random.split(key, 16)
    s = 0.1

    def w(k, shape):
        return (s * jax.random.normal(k, shape)).astype(jnp.float32)

    emb = w(keys[0], (vocab, dec_h))
    emb = emb.at[0].set(0.0)                                   # padding_idx=0
    return {
        # encoder
        "enc_pre_w": w(keys[1], (feat, enc_h)),
        "enc_pre_b": w(keys[2], (enc_h,)),
        "enc_out_w": w(keys[3], (enc_h, enc_o)),
        "enc_out_b": w(keys[4], (enc_o,)),
        # decoder
        "dec_emb": emb,
        "dec_wih": w(keys[5], (dec_h, 4 * dec_h)),
        "dec_whh": w(keys[6], (dec_h, 4 * dec_h)),
        "dec_b": w(keys[7], (4 * dec_h,)),                     # b_ih + b_hh combined
        "dec_out_w": w(keys[8], (dec_h, dec_o)),
        "dec_out_b": w(keys[9], (dec_o,)),
        # joint (forward_layer split for concat(enc, dec))
        "j_fe_w": w(keys[10], (enc_o, joint_inner)),
        "j_fd_w": w(keys[11], (dec_o, joint_inner)),
        "j_f_b": w(keys[12], (joint_inner,)),
        "j_p_w": w(keys[13], (joint_inner, vocab)),
        "j_p_b": w(keys[14], (vocab,)),
    }


def prepare_params(p):
    """One-time: fold joint forward_layer into enc/dec output projections and cast
    all matmul weights to bf16 (no per-forward cast passes over HBM weights)."""
    bf16, f32 = jnp.bfloat16, jnp.float32
    # enc_state @ W_fe + dec_state @ W_fd + b_f
    #   = enc_x @ (W_eo W_fe) + (b_eo W_fe) + h @ (W_do W_fd) + (b_do W_fd) + b_f
    # Caveat: only cheap when joint_inner is comparable to enc_o/dec_o (true here).
    enc_outJ_w = p["enc_out_w"] @ p["j_fe_w"]
    enc_outJ_b = p["enc_out_b"] @ p["j_fe_w"]
    dec_outJ_w = p["dec_out_w"] @ p["j_fd_w"]
    dec_outJ_b = p["dec_out_b"] @ p["j_fd_w"]
    J = p["j_f_b"].shape[0]
    V = p["j_p_w"].shape[1]
    # TODO(synk): pad J/V to MXU-friendly multiples (256 on v6e/v7x, 128 on v5e) with
    #             -inf masking of padded vocab columns in the log-softmax.
    return {
        "enc_pre_w": p["enc_pre_w"].astype(bf16),
        "enc_pre_b": p["enc_pre_b"].reshape(1, -1).astype(f32),
        "enc_outJ_w": enc_outJ_w.astype(bf16),
        "enc_outJ_b": enc_outJ_b.reshape(1, -1).astype(f32),
        "dec_emb": p["dec_emb"].astype(f32),
        "dec_wih": p["dec_wih"].astype(bf16),
        "dec_b": p["dec_b"].reshape(1, -1).astype(f32),
        "dec_whh": p["dec_whh"].astype(bf16),
        "dec_outJ_w": dec_outJ_w.astype(bf16),
        "dec_outJ_b": dec_outJ_b.reshape(1, -1).astype(f32),
        "j_f_b": p["j_f_b"].reshape(1, J).astype(f32),
        "j_p_w": p["j_p_w"].astype(bf16),
        "j_p_wT": jnp.transpose(p["j_p_w"]).astype(bf16),      # (V, J) rows for label gather
        "j_p_b": p["j_p_b"].astype(f32),
        "j_p_b_row": p["j_p_b"].reshape(1, V).astype(f32),
    }


if __name__ == "__main__":
    B, T, FEAT = 2, 8, 16
    U, VOCAB = 6, 32
    ENC_H = ENC_O = 32
    DEC_H = DEC_O = 32
    JOINT_INNER = 64

    key = jax.random.PRNGKey(0)
    k_in, k_tgt, k_par = jax.random.split(key, 3)

    inputs = jax.random.normal(k_in, (B, T, FEAT), dtype=jnp.float32)
    inputs_length = jnp.array([T, T - 1], dtype=jnp.int32)
    targets = jax.random.randint(k_tgt, (B, U), 1, VOCAB, dtype=jnp.int32)
    targets_length = jnp.array([U, U - 1], dtype=jnp.int32)

    params = init_params(k_par, FEAT, ENC_H, ENC_O, DEC_H, DEC_O, JOINT_INNER, VOCAB)
    prepared = prepare_params(params)

    fwd = jax.jit(transducer_forward)
    loss = fwd(prepared, inputs, inputs_length, targets, targets_length)
    loss = jax.block_until_ready(loss)
    assert jnp.isfinite(loss), "loss is not finite"
    print("KERNEL_OK")
</pallas_src>

<mosaic_0001>
module attributes {stable_mosaic.version = 11 : i64} {
  func.func @_linear_kernel(%arg0: i32, %arg1: i32, %arg2: memref<14x32xf32, #tpu.memory_space<vmem>>, %arg3: memref<32x128xbf16, #tpu.memory_space<vmem>>, %arg4: memref<1x128xf32, #tpu.memory_space<vmem>>, %arg5: memref<14x128xf32, #tpu.memory_space<vmem>>) attributes {dimension_semantics = [#tpu.dimension_semantics<parallel>, #tpu.dimension_semantics<parallel>], iteration_bounds = array<i64: 1, 1>, scalar_prefetch = 0 : i64, scratch_operands = 0 : i64, tpu.core_type = #tpu.core_type<tc>, window_params = [{transform_indices = @transform_0, window_bounds = array<i64: 14, 32>}, {pipeline_mode = #tpu.pipeline_mode<synchronous>, transform_indices = @transform_1, window_bounds = array<i64: 32, 128>}, {pipeline_mode = #tpu.pipeline_mode<synchronous>, transform_indices = @transform_2, window_bounds = array<i64: 1, 128>}, {transform_indices = @transform_3, window_bounds = array<i64: 14, 128>}]} {
    %c0 = arith.constant 0 : index
    %c0_0 = arith.constant 0 : index
    %0 = vector.load %arg2[%c0, %c0_0] : memref<14x32xf32, #tpu.memory_space<vmem>>, vector<14x32xf32>
    %1 = arith.truncf %0 : vector<14x32xf32> to vector<14x32xbf16>
    %c0_1 = arith.constant 0 : index
    %c0_2 = arith.constant 0 : index
    %2 = vector.load %arg3[%c0_1, %c0_2] : memref<32x128xbf16, #tpu.memory_space<vmem>>, vector<32x128xbf16>
    %cst = arith.constant dense<0.000000e+00> : vector<14x128xf32>
    %3 = tpu.matmul %1, %2, %cst {dimension_numbers = #tpu.dot_dimension_numbers<[1], [0], [0], [1], [0, 0, 1, 1], [], []>} : vector<14x32xbf16>, vector<32x128xbf16>, vector<14x128xf32> -> vector<14x128xf32>
    %c0_3 = arith.constant 0 : index
    %c0_4 = arith.constant 0 : index
    %4 = vector.load %arg4[%c0_3, %c0_4] : memref<1x128xf32, #tpu.memory_space<vmem>>, vector<1x128xf32>
    %5 = vector.broadcast %4 : vector<1x128xf32> to vector<14x128xf32>
    %6 = arith.addf %3, %5 : vector<14x128xf32>
    %c0_5 = arith.constant 0 : index
    %c0_6 = arith.constant 0 : index
    %7 = vector.load %arg5[%c0_5, %c0_6] : memref<14x128xf32, #tpu.memory_space<vmem>>, vector<14x128xf32>
    tpu.vector_store %arg5[%c0_5, %c0_6], %6 {strides = array<i32>} : memref<14x128xf32, #tpu.memory_space<vmem>>, vector<14x128xf32>,
    return
  }
  func.func @transform_0(%arg0: i32, %arg1: i32) -> (i32, i32) {
    %c0_i32 = arith.constant 0 : i32
    %c0_i32_0 = arith.constant 0 : i32
    return %arg0, %c0_i32 : i32, i32
  }
  func.func @transform_1(%arg0: i32, %arg1: i32) -> (i32, i32) {
    %c0_i32 = arith.constant 0 : i32
    %c0_i32_0 = arith.constant 0 : i32
    return %c0_i32, %arg1 : i32, i32
  }
  func.func @transform_2(%arg0: i32, %arg1: i32) -> (i32, i32) {
    %c0_i32 = arith.constant 0 : i32
    %c0_i32_0 = arith.constant 0 : i32
    return %c0_i32, %arg1 : i32, i32
  }
  func.func @transform_3(%arg0: i32, %arg1: i32) -> (i32, i32) {
    %c0_i32 = arith.constant 0 : i32
    return %arg0, %arg1 : i32, i32
  }
}

module attributes {stable_mosaic.version = 11 : i64} {
  func.func @_linear_kernel(%arg0: i32, %arg1: i32, %arg2: memref<14x32xf32, #tpu.memory_space<vmem>>, %arg3: memref<32x64xbf16, #tpu.memory_space<vmem>>, %arg4: memref<1x64xf32, #tpu.memory_space<vmem>>, %arg5: memref<14x64xbf16, #tpu.memory_space<vmem>>) attributes {dimension_semantics = [#tpu.dimension_semantics<parallel>, #tpu.dimension_semantics<parallel>], iteration_bounds = array<i64: 1, 1>, scalar_prefetch = 0 : i64, scratch_operands = 0 : i64, tpu.core_type = #tpu.core_type<tc>, window_params = [{transform_indices = @transform_0, window_bounds = array<i64: 14, 32>}, {pipeline_mode = #tpu.pipeline_mode<synchronous>, transform_indices = @transform_1, window_bounds = array<i64: 32, 64>}, {pipeline_mode = #tpu.pipeline_mode<synchronous>, transform_indices = @transform_2, window_bounds = array<i64: 1, 64>}, {transform_indices = @transform_3, window_bounds = array<i64: 14, 64>}]} {
    %c0 = arith.constant 0 : index
    %c0_0 = arith.constant 0 : index
    %0 = vector.load %arg2[%c0, %c0_0] : memref<14x32xf32, #tpu.memory_space<vmem>>, vector<14x32xf32>
    %1 = arith.truncf %0 : vector<14x32xf32> to vector<14x32xbf16>
    %c0_1 = arith.constant 0 : index
    %c0_2 = arith.constant 0 : index
    %2 = vector.load %arg3[%c0_1, %c0_2] : memref<32x64xbf16, #tpu.memory_space<vmem>>, vector<32x64xbf16>
    %cst = arith.constant dense<0.000000e+00> : vector<14x64xf32>
    %3 = tpu.matmul %1, %2, %cst {dimension_numbers = #tpu.dot_dimension_numbers<[1], [0], [0], [1], [0, 0, 1, 1], [], []>} : vector<14x32xbf16>, vector<32x64xbf16>, vector<14x64xf32> -> vector<14x64xf32>
    %c0_3 = arith.constant 0 : index
    %c0_4 = arith.constant 0 : index
    %4 = vector.load %arg4[%c0_3, %c0_4] : memref<1x64xf32, #tpu.memory_space<vmem>>, vector<1x64xf32>
    %5 = vector.broadcast %4 : vector<1x64xf32> to vector<14x64xf32>
    %6 = arith.addf %3, %5 : vector<14x64xf32>
    %7 = arith.truncf %6 : vector<14x64xf32> to vector<14x64xbf16>
    %c0_5 = arith.constant 0 : index
    %c0_6 = arith.constant 0 : index
    %8 = vector.load %arg5[%c0_5, %c0_6] : memref<14x64xbf16, #tpu.memory_space<vmem>>, vector<14x64xbf16>
    tpu.vector_store %arg5[%c0_5, %c0_6], %7 {strides = array<i32>} : memref<14x64xbf16, #tpu.memory_space<vmem>>, vector<14x64xbf16>,
    return
  }
  func.func @transform_0(%arg0: i32, %arg1: i32) -> (i32, i32) {
    %c0_i32 = arith.constant 0 : i32
    %c0_i32_0 = arith.constant 0 : i32
    return %arg0, %c0_i32 : i32, i32
  }
  func.func @transform_1(%arg0: i32, %arg1: i32) -> (i32, i32) {
    %c0_i32 = arith.constant 0 : i32
    %c0_i32_0 = arith.constant 0 : i32
    return %c0_i32, %arg1 : i32, i32
  }
  func.func @transform_2(%arg0: i32, %arg1: i32) -> (i32, i32) {
    %c0_i32 = arith.constant 0 : i32
    %c0_i32_0 = arith.constant 0 : i32
    return %c0_i32, %arg1 : i32, i32
  }
  func.func @transform_3(%arg0: i32, %arg1: i32) -> (i32, i32) {
    %c0_i32 = arith.constant 0 : i32
    return %arg0, %arg1 : i32, i32
  }
}

module attributes {stable_mosaic.version = 11 : i64} {
  func.func @_lstm_kernel(%arg0: i32, %arg1: memref<7x2x128xf32, #tpu.memory_space<vmem>>, %arg2: memref<32x128xbf16, #tpu.memory_space<vmem>>, %arg3: memref<7x2x32xf32, #tpu.memory_space<vmem>>, %arg4: memref<2x32xf32, #tpu.memory_space<vmem>>, %arg5: memref<2x32xf32, #tpu.memory_space<vmem>>) attributes {dimension_semantics = [#tpu.dimension_semantics<arbitrary>], iteration_bounds = array<i64: 1>, scalar_prefetch = 0 : i64, scratch_operands = 2 : i64, tpu.core_type = #tpu.core_type<tc>, window_params = [{transform_indices = @transform_0, window_bounds = array<i64: 7, 2, 128>}, {pipeline_mode = #tpu.pipeline_mode<synchronous>, transform_indices = @transform_1, window_bounds = array<i64: 32, 128>}, {transform_indices = @transform_2, window_bounds = array<i64: 7, 2, 32>}]} {
    %c0_i32 = arith.constant 0 : i32
    %0 = arith.cmpi eq, %arg0, %c0_i32 : i32
    %1 = arith.extui %0 : i1 to i32
    %c0_i32_0 = arith.constant 0 : i32
    %2 = arith.cmpi ne, %1, %c0_i32_0 : i32
    scf.if %2 {
      %cst_133 = arith.constant 0.000000e+00 : f32
      %269 = vector.broadcast %cst_133 : f32 to vector<2x32xf32>
      %c0_134 = arith.constant 0 : index
      %c0_135 = arith.constant 0 : index
      %270 = vector.load %arg4[%c0_134, %c0_135] : memref<2x32xf32, #tpu.memory_space<vmem>>, vector<2x32xf32>
      tpu.vector_store %arg4[%c0_134, %c0_135], %269 {strides = array<i32>} : memref<2x32xf32, #tpu.memory_space<vmem>>, vector<2x32xf32>,
      %cst_136 = arith.constant 0.000000e+00 : f32
      %271 = vector.broadcast %cst_136 : f32 to vector<2x32xf32>
      %c0_137 = arith.constant 0 : index
      %c0_138 = arith.constant 0 : index
      %272 = vector.load %arg5[%c0_137, %c0_138] : memref<2x32xf32, #tpu.memory_space<vmem>>, vector<2x32xf32>
      tpu.vector_store %arg5[%c0_137, %c0_138], %271 {strides = array<i32>} : memref<2x32xf32, #tpu.memory_space<vmem>>, vector<2x32xf32>,
    } else {
    }
    %c0 = arith.constant 0 : index
    %c0_1 = arith.constant 0 : index
    %c0_2 = arith.constant 0 : index
    %3 = vector.load %arg1[%c0, %c0_1, %c0_2] : memref<7x2x128xf32, #tpu.memory_space<vmem>>, vector<1x2x128xf32>
    %4 = vector.shape_cast %3 : vector<1x2x128xf32> to vector<2x128xf32>
    %c0_3 = arith.constant 0 : index
    %c0_4 = arith.constant 0 : index
    %5 = vector.load %arg4[%c0_3, %c0_4] : memref<2x32xf32, #tpu.memory_space<vmem>>, vector<2x32xf32>
    %6 = arith.truncf %5 : vector<2x32xf32> to vector<2x32xbf16>
    %c0_5 = arith.constant 0 : index
    %c0_6 = arith.constant 0 : index
    %7 = vector.load %arg2[%c0_5, %c0_6] : memref<32x128xbf16, #tpu.memory_space<vmem>>, vector<32x128xbf16>
    %cst = arith.constant dense<0.000000e+00> : vector<2x128xf32>
    %8 = tpu.matmul %6, %7, %cst {dimension_numbers = #tpu.dot_dimension_numbers<[1], [0], [0], [1], [0, 0, 1, 1], [], []>} : vector<2x32xbf16>, vector<32x128xbf16>, vector<2x128xf32> -> vector<2x128xf32>
    %9 = arith.addf %4, %8 : vector<2x128xf32>
    %10 = vector.extract_strided_slice %9 {offsets = [0, 0], sizes = [2, 32], strides = [1, 1]} : vector<2x128xf32> to vector<2x32xf32>
    %11 = arith.negf %10 : vector<2x32xf32>
    %12 = math.exp %11 : vector<2x32xf32>
    %cst_7 = arith.constant 1.000000e+00 : f32
    %13 = vector.broadcast %cst_7 : f32 to vector<2x32xf32>
    %14 = arith.addf %13, %12 : vector<2x32xf32>
    %15 = arith.divf %13, %14 : vector<2x32xf32>
    %16 = vector.extract_strided_slice %9 {offsets = [0, 32], sizes = [2, 32], strides = [1, 1]} : vector<2x128xf32> to vector<2x32xf32>
    %17 = arith.negf %16 : vector<2x32xf32>
    %18 = math.exp %17 : vector<2x32xf32>
    %cst_8 = arith.constant 1.000000e+00 : f32
    %19 = vector.broadcast %cst_8 : f32 to vector<2x32xf32>
    %20 = arith.addf %19, %18 : vector<2x32xf32>
    %21 = arith.divf %19, %20 : vector<2x32xf32>
    %22 = vector.extract_strided_slice %9 {offsets = [0, 64], sizes = [2, 32], strides = [1, 1]} : vector<2x128xf32> to vector<2x32xf32>
    %23 = math.tanh %22 : vector<2x32xf32>
    %24 = vector.extract_strided_slice %9 {offsets = [0, 96], sizes = [2, 32], strides = [1, 1]} : vector<2x128xf32> to vector<2x32xf32>
    %25 = arith.negf %24 : vector<2x32xf32>
    %26 = math.exp %25 : vector<2x32xf32>
    %cst_9 = arith.constant 1.000000e+00 : f32
    %27 = vector.broadcast %cst_9 : f32 to vector<2x32xf32>
    %28 = arith.addf %27, %26 : vector<2x32xf32>
    %29 = arith.divf %27, %28 : vector<2x32xf32>
    %c0_10 = arith.constant 0 : index
    %c0_11 = arith.constant 0 : index
    %30 = vector.load %arg5[%c0_10, %c0_11] : memref<2x32xf32, #tpu.memory_space<vmem>>, vector<2x32xf32>
    %31 = arith.mulf %21, %30 : vector<2x32xf32>
    %32 = arith.mulf %15, %23 : vector<2x32xf32>
    %33 = arith.addf %31, %32 : vector<2x32xf32>
    %34 = math.tanh %33 : vector<2x32xf32>
    %35 = arith.mulf %29, %34 : vector<2x32xf32>
    %c0_12 = arith.constant 0 : index
    %c0_13 = arith.constant 0 : index
    %36 = vector.load %arg5[%c0_12, %c0_13] : memref<2x32xf32, #tpu.memory_space<vmem>>, vector<2x32xf32>
    tpu.vector_store %arg5[%c0_12, %c0_13], %33 {strides = array<i32>} : memref<2x32xf32, #tpu.memory_space<vmem>>, vector<2x32xf32>,
    %c0_14 = arith.constant 0 : index
    %c0_15 = arith.constant 0 : index
    %37 = vector.load %arg4[%c0_14, %c0_15] : memref<2x32xf32, #tpu.memory_space<vmem>>, vector<2x32xf32>
    tpu.vector_store %arg4[%c0_14, %c0_15], %35 {strides = array<i32>} : memref<2x32xf32, #tpu.memory_space<vmem>>, vector<2x32xf32>,
    %c0_16 = arith.constant 0 : index
    %c0_17 = arith.constant 0 : index
    %c0_18 = arith.constant 0 : index
    %38 = vector.load %arg3[%c0_16, %c0_17, %c0_18] : memref<7x2x32xf32, #tpu.memory_space<vmem>>, vector<1x2x32xf32>
    %39 = vector.shape_cast %38 : vector<1x2x32xf32> to vector<2x32xf32>
    %40 = vector.shape_cast %35 : vector<2x32xf32> to vector<1x2x32xf32>
    tpu.vector_store %arg3[%c0_16, %c0_17, %c0_18], %40 {strides = array<i32>} : memref<7x2x32xf32, #tpu.memory_space<vmem>>, vector<1x2x32xf32>,
    %c1 = arith.constant 1 : index
    %c0_19 = arith.constant 0 : index
    %c0_20 = arith.constant 0 : index
    %41 = vector.load %arg1[%c1, %c0_19, %c0_20] : memref<7x2x128xf32, #tpu.memory_space<vmem>>, vector<1x2x128xf32>
    %42 = vector.shape_cast %41 : vector<1x2x128xf32> to vector<2x128xf32>
    %c0_21 = arith.constant 0 : index
    %c0_22 = arith.constant 0 : index
    %43 = vector.load %arg4[%c0_21, %c0_22] : memref<2x32xf32, #tpu.memory_space<vmem>>, vector<2x32xf32>
    %44 = arith.truncf %43 : vector<2x32xf32> to vector<2x32xbf16>
    %c0_23 = arith.constant 0 : index
    %c0_24 = arith.constant 0 : index
    %45 = vector.load %arg2[%c0_23, %c0_24] : memref<32x128xbf16, #tpu.memory_space<vmem>>, vector<32x128xbf16>
    %cst_25 = arith.constant dense<0.000000e+00> : vector<2x128xf32>
    %46 = tpu.matmul %44, %45, %cst_25 {dimension_numbers = #tpu.dot_dimension_numbers<[1], [0], [0], [1], [0, 0, 1, 1], [], []>} : vector<2x32xbf16>, vector<32x128xbf16>, vector<2x128xf32> -> vector<2x128xf32>
    %47 = arith.addf %42, %46 : vector<2x128xf32>
    %48 = vector.extract_strided_slice %47 {offsets = [0, 0], sizes = [2, 32], strides = [1, 1]} : vector<2x128xf32> to vector<2x32xf32>
    %49 = arith.negf %48 : vector<2x32xf32>
    %50 = math.exp %49 : vector<2x32xf32>
    %cst_26 = arith.constant 1.000000e+00 : f32
    %51 = vector.broadcast %cst_26 : f32 to vector<2x32xf32>
    %52 = arith.addf %51, %50 : vector<2x32xf32>
    %53 = arith.divf %51, %52 : vector<2x32xf32>
    %54 = vector.extract_strided_slice %47 {offsets = [0, 32], sizes = [2, 32], strides = [1, 1]} : vector<2x128xf32> to vector<2x32xf32>
    %55 = arith.negf %54 : vector<2x32xf32>
    %56 = math.exp %55 : vector<2x32xf32>
    %cst_27 = arith.constant 1.000000e+00 : f32
    %57 = vector.broadcast %cst_27 : f32 to vector<2x32xf32>
    %58 = arith.addf %57, %56 : vector<2x32xf32>
    %59 = arith.divf %57, %58 : vector<2x32xf32>
    %60 = vector.extract_strided_slice %47 {offsets = [0, 64], sizes = [2, 32], strides = [1, 1]} : vector<2x128xf32> to vector<2x32xf32>
    %61 = math.tanh %60 : vector<2x32xf32>
    %62 = vector.extract_strided_slice %47 {offsets = [0, 96], sizes = [2, 32], strides = [1, 1]} : vector<2x128xf32> to vector<2x32xf32>
    %63 = arith.negf %62 : vector<2x32xf32>
    %64 = math.exp %63 : vector<2x32xf32>
    %cst_28 = arith.constant 1.000000e+00 : f32
    %65 = vector.broadcast %cst_28 : f32 to vector<2x32xf32>
    %66 = arith.addf %65, %64 : vector<2x32xf32>
    %67 = arith.divf %65, %66 : vector<2x32xf32>
    %c0_29 = arith.constant 0 : index
    %c0_30 = arith.constant 0 : index
    %68 = vector.load %arg5[%c0_29, %c0_30] : memref<2x32xf32, #tpu.memory_space<vmem>>, vector<2x32xf32>
    %69 = arith.mulf %59, %68 : vector<2x32xf32>
    %70 = arith.mulf %53, %61 : vector<2x32xf32>
    %71 = arith.addf %69, %70 : vector<2x32xf32>
    %72 = math.tanh %71 : vector<2x32xf32>
    %73 = arith.mulf %67, %72 : vector<2x32xf32>
    %c0_31 = arith.constant 0 : index
    %c0_32 = arith.constant 0 : index
    %74 = vector.load %arg5[%c0_31, %c0_32] : memref<2x32xf32, #tpu.memory_space<vmem>>, vector<2x32xf32>
    tpu.vector_store %arg5[%c0_31, %c0_32], %71 {strides = array<i32>} : memref<2x32xf32, #tpu.memory_space<vmem>>, vector<2x32xf32>,
    %c0_33 = arith.constant 0 : index
    %c0_34 = arith.constant 0 : index
    %75 = vector.load %arg4[%c0_33, %c0_34] : memref<2x32xf32, #tpu.memory_space<vmem>>, vector<2x32xf32>
    tpu.vector_store %arg4[%c0_33, %c0_34], %73 {strides = array<i32>} : memref<2x32xf32, #tpu.memory_space<vmem>>, vector<2x32xf32>,
    %c1_35 = arith.constant 1 : index
    %c0_36 = arith.constant 0 : index
    %c0_37 = arith.constant 0 : index
    %76 = vector.load %arg3[%c1_35, %c0_36, %c0_37] : memref<7x2x32xf32, #tpu.memory_space<vmem>>, vector<1x2x32xf32>
    %77 = vector.shape_cast %76 : vector<1x2x32xf32> to vector<2x32xf32>
    %78 = vector.shape_cast %73 : vector<2x32xf32> to vector<1x2x32xf32>
    tpu.vector_store %arg3[%c1_35, %c0_36, %c0_37], %78 {strides = array<i32>} : memref<7x2x32xf32, #tpu.memory_space<vmem>>, vector<1x2x32xf32>,
    %c2 = arith.constant 2 : index
    %c0_38 = arith.constant 0 : index
    %c0_39 = arith.constant 0 : index
    %79 = vector.load %arg1[%c2, %c0_38, %c0_39] : memref<7x2x128xf32, #tpu.memory_space<vmem>>, vector<1x2x128xf32>
    %80 = vector.shape_cast %79 : vector<1x2x128xf32> to vector<2x128xf32>
    %c0_40 = arith.constant 0 : index
    %c0_41 = arith.constant 0 : index
    %81 = vector.load %arg4[%c0_40, %c0_41] : memref<2x32xf32, #tpu.memory_space<vmem>>, vector<2x32xf32>
    %82 = arith.truncf %81 : vector<2x32xf32> to vector<2x32xbf16>
    %c0_42 = arith.constant 0 : index
    %c0_43 = arith.constant 0 : index
    %83 = vector.load %arg2[%c0_42, %c0_43] : memref<32x128xbf16, #tpu.memory_space<vmem>>, vector<32x128xbf16>
    %cst_44 = arith.constant dense<0.000000e+00> : vector<2x128xf32>
    %84 = tpu.matmul %82, %83, %cst_44 {dimension_numbers = #tpu.dot_dimension_numbers<[1], [0], [0], [1], [0, 0, 1, 1], [], []>} : vector<2x32xbf16>, vector<32x128xbf16>, vector<2x128xf32> -> vector<2x128xf32>
    %85 = arith.addf %80, %84 : vector<2x128xf32>
    %86 = vector.extract_strided_slice %85 {offsets = [0, 0], sizes = [2, 32], strides = [1, 1]} : vector<2x128xf32> to vector<2x32xf32>
    %87 = arith.negf %86 : vector<2x32xf32>
    %88 = math.exp %87 : vector<2x32xf32>
    %cst_45 = arith.constant 1.000000e+00 : f32
    %89 = vector.broadcast %cst_45 : f32 to vector<2x32xf32>
    %90 = arith.addf %89, %88 : vector<2x32xf32>
    %91 = arith.divf %89, %90 : vector<2x32xf32>
    %92 = vector.extract_strided_slice %85 {offsets = [0, 32], sizes = [2, 32], strides = [1, 1]} : vector<2x128xf32> to vector<2x32xf32>
    %93 = arith.negf %92 : vector<2x32xf32>
    %94 = math.exp %93 : vector<2x32xf32>
    %cst_46 = arith.constant 1.000000e+00 : f32
    %95 = vector.broadcast %cst_46 : f32 to vector<2x32xf32>
    %96 = arith.addf %95, %94 : vector<2x32xf32>
    %97 = arith.divf %95, %96 : vector<2x32xf32>
    %98 = vector.extract_strided_slice %85 {offsets = [0, 64], sizes = [2, 32], strides = [1, 1]} : vector<2x128xf32> to vector<2x32xf32>
    %99 = math.tanh %98 : vector<2x32xf32>
    %100 = vector.extract_strided_slice %85 {offsets = [0, 96], sizes = [2, 32], strides = [1, 1]} : vector<2x128xf32> to vector<2x32xf32>
    %101 = arith.negf %100 : vector<2x32xf32>
    %102 = math.exp %101 : vector<2x32xf32>
    %cst_47 = arith.constant 1.000000e+00 : f32
    %103 = vector.broadcast %cst_47 : f32 to vector<2x32xf32>
    %104 = arith.addf %103, %102 : vector<2x32xf32>
    %105 = arith.divf %103, %104 : vector<2x32xf32>
    %c0_48 = arith.constant 0 : index
    %c0_49 = arith.constant 0 : index
    %106 = vector.load %arg5[%c0_48, %c0_49] : memref<2x32xf32, #tpu.memory_space<vmem>>, vector<2x32xf32>
    %107 = arith.mulf %97, %106 : vector<2x32xf32>
    %108 = arith.mulf %91, %99 : vector<2x32xf32>
    %109 = arith.addf %107, %108 : vector<2x32xf32>
    %110 = math.tanh %109 : vector<2x32xf32>
    %111 = arith.mulf %105, %110 : vector<2x32xf32>
    %c0_50 = arith.constant 0 : index
    %c0_51 = arith.constant 0 : index
    %112 = vector.load %arg5[%c0_50, %c0_51] : memref<2x32xf32, #tpu.memory_space<vmem>>, vector<2x32xf32>
    tpu.vector_store %arg5[%c0_50, %c0_51], %109 {strides = array<i32>} : memref<2x32xf32, #tpu.memory_space<vmem>>, vector<2x32xf32>,
    %c0_52 = arith.constant 0 : index
    %c0_53 = arith.constant 0 : index
    %113 = vector.load %arg4[%c0_52, %c0_53] : memref<2x32xf32, #tpu.memory_space<vmem>>, vector<2x32xf32>
    tpu.vector_store %arg4[%c0_52, %c0_53], %111 {strides = array<i32>} : memref<2x32xf32, #tpu.memory_space<vmem>>, vector<2x32xf32>,
    %c2_54 = arith.constant 2 : index
    %c0_55 = arith.constant 0 : index
    %c0_56 = arith.constant 0 : index
    %114 = vector.load %arg3[%c2_54, %c0_55, %c0_56] : memref<7x2x32xf32, #tpu.memory_space<vmem>>, vector<1x2x32xf32>
    %115 = vector.shape_cast %114 : vector<1x2x32xf32> to vector<2x32xf32>
    %116 = vector.shape_cast %111 : vector<2x32xf32> to vector<1x2x32xf32>
    tpu.vector_store %arg3[%c2_54, %c0_55, %c0_56], %116 {strides = array<i32>} : memref<7x2x32xf32, #tpu.memory_space<vmem>>, vector<1x2x32xf32>,
    %c3 = arith.constant 3 : index
    %c0_57 = arith.constant 0 : index
    %c0_58 = arith.constant 0 : index
    %117 = vector.load %arg1[%c3, %c0_57, %c0_58] : memref<7x2x128xf32, #tpu.memory_space<vmem>>, vector<1x2x128xf32>
    %118 = vector.shape_cast %117 : vector<1x2x128xf32> to vector<2x128xf32>
    %c0_59 = arith.constant 0 : index
    %c0_60 = arith.constant 0 : index
    %119 = vector.load %arg4[%c0_59, %c0_60] : memref<2x32xf32, #tpu.memory_space<vmem>>, vector<2x32xf32>
    %120 = arith.truncf %119 : vector<2x32xf32> to vector<2x32xbf16>
    %c0_61 = arith.constant 0 : index
    %c0_62 = arith.constant 0 : index
    %121 = vector.load %arg2[%c0_61, %c0_62] : memref<32x128xbf16, #tpu.memory_space<vmem>>, vector<32x128xbf16>
    %cst_63 = arith.constant dense<0.000000e+00> : vector<2x128xf32>
    %122 = tpu.matmul %120, %121, %cst_63 {dimension_numbers = #tpu.dot_dimension_numbers<[1], [0], [0], [1], [0, 0, 1, 1], [], []>} : vector<2x32xbf16>, vector<32x128xbf16>, vector<2x128xf32> -> vector<2x128xf32>
    %123 = arith.addf %118, %122 : vector<2x128xf32>
    %124 = vector.extract_strided_slice %123 {offsets = [0, 0], sizes = [2, 32], strides = [1, 1]} : vector<2x128xf32> to vector<2x32xf32>
    %125 = arith.negf %124 : vector<2x32xf32>
    %126 = math.exp %125 : vector<2x32xf32>
    %cst_64 = arith.constant 1.000000e+00 : f32
    %127 = vector.broadcast %cst_64 : f32 to vector<2x32xf32>
    %128 = arith.addf %127, %126 : vector<2x32xf32>
    %129 = arith.divf %127, %128 : vector<2x32xf32>
    %130 = vector.extract_strided_slice %123 {offsets = [0, 32], sizes = [2, 32], strides = [1, 1]} : vector<2x128xf32> to vector<2x32xf32>
    %131 = arith.negf %130 : vector<2x32xf32>
    %132 = math.exp %131 : vector<2x32xf32>
    %cst_65 = arith.constant 1.000000e+00 : f32
    %133 = vector.broadcast %cst_65 : f32 to vector<2x32xf32>
    %134 = arith.addf %133, %132 : vector<2x32xf32>
    %135 = arith.divf %133, %134 : vector<2x32xf32>
    %136 = vector.extract_strided_slice %123 {offsets = [0, 64], sizes = [2, 32], strides = [1, 1]} : vector<2x128xf32> to vector<2x32xf32>
    %137 = math.tanh %136 : vector<2x32xf32>
    %138 = vector.extract_strided_slice %123 {offsets = [0, 96], sizes = [2, 32], strides = [1, 1]} : vector<2x128xf32> to vector<2x32xf32>
    %139 = arith.negf %138 : vector<2x32xf32>
    %140 = math.exp %139 : vector<2x32xf32>
    %cst_66 = arith.constant 1.000000e+00 : f32
    %141 = vector.broadcast %cst_66 : f32 to vector<2x32xf32>
    %142 = arith.addf %141, %140 : vector<2x32xf32>
    %143 = arith.divf %141, %142 : vector<2x32xf32>
    %c0_67 = arith.constant 0 : index
    %c0_68 = arith.constant 0 : index
    %144 = vector.load %arg5[%c0_67, %c0_68] : memref<2x32xf32, #tpu.memory_space<vmem>>, vector<2x32xf32>
    %145 = arith.mulf %135, %144 : vector<2x32xf32>
    %146 = arith.mulf %129, %137 : vector<2x32xf32>
    %147 = arith.addf %145, %146 : vector<2x32xf32>
    %148 = math.tanh %147 : vector<2x32xf32>
    %149 = arith.mulf %143, %148 : vector<2x32xf32>
    %c0_69 = arith.constant 0 : index
    %c0_70 = arith.constant 0 : index
    %150 = vector.load %arg5[%c0_69, %c0_70] : memref<2x32xf32, #tpu.memory_space<vmem>>, vector<2x32xf32>
    tpu.vector_store %arg5[%c0_69, %c0_70], %147 {strides = array<i32>} : memref<2x32xf32, #tpu.memory_space<vmem>>, vector<2x32xf32>,
    %c0_71 = arith.constant 0 : index
    %c0_72 = arith.constant 0 : index
    %151 = vector.load %arg4[%c0_71, %c0_72] : memref<2x32xf32, #tpu.memory_space<vmem>>, vector<2x32xf32>
    tpu.vector_store %arg4[%c0_71, %c0_72], %149 {strides = array<i32>} : memref<2x32xf32, #tpu.memory_space<vmem>>, vector<2x32xf32>,
    %c3_73 = arith.constant 3 : index
    %c0_74 = arith.constant 0 : index
    %c0_75 = arith.constant 0 : index
    %152 = vector.load %arg3[%c3_73, %c0_74, %c0_75] : memref<7x2x32xf32, #tpu.memory_space<vmem>>, vector<1x2x32xf32>
    %153 = vector.shape_cast %152 : vector<1x2x32xf32> to vector<2x32xf32>
    %154 = vector.shape_cast %149 : vector<2x32xf32> to vector<1x2x32xf32>
    tpu.vector_store %arg3[%c3_73, %c0_74, %c0_75], %154 {strides = array<i32>} : memref<7x2x32xf32, #tpu.memory_space<vmem>>, vector<1x2x32xf32>,
    %c4 = arith.constant 4 : index
    %c0_76 = arith.constant 0 : index
    %c0_77 = arith.constant 0 : index
    %155 = vector.load %arg1[%c4, %c0_76, %c0_77] : memref<7x2x128xf32, #tpu.memory_space<vmem>>, vector<1x2x128xf32>
    %156 = vector.shape_cast %155 : vector<1x2x128xf32> to vector<2x128xf32>
    %c0_78 = arith.constant 0 : index
    %c0_79 = arith.constant 0 : index
    %157 = vector.load %arg4[%c0_78, %c0_79] : memref<2x32xf32, #tpu.memory_space<vmem>>, vector<2x32xf32>
    %158 = arith.truncf %157 : vector<2x32xf32> to vector<2x32xbf16>
    %c0_80 = arith.constant 0 : index
    %c0_81 = arith.constant 0 : index
    %159 = vector.load %arg2[%c0_80, %c0_81] : memref<32x128xbf16, #tpu.memory_space<vmem>>, vector<32x128xbf16>
    %cst_82 = arith.constant dense<0.000000e+00> : vector<2x128xf32>
    %160 = tpu.matmul %158, %159, %cst_82 {dimension_numbers = #tpu.dot_dimension_numbers<[1], [0], [0], [1], [0, 0, 1, 1], [], []>} : vector<2x32xbf16>, vector<32x128xbf16>, vector<2x128xf32> -> vector<2x128xf32>
    %161 = arith.addf %156, %160 : vector<2x128xf32>
    %162 = vector.extract_strided_slice %161 {offsets = [0, 0], sizes = [2, 32], strides = [1, 1]} : vector<2x128xf32> to vector<2x32xf32>
    %163 = arith.negf %162 : vector<2x32xf32>
    %164 = math.exp %163 : vector<2x32xf32>
    %cst_83 = arith.constant 1.000000e+00 : f32
    %165 = vector.broadcast %cst_83 : f32 to vector<2x32xf32>
    %166 = arith.addf %165, %164 : vector<2x32xf32>
    %167 = arith.divf %165, %166 : vector<2x32xf32>
    %168 = vector.extract_strided_slice %161 {offsets = [0, 32], sizes = [2, 32], strides = [1, 1]} : vector<2x128xf32> to vector<2x32xf32>
    %169 = arith.negf %168 : vector<2x32xf32>
    %170 = math.exp %169 : vector<2x32xf32>
    %cst_84 = arith.constant 1.000000e+00 : f32
    %171 = vector.broadcast %cst_84 : f32 to vector<2x32xf32>
    %172 = arith.addf %171, %170 : vector<2x32xf32>
    %173 = arith.divf %171, %172 : vector<2x32xf32>
    %174 = vector.extract_strided_slice %161 {offsets = [0, 64], sizes = [2, 32], strides = [1, 1]} : vector<2x128xf32> to vector<2x32xf32>
    %175 = math.tanh %174 : vector<2x32xf32>
    %176 = vector.extract_strided_slice %161 {offsets = [0, 96], sizes = [2, 32], strides = [1, 1]} : vector<2x128xf32> to vector<2x32xf32>
    %177 = arith.negf %176 : vector<2x32xf32>
    %178 = math.exp %177 : vector<2x32xf32>
    %cst_85 = arith.constant 1.000000e+00 : f32
    %179 = vector.broadcast %cst_85 : f32 to vector<2x32xf32>
    %180 = arith.addf %179, %178 : vector<2x32xf32>
    %181 = arith.divf %179, %180 : vector<2x32xf32>
    %c0_86 = arith.constant 0 : index
    %c0_87 = arith.constant 0 : index
    %182 = vector.load %arg5[%c0_86, %c0_87] : memref<2x32xf32, #tpu.memory_space<vmem>>, vector<2x32xf32>
    %183 = arith.mulf %173, %182 : vector<2x32xf32>
    %184 = arith.mulf %167, %175 : vector<2x32xf32>
    %185 = arith.addf %183, %184 : vector<2x32xf32>
    %186 = math.tanh %185 : vector<2x32xf32>
    %187 = arith.mulf %181, %186 : vector<2x32xf32>
    %c0_88 = arith.constant 0 : index
    %c0_89 = arith.constant 0 : index
    %188 = vector.load %arg5[%c0_88, %c0_89] : memref<2x32xf32, #tpu.memory_space<vmem>>, vector<2x32xf32>
    tpu.vector_store %arg5[%c0_88, %c0_89], %185 {strides = array<i32>} : memref<2x32xf32, #tpu.memory_space<vmem>>, vector<2x32xf32>,
    %c0_90 = arith.constant 0 : index
    %c0_91 = arith.constant 0 : index
    %189 = vector.load %arg4[%c0_90, %c0_91] : memref<2x32xf32, #tpu.memory_space<vmem>>, vector<2x32xf32>
    tpu.vector_store %arg4[%c0_90, %c0_91], %187 {strides = array<i32>} : memref<2x32xf32, #tpu.memory_space<vmem>>, vector<2x32xf32>,
    %c4_92 = arith.constant 4 : index
    %c0_93 = arith.constant 0 : index
    %c0_94 = arith.constant 0 : index
    %190 = vector.load %arg3[%c4_92, %c0_93, %c0_94] : memref<7x2x32xf32, #tpu.memory_space<vmem>>, vector<1x2x32xf32>
    %191 = vector.shape_cast %190 : vector<1x2x32xf32> to vector<2x32xf32>
    %192 = vector.shape_cast %187 : vector<2x32xf32> to vector<1x2x32xf32>
    tpu.vector_store %arg3[%c4_92, %c0_93, %c0_94], %192 {strides = array<i32>} : memref<7x2x32xf32, #tpu.memory_space<vmem>>, vector<1x2x32xf32>,
    %c5 = arith.constant 5 : index
    %c0_95 = arith.constant 0 : index
    %c0_96 = arith.constant 0 : index
    %193 = vector.load %arg1[%c5, %c0_95, %c0_96] : memref<7x2x128xf32, #tpu.memory_space<vmem>>, vector<1x2x128xf32>
    %194 = vector.shape_cast %193 : vector<1x2x128xf32> to vector<2x128xf32>
    %c0_97 = arith.constant 0 : index
    %c0_98 = arith.constant 0 : index
    %195 = vector.load %arg4[%c0_97, %c0_98] : memref<2x32xf32, #tpu.memory_space<vmem>>, vector<2x32xf32>
    %196 = arith.truncf %195 : vector<2x32xf32> to vector<2x32xbf16>
    %c0_99 = arith.constant 0 : index
    %c0_100 = arith.constant 0 : index
    %197 = vector.load %arg2[%c0_99, %c0_100] : memref<32x128xbf16, #tpu.memory_space<vmem>>, vector<32x128xbf16>
    %cst_101 = arith.constant dense<0.000000e+00> : vector<2x128xf32>
    %198 = tpu.matmul %196, %197, %cst_101 {dimension_numbers = #tpu.dot_dimension_numbers<[1], [0], [0], [1], [0, 0, 1, 1], [], []>} : vector<2x32xbf16>, vector<32x128xbf16>, vector<2x128xf32> -> vector<2x128xf32>
    %199 = arith.addf %194, %198 : vector<2x128xf32>
    %200 = vector.extract_strided_slice %199 {offsets = [0, 0], sizes = [2, 32], strides = [1, 1]} : vector<2x128xf32> to vector<2x32xf32>
    %201 = arith.negf %200 : vector<2x32xf32>
    %202 = math.exp %201 : vector<2x32xf32>
    %cst_102 = arith.constant 1.000000e+00 : f32
    %203 = vector.broadcast %cst_102 : f32 to vector<2x32xf32>
    %204 = arith.addf %203, %202 : vector<2x32xf32>
    %205 = arith.divf %203, %204 : vector<2x32xf32>
    %206 = vector.extract_strided_slice %199 {offsets = [0, 32], sizes = [2, 32], strides = [1, 1]} : vector<2x128xf32> to vector<2x32xf32>
    %207 = arith.negf %206 : vector<2x32xf32>
    %208 = math.exp %207 : vector<2x32xf32>
    %cst_103 = arith.constant 1.000000e+00 : f32
    %209 = vector.broadcast %cst_103 : f32 to vector<2x32xf32>
    %210 = arith.addf %209, %208 : vector<2x32xf32>
    %211 = arith.divf %209, %210 : vector<2x32xf32>
    %212 = vector.extract_strided_slice %199 {offsets = [0, 64], sizes = [2, 32], strides = [1, 1]} : vector<2x128xf32> to vector<2x32xf32>
    %213 = math.tanh %212 : vector<2x32xf32>
    %214 = vector.extract_strided_slice %199 {offsets = [0, 96], sizes = [2, 32], strides = [1, 1]} : vector<2x128xf32> to vector<2x32xf32>
    %215 = arith.negf %214 : vector<2x32xf32>
    %216 = math.exp %215 : vector<2x32xf32>
    %cst_104 = arith.constant 1.000000e+00 : f32
    %217 = vector.broadcast %cst_104 : f32 to vector<2x32xf32>
    %218 = arith.addf %217, %216 : vector<2x32xf32>
    %219 = arith.divf %217, %218 : vector<2x32xf32>
    %c0_105 = arith.constant 0 : index
    %c0_106 = arith.constant 0 : index
    %220 = vector.load %arg5[%c0_105, %c0_106] : memref<2x32xf32, #tpu.memory_space<vmem>>, vector<2x32xf32>
    %221 = arith.mulf %211, %220 : vector<2x32xf32>
    %222 = arith.mulf %205, %213 : vector<2x32xf32>
    %223 = arith.addf %221, %222 : vector<2x32xf32>
    %224 = math.tanh %223 : vector<2x32xf32>
    %225 = arith.mulf %219, %224 : vector<2x32xf32>
    %c0_107 = arith.constant 0 : index
    %c0_108 = arith.constant 0 : index
    %226 = vector.load %arg5[%c0_107, %c0_108] : memref<2x32xf32, #tpu.memory_space<vmem>>, vector<2x32xf32>
    tpu.vector_store %arg5[%c0_107, %c0_108], %223 {strides = array<i32>} : memref<2x32xf32, #tpu.memory_space<vmem>>, vector<2x32xf32>,
    %c0_109 = arith.constant 0 : index
    %c0_110 = arith.constant 0 : index
    %227 = vector.load %arg4[%c0_109, %c0_110] : memref<2x32xf32, #tpu.memory_space<vmem>>, vector<2x32xf32>
    tpu.vector_store %arg4[%c0_109, %c0_110], %225 {strides = array<i32>} : memref<2x32xf32, #tpu.memory_space<vmem>>, vector<2x32xf32>,
    %c5_111 = arith.constant 5 : index
    %c0_112 = arith.constant 0 : index
    %c0_113 = arith.constant 0 : index
    %228 = vector.load %arg3[%c5_111, %c0_112, %c0_113] : memref<7x2x32xf32, #tpu.memory_space<vmem>>, vector<1x2x32xf32>
    %229 = vector.shape_cast %228 : vector<1x2x32xf32> to vector<2x32xf32>
    %230 = vector.shape_cast %225 : vector<2x32xf32> to vector<1x2x32xf32>
    tpu.vector_store %arg3[%c5_111, %c0_112, %c0_113], %230 {strides = array<i32>} : memref<7x2x32xf32, #tpu.memory_space<vmem>>, vector<1x2x32xf32>,
    %c6 = arith.constant 6 : index
    %c0_114 = arith.constant 0 : index
    %c0_115 = arith.constant 0 : index
    %231 = vector.load %arg1[%c6, %c0_114, %c0_115] : memref<7x2x128xf32, #tpu.memory_space<vmem>>, vector<1x2x128xf32>
    %232 = vector.shape_cast %231 : vector<1x2x128xf32> to vector<2x128xf32>
    %c0_116 = arith.constant 0 : index
    %c0_117 = arith.constant 0 : index
    %233 = vector.load %arg4[%c0_116, %c0_117] : memref<2x32xf32, #tpu.memory_space<vmem>>, vector<2x32xf32>
    %234 = arith.truncf %233 : vector<2x32xf32> to vector<2x32xbf16>
    %c0_118 = arith.constant 0 : index
    %c0_119 = arith.constant 0 : index
    %235 = vector.load %arg2[%c0_118, %c0_119] : memref<32x128xbf16, #tpu.memory_space<vmem>>, vector<32x128xbf16>
    %cst_120 = arith.constant dense<0.000000e+00> : vector<2x128xf32>
    %236 = tpu.matmul %234, %235, %cst_120 {dimension_numbers = #tpu.dot_dimension_numbers<[1], [0], [0], [1], [0, 0, 1, 1], [], []>} : vector<2x32xbf16>, vector<32x128xbf16>, vector<2x128xf32> -> vector<2x128xf32>
    %237 = arith.addf %232, %236 : vector<2x128xf32>
    %238 = vector.extract_strided_slice %237 {offsets = [0, 0], sizes = [2, 32], strides = [1, 1]} : vector<2x128xf32> to vector<2x32xf32>
    %239 = arith.negf %238 : vector<2x32xf32>
    %240 = math.exp %239 : vector<2x32xf32>
    %cst_121 = arith.constant 1.000000e+00 : f32
    %241 = vector.broadcast %cst_121 : f32 to vector<2x32xf32>
    %242 = arith.addf %241, %240 : vector<2x32xf32>
    %243 = arith.divf %241, %242 : vector<2x32xf32>
    %244 = vector.extract_strided_slice %237 {offsets = [0, 32], sizes = [2, 32], strides = [1, 1]} : vector<2x128xf32> to vector<2x32xf32>
    %245 = arith.negf %244 : vector<2x32xf32>
    %246 = math.exp %245 : vector<2x32xf32>
    %cst_122 = arith.constant 1.000000e+00 : f32
    %247 = vector.broadcast %cst_122 : f32 to vector<2x32xf32>
    %248 = arith.addf %247, %246 : vector<2x32xf32>
    %249 = arith.divf %247, %248 : vector<2x32xf32>
    %250 = vector.extract_strided_slice %237 {offsets = [0, 64], sizes = [2, 32], strides = [1, 1]} : vector<2x128xf32> to vector<2x32xf32>
    %251 = math.tanh %250 : vector<2x32xf32>
    %252 = vector.extract_strided_slice %237 {offsets = [0, 96], sizes = [2, 32], strides = [1, 1]} : vector<2x128xf32> to vector<2x32xf32>
    %253 = arith.negf %252 : vector<2x32xf32>
    %254 = math.exp %253 : vector<2x32xf32>
    %cst_123 = arith.constant 1.000000e+00 : f32
    %255 = vector.broadcast %cst_123 : f32 to vector<2x32xf32>
    %256 = arith.addf %255, %254 : vector<2x32xf32>
    %257 = arith.divf %255, %256 : vector<2x32xf32>
    %c0_124 = arith.constant 0 : index
    %c0_125 = arith.constant 0 : index
    %258 = vector.load %arg5[%c0_124, %c0_125] : memref<2x32xf32, #tpu.memory_space<vmem>>, vector<2x32xf32>
    %259 = arith.mulf %249, %258 : vector<2x32xf32>
    %260 = arith.mulf %243, %251 : vector<2x32xf32>
    %261 = arith.addf %259, %260 : vector<2x32xf32>
    %262 = math.tanh %261 : vector<2x32xf32>
    %263 = arith.mulf %257, %262 : vector<2x32xf32>
    %c0_126 = arith.constant 0 : index
    %c0_127 = arith.constant 0 : index
    %264 = vector.load %arg5[%c0_126, %c0_127] : memref<2x32xf32, #tpu.memory_space<vmem>>, vector<2x32xf32>
    tpu.vector_store %arg5[%c0_126, %c0_127], %261 {strides = array<i32>} : memref<2x32xf32, #tpu.memory_space<vmem>>, vector<2x32xf32>,
    %c0_128 = arith.constant 0 : index
    %c0_129 = arith.constant 0 : index
    %265 = vector.load %arg4[%c0_128, %c0_129] : memref<2x32xf32, #tpu.memory_space<vmem>>, vector<2x32xf32>
    tpu.vector_store %arg4[%c0_128, %c0_129], %263 {strides = array<i32>} : memref<2x32xf32, #tpu.memory_space<vmem>>, vector<2x32xf32>,
    %c6_130 = arith.constant 6 : index
    %c0_131 = arith.constant 0 : index
    %c0_132 = arith.constant 0 : index
    %266 = vector.load %arg3[%c6_130, %c0_131, %c0_132] : memref<7x2x32xf32, #tpu.memory_space<vmem>>, vector<1x2x32xf32>
    %267 = vector.shape_cast %266 : vector<1x2x32xf32> to vector<2x32xf32>
    %268 = vector.shape_cast %263 : vector<2x32xf32> to vector<1x2x32xf32>
    tpu.vector_store %arg3[%c6_130, %c0_131, %c0_132], %268 {strides = array<i32>} : memref<7x2x32xf32, #tpu.memory_space<vmem>>, vector<1x2x32xf32>,
    return
  }
  func.func @transform_0(%arg0: i32) -> (i32, i32, i32) {
    %c0_i32 = arith.constant 0 : i32
    %c0_i32_0 = arith.constant 0 : i32
    %c0_i32_1 = arith.constant 0 : i32
    return %arg0, %c0_i32, %c0_i32_0 : i32, i32, i32
  }
  func.func @transform_1(%arg0: i32) -> (i32, i32) {
    %c0_i32 = arith.constant 0 : i32
    %c0_i32_0 = arith.constant 0 : i32
    %c0_i32_1 = arith.constant 0 : i32
    return %c0_i32, %c0_i32_0 : i32, i32
  }
  func.func @transform_2(%arg0: i32) -> (i32, i32, i32) {
    %c0_i32 = arith.constant 0 : i32
    %c0_i32_0 = arith.constant 0 : i32
    %c0_i32_1 = arith.constant 0 : i32
    return %arg0, %c0_i32, %c0_i32_0 : i32, i32, i32
  }
}

module attributes {stable_mosaic.version = 11 : i64} {
  func.func @_linear_kernel(%arg0: i32, %arg1: i32, %arg2: memref<16x16xf32, #tpu.memory_space<vmem>>, %arg3: memref<16x32xbf16, #tpu.memory_space<vmem>>, %arg4: memref<1x32xf32, #tpu.memory_space<vmem>>, %arg5: memref<16x32xf32, #tpu.memory_space<vmem>>) attributes {dimension_semantics = [#tpu.dimension_semantics<parallel>, #tpu.dimension_semantics<parallel>], iteration_bounds = array<i64: 1, 1>, scalar_prefetch = 0 : i64, scratch_operands = 0 : i64, tpu.core_type = #tpu.core_type<tc>, window_params = [{transform_indices = @transform_0, window_bounds = array<i64: 16, 16>}, {pipeline_mode = #tpu.pipeline_mode<synchronous>, transform_indices = @transform_1, window_bounds = array<i64: 16, 32>}, {pipeline_mode = #tpu.pipeline_mode<synchronous>, transform_indices = @transform_2, window_bounds = array<i64: 1, 32>}, {transform_indices = @transform_3, window_bounds = array<i64: 16, 32>}]} {
    %c0 = arith.constant 0 : index
    %c0_0 = arith.constant 0 : index
    %0 = vector.load %arg2[%c0, %c0_0] : memref<16x16xf32, #tpu.memory_space<vmem>>, vector<16x16xf32>
    %1 = arith.truncf %0 : vector<16x16xf32> to vector<16x16xbf16>
    %c0_1 = arith.constant 0 : index
    %c0_2 = arith.constant 0 : index
    %2 = vector.load %arg3[%c0_1, %c0_2] : memref<16x32xbf16, #tpu.memory_space<vmem>>, vector<16x32xbf16>
    %cst = arith.constant dense<0.000000e+00> : vector<16x32xf32>
    %3 = tpu.matmul %1, %2, %cst {dimension_numbers = #tpu.dot_dimension_numbers<[1], [0], [0], [1], [0, 0, 1, 1], [], []>} : vector<16x16xbf16>, vector<16x32xbf16>, vector<16x32xf32> -> vector<16x32xf32>
    %c0_3 = arith.constant 0 : index
    %c0_4 = arith.constant 0 : index
    %4 = vector.load %arg4[%c0_3, %c0_4] : memref<1x32xf32, #tpu.memory_space<vmem>>, vector<1x32xf32>
    %5 = vector.broadcast %4 : vector<1x32xf32> to vector<16x32xf32>
    %6 = arith.addf %3, %5 : vector<16x32xf32>
    %c0_5 = arith.constant 0 : index
    %c0_6 = arith.constant 0 : index
    %7 = vector.load %arg5[%c0_5, %c0_6] : memref<16x32xf32, #tpu.memory_space<vmem>>, vector<16x32xf32>
    tpu.vector_store %arg5[%c0_5, %c0_6], %6 {strides = array<i32>} : memref<16x32xf32, #tpu.memory_space<vmem>>, vector<16x32xf32>,
    return
  }
  func.func @transform_0(%arg0: i32, %arg1: i32) -> (i32, i32) {
    %c0_i32 = arith.constant 0 : i32
    %c0_i32_0 = arith.constant 0 : i32
    return %arg0, %c0_i32 : i32, i32
  }
  func.func @transform_1(%arg0: i32, %arg1: i32) -> (i32, i32) {
    %c0_i32 = arith.constant 0 : i32
    %c0_i32_0 = arith.constant 0 : i32
    return %c0_i32, %arg1 : i32, i32
  }
  func.func @transform_2(%arg0: i32, %arg1: i32) -> (i32, i32) {
    %c0_i32 = arith.constant 0 : i32
    %c0_i32_0 = arith.constant 0 : i32
    return %c0_i32, %arg1 : i32, i32
  }
  func.func @transform_3(%arg0: i32, %arg1: i32) -> (i32, i32) {
    %c0_i32 = arith.constant 0 : i32
    return %arg0, %arg1 : i32, i32
  }
}

module attributes {stable_mosaic.version = 11 : i64} {
  func.func @_linear_kernel(%arg0: i32, %arg1: i32, %arg2: memref<16x32xf32, #tpu.memory_space<vmem>>, %arg3: memref<32x64xbf16, #tpu.memory_space<vmem>>, %arg4: memref<1x64xf32, #tpu.memory_space<vmem>>, %arg5: memref<16x64xbf16, #tpu.memory_space<vmem>>) attributes {dimension_semantics = [#tpu.dimension_semantics<parallel>, #tpu.dimension_semantics<parallel>], iteration_bounds = array<i64: 1, 1>, scalar_prefetch = 0 : i64, scratch_operands = 0 : i64, tpu.core_type = #tpu.core_type<tc>, window_params = [{transform_indices = @transform_0, window_bounds = array<i64: 16, 32>}, {pipeline_mode = #tpu.pipeline_mode<synchronous>, transform_indices = @transform_1, window_bounds = array<i64: 32, 64>}, {pipeline_mode = #tpu.pipeline_mode<synchronous>, transform_indices = @transform_2, window_bounds = array<i64: 1, 64>}, {transform_indices = @transform_3, window_bounds = array<i64: 16, 64>}]} {
    %c0 = arith.constant 0 : index
    %c0_0 = arith.constant 0 : index
    %0 = vector.load %arg2[%c0, %c0_0] : memref<16x32xf32, #tpu.memory_space<vmem>>, vector<16x32xf32>
    %1 = arith.truncf %0 : vector<16x32xf32> to vector<16x32xbf16>
    %c0_1 = arith.constant 0 : index
    %c0_2 = arith.constant 0 : index
    %2 = vector.load %arg3[%c0_1, %c0_2] : memref<32x64xbf16, #tpu.memory_space<vmem>>, vector<32x64xbf16>
    %cst = arith.constant dense<0.000000e+00> : vector<16x64xf32>
    %3 = tpu.matmul %1, %2, %cst {dimension_numbers = #tpu.dot_dimension_numbers<[1], [0], [0], [1], [0, 0, 1, 1], [], []>} : vector<16x32xbf16>, vector<32x64xbf16>, vector<16x64xf32> -> vector<16x64xf32>
    %c0_3 = arith.constant 0 : index
    %c0_4 = arith.constant 0 : index
    %4 = vector.load %arg4[%c0_3, %c0_4] : memref<1x64xf32, #tpu.memory_space<vmem>>, vector<1x64xf32>
    %5 = vector.broadcast %4 : vector<1x64xf32> to vector<16x64xf32>
    %6 = arith.addf %3, %5 : vector<16x64xf32>
    %7 = arith.truncf %6 : vector<16x64xf32> to vector<16x64xbf16>
    %c0_5 = arith.constant 0 : index
    %c0_6 = arith.constant 0 : index
    %8 = vector.load %arg5[%c0_5, %c0_6] : memref<16x64xbf16, #tpu.memory_space<vmem>>, vector<16x64xbf16>
    tpu.vector_store %arg5[%c0_5, %c0_6], %7 {strides = array<i32>} : memref<16x64xbf16, #tpu.memory_space<vmem>>, vector<16x64xbf16>,
    return
  }
  func.func @transform_0(%arg0: i32, %arg1: i32) -> (i32, i32) {
    %c0_i32 = arith.constant 0 : i32
    %c0_i32_0 = arith.constant 0 : i32
    return %arg0, %c0_i32 : i32, i32
  }
  func.func @transform_1(%arg0: i32, %arg1: i32) -> (i32, i32) {
    %c0_i32 = arith.constant 0 : i32
    %c0_i32_0 = arith.constant 0 : i32
    return %c0_i32, %arg1 : i32, i32
  }
  func.func @transform_2(%arg0: i32, %arg1: i32) -> (i32, i32) {
    %c0_i32 = arith.constant 0 : i32
    %c0_i32_0 = arith.constant 0 : i32
    return %c0_i32, %arg1 : i32, i32
  }
  func.func @transform_3(%arg0: i32, %arg1: i32) -> (i32, i32) {
    %c0_i32 = arith.constant 0 : i32
    return %arg0, %arg1 : i32, i32
  }
}

module attributes {stable_mosaic.version = 11 : i64} {
  func.func @_joint_kernel(%arg0: i32, %arg1: i32, %arg2: i32, %arg3: memref<1x8x64xbf16, #tpu.memory_space<vmem>>, %arg4: memref<1x7x64xbf16, #tpu.memory_space<vmem>>, %arg5: memref<1x7x64xbf16, #tpu.memory_space<vmem>>, %arg6: memref<1x1x7xf32, #tpu.memory_space<vmem>>, %arg7: memref<1x64xf32, #tpu.memory_space<vmem>>, %arg8: memref<64x32xbf16, #tpu.memory_space<vmem>>, %arg9: memref<1x32xf32, #tpu.memory_space<vmem>>, %arg10: memref<1x8x7xf32, #tpu.memory_space<vmem>>, %arg11: memref<1x8x7xf32, #tpu.memory_space<vmem>>) attributes {dimension_semantics = [#tpu.dimension_semantics<parallel>, #tpu.dimension_semantics<parallel>, #tpu.dimension_semantics<parallel>], iteration_bounds = array<i64: 1, 2, 1>, scalar_prefetch = 0 : i64, scratch_operands = 0 : i64, tpu.core_type = #tpu.core_type<tc>, window_params = [{transform_indices = @transform_0, window_bounds = array<i64: 1, 8, 64>}, {transform_indices = @transform_1, window_bounds = array<i64: 1, 7, 64>}, {transform_indices = @transform_2, window_bounds = array<i64: 1, 7, 64>}, {transform_indices = @transform_3, window_bounds = array<i64: 1, 1, 7>}, {pipeline_mode = #tpu.pipeline_mode<synchronous>, transform_indices = @transform_4, window_bounds = array<i64: 1, 64>}, {pipeline_mode = #tpu.pipeline_mode<synchronous>, transform_indices = @transform_5, window_bounds = array<i64: 64, 32>}, {pipeline_mode = #tpu.pipeline_mode<synchronous>, transform_indices = @transform_6, window_bounds = array<i64: 1, 32>}, {transform_indices = @transform_7, window_bounds = array<i64: 1, 8, 7>}, {transform_indices = @transform_8, window_bounds = array<i64: 1, 8, 7>}]} {
    %c0 = arith.constant 0 : index
    %c0_0 = arith.constant 0 : index
    %c0_1 = arith.constant 0 : index
    %0 = vector.load %arg3[%c0, %c0_0, %c0_1] : memref<1x8x64xbf16, #tpu.memory_space<vmem>>, vector<1x8x64xbf16>
    %1 = vector.shape_cast %0 : vector<1x8x64xbf16> to vector<8x64xbf16>
    %2 = arith.extf %1 : vector<8x64xbf16> to vector<8x64xf32>
    %c0_2 = arith.constant 0 : index
    %c0_3 = arith.constant 0 : index
    %c0_4 = arith.constant 0 : index
    %3 = vector.load %arg4[%c0_2, %c0_3, %c0_4] : memref<1x7x64xbf16, #tpu.memory_space<vmem>>, vector<1x7x64xbf16>
    %4 = vector.shape_cast %3 : vector<1x7x64xbf16> to vector<7x64xbf16>
    %5 = arith.extf %4 : vector<7x64xbf16> to vector<7x64xf32>
    %6 = vector.shape_cast %2 : vector<8x64xf32> to vector<8x1x64xf32>
    %7 = vector.shape_cast %5 : vector<7x64xf32> to vector<1x7x64xf32>
    %8 = vector.broadcast %6 : vector<8x1x64xf32> to vector<8x7x64xf32>
    %9 = vector.broadcast %7 : vector<1x7x64xf32> to vector<8x7x64xf32>
    %10 = arith.addf %8, %9 : vector<8x7x64xf32>
    %c0_5 = arith.constant 0 : index
    %c0_6 = arith.constant 0 : index
    %11 = vector.load %arg7[%c0_5, %c0_6] : memref<1x64xf32, #tpu.memory_space<vmem>>, vector<1x64xf32>
    %12 = vector.shape_cast %11 : vector<1x64xf32> to vector<1x1x64xf32>
    %13 = vector.broadcast %12 : vector<1x1x64xf32> to vector<8x7x64xf32>
    %14 = arith.addf %10, %13 : vector<8x7x64xf32>
    %15 = math.tanh %14 : vector<8x7x64xf32>
    %16 = arith.truncf %15 : vector<8x7x64xf32> to vector<8x7x64xbf16>
    %17 = vector.shape_cast %16 : vector<8x7x64xbf16> to vector<56x64xbf16>
    %c0_7 = arith.constant 0 : index
    %c0_8 = arith.constant 0 : index
    %18 = vector.load %arg8[%c0_7, %c0_8] : memref<64x32xbf16, #tpu.memory_space<vmem>>, vector<64x32xbf16>
    %cst = arith.constant dense<0.000000e+00> : vector<56x32xf32>
    %19 = tpu.matmul %17, %18, %cst {dimension_numbers = #tpu.dot_dimension_numbers<[1], [0], [0], [1], [0, 0, 1, 1], [], []>} : vector<56x64xbf16>, vector<64x32xbf16>, vector<56x32xf32> -> vector<56x32xf32>
    %c0_9 = arith.constant 0 : index
    %c0_10 = arith.constant 0 : index
    %20 = vector.load %arg9[%c0_9, %c0_10] : memref<1x32xf32, #tpu.memory_space<vmem>>, vector<1x32xf32>
    %21 = vector.broadcast %20 : vector<1x32xf32> to vector<56x32xf32>
    %22 = arith.addf %19, %21 : vector<56x32xf32>
    %23 = vector.shape_cast %22 : vector<56x32xf32> to vector<8x7x32xf32>
    %cst_11 = arith.constant dense<0xFF800000> : vector<8x7xf32>
    %24 = vector.multi_reduction <maximumf>, %23, %cst_11 [2] : vector<8x7x32xf32> to vector<8x7xf32>
    %25 = vector.shape_cast %24 : vector<8x7xf32> to vector<8x7x1xf32>
    %26 = vector.broadcast %25 : vector<8x7x1xf32> to vector<8x7x32xf32>
    %27 = arith.subf %23, %26 : vector<8x7x32xf32>
    %28 = math.exp %27 : vector<8x7x32xf32>
    %cst_12 = arith.constant dense<0.000000e+00> : vector<8x7xf32>
    %29 = vector.multi_reduction <add>, %28, %cst_12 [2] : vector<8x7x32xf32> to vector<8x7xf32>
    %30 = math.log %29 : vector<8x7xf32>
    %31 = arith.addf %24, %30 : vector<8x7xf32>
    %32 = vector.extract_strided_slice %23 {offsets = [0, 0, 0], sizes = [8, 7, 1], strides = [1, 1, 1]} : vector<8x7x32xf32> to vector<8x7x1xf32>
    %33 = vector.shape_cast %32 : vector<8x7x1xf32> to vector<8x7xf32>
    %34 = arith.subf %33, %31 : vector<8x7xf32>
    %c0_13 = arith.constant 0 : index
    %c0_14 = arith.constant 0 : index
    %c0_15 = arith.constant 0 : index
    %35 = vector.load %arg10[%c0_13, %c0_14, %c0_15] : memref<1x8x7xf32, #tpu.memory_space<vmem>>, vector<1x8x7xf32>
    %36 = vector.shape_cast %35 : vector<1x8x7xf32> to vector<8x7xf32>
    %37 = vector.shape_cast %34 : vector<8x7xf32> to vector<1x8x7xf32>
    tpu.vector_store %arg10[%c0_13, %c0_14, %c0_15], %37 {strides = array<i32>} : memref<1x8x7xf32, #tpu.memory_space<vmem>>, vector<1x8x7xf32>,
    %c0_16 = arith.constant 0 : index
    %c0_17 = arith.constant 0 : index
    %c0_18 = arith.constant 0 : index
    %38 = vector.load %arg5[%c0_16, %c0_17, %c0_18] : memref<1x7x64xbf16, #tpu.memory_space<vmem>>, vector<1x7x64xbf16>
    %39 = vector.shape_cast %38 : vector<1x7x64xbf16> to vector<7x64xbf16>
    %40 = arith.extf %39 : vector<7x64xbf16> to vector<7x64xf32>
    %41 = arith.extf %16 : vector<8x7x64xbf16> to vector<8x7x64xf32>
    %42 = vector.shape_cast %40 : vector<7x64xf32> to vector<1x7x64xf32>
    %43 = vector.broadcast %42 : vector<1x7x64xf32> to vector<8x7x64xf32>
    %44 = arith.mulf %41, %43 : vector<8x7x64xf32>
    %cst_19 = arith.constant dense<0.000000e+00> : vector<8x7xf32>
    %45 = vector.multi_reduction <add>, %44, %cst_19 [2] : vector<8x7x64xf32> to vector<8x7xf32>
    %c0_20 = arith.constant 0 : index
    %c0_21 = arith.constant 0 : index
    %c0_22 = arith.constant 0 : index
    %46 = vector.load %arg6[%c0_20, %c0_21, %c0_22] : memref<1x1x7xf32, #tpu.memory_space<vmem>>, vector<1x1x7xf32>
    %47 = vector.shape_cast %46 : vector<1x1x7xf32> to vector<7xf32>
    %48 = vector.shape_cast %47 : vector<7xf32> to vector<1x7xf32>
    %49 = vector.broadcast %48 : vector<1x7xf32> to vector<8x7xf32>
    %50 = arith.addf %45, %49 : vector<8x7xf32>
    %51 = arith.subf %50, %31 : vector<8x7xf32>
    %c0_23 = arith.constant 0 : index
    %c0_24 = arith.constant 0 : index
    %c0_25 = arith.constant 0 : index
    %52 = vector.load %arg11[%c0_23, %c0_24, %c0_25] : memref<1x8x7xf32, #tpu.memory_space<vmem>>, vector<1x8x7xf32>
    %53 = vector.shape_cast %52 : vector<1x8x7xf32> to vector<8x7xf32>
    %54 = vector.shape_cast %51 : vector<8x7xf32> to vector<1x8x7xf32>
    tpu.vector_store %arg11[%c0_23, %c0_24, %c0_25], %54 {strides = array<i32>} : memref<1x8x7xf32, #tpu.memory_space<vmem>>, vector<1x8x7xf32>,
    return
  }
  func.func @transform_0(%arg0: i32, %arg1: i32, %arg2: i32) -> (i32, i32, i32) {
    %c0_i32 = arith.constant 0 : i32
    %c0_i32_0 = arith.constant 0 : i32
    return %arg1, %arg0, %c0_i32 : i32, i32, i32
  }
  func.func @transform_1(%arg0: i32, %arg1: i32, %arg2: i32) -> (i32, i32, i32) {
    %c0_i32 = arith.constant 0 : i32
    %c0_i32_0 = arith.constant 0 : i32
    return %arg1, %arg2, %c0_i32 : i32, i32, i32
  }
  func.func @transform_2(%arg0: i32, %arg1: i32, %arg2: i32) -> (i32, i32, i32) {
    %c0_i32 = arith.constant 0 : i32
    %c0_i32_0 = arith.constant 0 : i32
    return %arg1, %arg2, %c0_i32 : i32, i32, i32
  }
  func.func @transform_3(%arg0: i32, %arg1: i32, %arg2: i32) -> (i32, i32, i32) {
    %c0_i32 = arith.constant 0 : i32
    %c0_i32_0 = arith.constant 0 : i32
    return %arg1, %c0_i32, %arg2 : i32, i32, i32
  }
  func.func @transform_4(%arg0: i32, %arg1: i32, %arg2: i32) -> (i32, i32) {
    %c0_i32 = arith.constant 0 : i32
    %c0_i32_0 = arith.constant 0 : i32
    %c0_i32_1 = arith.constant 0 : i32
    return %c0_i32, %c0_i32_0 : i32, i32
  }
  func.func @transform_5(%arg0: i32, %arg1: i32, %arg2: i32) -> (i32, i32) {
    %c0_i32 = arith.constant 0 : i32
    %c0_i32_0 = arith.constant 0 : i32
    %c0_i32_1 = arith.constant 0 : i32
    return %c0_i32, %c0_i32_0 : i32, i32
  }
  func.func @transform_6(%arg0: i32, %arg1: i32, %arg2: i32) -> (i32, i32) {
    %c0_i32 = arith.constant 0 : i32
    %c0_i32_0 = arith.constant 0 : i32
    %c0_i32_1 = arith.constant 0 : i32
    return %c0_i32, %c0_i32_0 : i32, i32
  }
  func.func @transform_7(%arg0: i32, %arg1: i32, %arg2: i32) -> (i32, i32, i32) {
    %c0_i32 = arith.constant 0 : i32
    return %arg1, %arg0, %arg2 : i32, i32, i32
  }
  func.func @transform_8(%arg0: i32, %arg1: i32, %arg2: i32) -> (i32, i32, i32) {
    %c0_i32 = arith.constant 0 : i32
    return %arg1, %arg0, %arg2 : i32, i32, i32
  }
}

</mosaic_0001>

<bundles_post_ra>
// kernel: transducer_forward.8
= control target key start
LH: loop header
LB: loop body
LE: loop exit
PB: predicated region body
PF: predicated region fallthrough
CT: control target
= control target key end

     0   :  { %v111_v0 = vmov 0.0   ;;  %vm112_vm0 = vmmov 0   ;;  %vm41_vm1 = vcmask 261120   ;;  %s154_s1 = inlined_call_operand.vmem [shape: bf16[32,128], index: 1, kind: input, shape index: {}]   ;;  %s155_s0 = inlined_call_operand.vmem [shape: f32[14,32], index: 0, kind: input, shape index: {}]   ;;  %s156_s2 = inlined_call_operand.vmem [shape: f32[1,128], index: 2, kind: input, shape index: {}]   ;;  %s157_s3 = inlined_call_operand.vmem [shape: f32[14,128], index: 3, kind: output, shape index: {}]  }
   0x1   :  { %99 = vmatprep.subr.bf16.mxu0 %v111_v0  ;;  %v109_v1 = vld [vmem:[%s154_s1 + $0x8] sm:$0xff]   ;;  %103 = vmatprep.mubr.msk.bf16.mxu0 %vm112_vm0, %v111_v0  ;;  %v110_v2 = vld [vmem:[%s154_s1] sm:$0xff]  }
   0x2   :  { %100 = vmatpush3.bf16.msra.mxu0 %v109_v1  ;;  %v15_v3 = vld [vmem:[%s155_s0] sm:$0xff]  ;;  %v16_v4 = vld [vmem:[%s155_s0 + $0x8] sm:$0x3f] }
   0x3   :  { %101 = vmatprep.subr.bf16.mxu0 %v111_v0  ;;  %v17_v5 = vpack.c.bf16 %v16_v4, %v15_v3  ;;  %v92_v6 = vld [vmem:[%s156_s2] ss:$0 sm:$0xff] }
   0x6   :  { %102 = vmatpush3.bf16.msra.mxu0 %v110_v2 }
   0x9   :  { %104 = vmatmul.mubr.msk.bf16.vlgmr.msra.gmra.mxu0 %vm41_vm1, %v17_v5 }
  0xc9   :  { %v79_v7 = vpop.f32.mrf.mxu0 }
  0xca   :  { %v80_v8 = vadd.f32 %v92_v6, %v79_v7 }
  0xcb   :  { %v105_v9 = vpop.f32.mrf.mxu0 }
  0xcc   :  { %86 = vst [vmem:[%s157_s3] sm:$0xff] %v80_v8 }
  0xcd   :  { %v82_v10 = vpop.f32.mrf.mxu0 }
  0xce   :  { %v83_v11 = vadd.f32 %v92_v6, %v82_v10 }
  0xcf   :  { %v106_v12 = vpop.f32.mrf.mxu0 }
  0xd0   :  { %87 = vst [vmem:[%s157_s3 + $0x8] sm:$0x3f] %v83_v11 }

// kernel: transducer_forward.10
= control target key start
LH: loop header
LB: loop body
LE: loop exit
PB: predicated region body
PF: predicated region fallthrough
CT: control target
= control target key end

     0   :  { %v125_v0 = vmov 0.0   ;;  %vm126_vm0 = vmmov 0   ;;  %vm41_vm1 = vcmask 261120   ;;  %vm94_vm2 = vcmask 519168   ;;  %s168_s1 = inlined_call_operand.vmem [shape: bf16[32,64], index: 1, kind: input, shape index: {}]   ;;  %s169_s0 = inlined_call_operand.vmem [shape: f32[14,32], index: 0, kind: input, shape index: {}]   ;;  %s170_s2 = inlined_call_operand.vmem [shape: f32[1,64], index: 2, kind: input, shape index: {}]   ;;  %s171_s3 = inlined_call_operand.vmem [shape: bf16[14,64], index: 3, kind: output, shape index: {}]  }
   0x1   :  { %113 = vmatprep.subr.bf16.mxu0 %v125_v0  ;;  %v123_v1 = vld [vmem:[%s168_s1 + $0x8] sm:$0xff]   ;;  %117 = vmatprep.mubr.msk.bf16.mxu0 %vm126_vm0, %v125_v0  ;;  %v124_v2 = vld [vmem:[%s168_s1] sm:$0xff]   ;;  %vm96_vm3 = vcmask 518144  }
   0x2   :  { %114 = vmatpush3.bf16.msra.mxu0 %v123_v1  ;;  %v15_v3 = vld [vmem:[%s169_s0] sm:$0xff]  ;;  %v16_v4 = vld [vmem:[%s169_s0 + $0x8] sm:$0x3f] }
   0x3   :  { %115 = vmatprep.subr.bf16.mxu0 %v125_v0  ;;  %v17_v5 = vpack.c.bf16 %v16_v4, %v15_v3  ;;  %v102_v6 = vld [vmem:[%s170_s2] ss:$0 sm:$0xff] }
   0x6   :  { %116 = vmatpush3.bf16.msra.mxu0 %v124_v2 }
   0x9   :  { %118 = vmatmul.mubr.msk.bf16.vlgmr.msra.gmra.mxu0 %vm41_vm1, %v17_v5 }
  0xc9   :  { %v79_v7 = vpop.f32.mrf.mxu0 }
  0xca   :  { %v80_v8 = vadd.f32 %v102_v6, %v79_v7 }
  0xcb   :  { %v119_v9 = vpop.f32.mrf.mxu0 }
  0xcc   :  { %v108_v10 = vpack.c.bf16 %v80_v8, %v80_v8 }
  0xcd   :  { %v82_v11 = vpop.f32.mrf.mxu0 }
  0xce   :  { %95 = vst.msk [vmem:[%s171_s3] sm:$0xf] %vm94_vm2, %v108_v10  ;;  %v83_v12 = vadd.f32 %v102_v6, %v82_v11 }
  0xcf   :  { %v120_v13 = vpop.f32.mrf.mxu0 }
  0xd0   :  { %v109_v14 = vpack.c.bf16 %v83_v12, %v83_v12 }
  0xd2   :  { %97 = vst.msk [vmem:[%s171_s3 + $0x4] sm:$0x7] %vm96_vm3, %v109_v14 }

// kernel: transducer_forward.6
= control target key start
LH: loop header
LB: loop body
LE: loop exit
PB: predicated region body
PF: predicated region fallthrough
CT: control target
= control target key end

     0   :  { %v99_v0 = vmov 0.0   ;;  %vm100_vm0 = vmmov 0   ;;  %vm33_vm1 = vcmask 130048   ;;  %vm78_vm2 = vcmask 261120   ;;  %s139_s1 = inlined_call_operand.vmem [shape: bf16[16,32], index: 1, kind: input, shape index: {}]   ;;  %s140_s0 = inlined_call_operand.vmem [shape: f32[16,16], index: 0, kind: input, shape index: {}]   ;;  %s141_s2 = inlined_call_operand.vmem [shape: f32[1,32], index: 2, kind: input, shape index: {}]   ;;  %s142_s3 = inlined_call_operand.vmem [shape: f32[16,32], index: 3, kind: output, shape index: {}]  }
   0x1   :  { %90 = vmatprep.subr.bf16.mxu0 %v99_v0  ;;  %v98_v1 = vld [vmem:[%s139_s1] sm:$0xff]   ;;  %92 = vmatprep.mubr.msk.bf16.mxu0 %vm100_vm0, %v99_v0  ;;  %v16_v3 = vld [vmem:[%s140_s0 + $0x8] sm:$0xff] }
   0x2   :  { %v15_v2 = vld [vmem:[%s140_s0] sm:$0xff]  ;;  %91 = vmatpush3.bf16.msra.mxu0 %v98_v1 }
   0x3   :  { %v17_v4 = vpack.c.bf16 %v16_v3, %v15_v2  ;;  %v85_v5 = vld [vmem:[%s141_s2] ss:$0 sm:$0xff] }
   0x5   :  { %93 = vmatmul.mubr.msk.bf16.vlgmr.msra.gmra.mxu0 %vm33_vm1, %v17_v4 }
  0xc5   :  { %v71_v6 = vpop.f32.mrf.mxu0 }
  0xc6   :  { %v72_v7 = vadd.f32 %v85_v5, %v71_v6 }
  0xc7   :  { %v94_v8 = vpop.f32.mrf.mxu0 }
  0xc8   :  { %79 = vst.msk [vmem:[%s142_s3] sm:$0xff] %vm78_vm2, %v72_v7 }
  0xc9   :  { %v74_v9 = vpop.f32.mrf.mxu0 }
  0xca   :  { %v75_v10 = vadd.f32 %v85_v5, %v74_v9 }
  0xcb   :  { %v95_v11 = vpop.f32.mrf.mxu0 }
  0xcc   :  { %80 = vst.msk [vmem:[%s142_s3 + $0x8] sm:$0xff] %vm78_vm2, %v75_v10 }

// kernel: transducer_forward.7
= control target key start
LH: loop header
LB: loop body
LE: loop exit
PB: predicated region body
PF: predicated region fallthrough
CT: control target
= control target key end

     0   :  { %v124_v0 = vmov 0.0   ;;  %vm125_vm0 = vmmov 0   ;;  %vm41_vm1 = vcmask 261120   ;;  %vm94_vm2 = vcmask 519168   ;;  %s167_s1 = inlined_call_operand.vmem [shape: bf16[32,64], index: 1, kind: input, shape index: {}]   ;;  %s168_s0 = inlined_call_operand.vmem [shape: f32[16,32], index: 0, kind: input, shape index: {}]   ;;  %s169_s2 = inlined_call_operand.vmem [shape: f32[1,64], index: 2, kind: input, shape index: {}]   ;;  %s170_s3 = inlined_call_operand.vmem [shape: bf16[16,64], index: 3, kind: output, shape index: {}]  }
   0x1   :  { %112 = vmatprep.subr.bf16.mxu0 %v124_v0  ;;  %v122_v1 = vld [vmem:[%s167_s1 + $0x8] sm:$0xff]   ;;  %116 = vmatprep.mubr.msk.bf16.mxu0 %vm125_vm0, %v124_v0  ;;  %v123_v2 = vld [vmem:[%s167_s1] sm:$0xff]  }
   0x2   :  { %113 = vmatpush3.bf16.msra.mxu0 %v122_v1  ;;  %v15_v3 = vld [vmem:[%s168_s0] sm:$0xff]  ;;  %v16_v4 = vld [vmem:[%s168_s0 + $0x8] sm:$0xff] }
   0x3   :  { %114 = vmatprep.subr.bf16.mxu0 %v124_v0  ;;  %v17_v5 = vpack.c.bf16 %v16_v4, %v15_v3  ;;  %v101_v6 = vld [vmem:[%s169_s2] ss:$0 sm:$0xff] }
   0x6   :  { %115 = vmatpush3.bf16.msra.mxu0 %v123_v2 }
   0x9   :  { %117 = vmatmul.mubr.msk.bf16.vlgmr.msra.gmra.mxu0 %vm41_vm1, %v17_v5 }
  0xc9   :  { %v79_v7 = vpop.f32.mrf.mxu0 }
  0xca   :  { %v80_v8 = vadd.f32 %v101_v6, %v79_v7 }
  0xcb   :  { %v118_v9 = vpop.f32.mrf.mxu0 }
  0xcc   :  { %v107_v10 = vpack.c.bf16 %v80_v8, %v80_v8 }
  0xcd   :  { %v82_v11 = vpop.f32.mrf.mxu0 }
  0xce   :  { %95 = vst.msk [vmem:[%s170_s3] sm:$0xf] %vm94_vm2, %v107_v10  ;;  %v83_v12 = vadd.f32 %v101_v6, %v82_v11 }
  0xcf   :  { %v119_v13 = vpop.f32.mrf.mxu0 }
  0xd0   :  { %v108_v14 = vpack.c.bf16 %v83_v12, %v83_v12 }
  0xd2   :  { %96 = vst.msk [vmem:[%s170_s3 + $0x4] sm:$0xf] %vm94_vm2, %v108_v14 }

// kernel: transducer_forward.9
= control target key start
LH: loop header
LB: loop body
LE: loop exit
PB: predicated region body
PF: predicated region fallthrough
CT: control target
= control target key end

     0   :  { %vm16_vm0 = vcmask 254976   ;;  %v950_v0 = vmov 0.0   ;;  %vm951_vm1 = vmmov 0   ;;  %vm38_vm2 = vcmask 261120   ;;  %s952_s15 = smov 64   ;;  %s953_s16 = smov 32   ;;  %s1156_s1 = inlined_call_operand.vmem [shape: bf16[32,128], index: 1, kind: input, shape index: {}]   ;;  %s1157_s0 = inlined_call_operand.vmem [shape: f32[7,2,128], index: 0, kind: input, shape index: {}]   ;;  %s1158_s2 = inlined_call_operand.vmem [shape: f32[7,2,32], index: 2, kind: output, shape index: {}]  }
   0x1   :  { %819 = vmatprep.subr.bf16.mxu0 %v950_v0  ;;  %v880_v1 = vld [vmem:[%s1156_s1 + $0x8] sm:$0xff]   ;;  %823 = vmatprep.mubr.msk.bf16.mxu0 %vm951_vm1, %v950_v0  ;;  %17 = vst.msk [vmem:[#allocation2] sm:$0x3] %vm16_vm0, %v950_v0  ;;  %18 = vst.msk [vmem:[#allocation3] sm:$0x3] %vm16_vm0, %v950_v0  ;;  %v881_v2 = vld [vmem:[%s1156_s1] sm:$0xff]  }
   0x2   :  { %827 = vmatprep.subr.bf16.mxu1 %v950_v0  ;;  %831 = vmatprep.mubr.msk.bf16.mxu1 %vm951_vm1, %v950_v0  ;;  %v19_v5 = vld [vmem:[%s1157_s0] sm:$0x3]  ;;  %s954_s17 = smov 96   ;;  %v882_v24 = vld [vmem:[%s1156_s1 + $0x8] sm:$0xff]   ;;  %v762_v33 = vld [vmem:[%s1157_s0 + $0x2] sm:$0x3] }
   0x3   :  { %820 = vmatpush3.bf16.msra.mxu0 %v880_v1  ;;  %828 = vmatpush3.bf16.msra.mxu1 %v882_v24  ;;  %v883_v25 = vld [vmem:[%s1156_s1] sm:$0xff]   ;;  %v884_v51 = vld [vmem:[%s1156_s1 + $0x8] sm:$0xff]  }
   0x4   :  { %821 = vmatprep.subr.bf16.mxu0 %v950_v0  ;;  %829 = vmatprep.subr.bf16.mxu1 %v950_v0  ;;  %v885_v52 = vld [vmem:[%s1156_s1] sm:$0xff]  }
   0x5   :  { %v768_v60 = vld [vmem:[%s1157_s0 + $0x4] sm:$0x3]  ;;  %v774_v24 = vld [vmem:[%s1157_s0 + $0x6] sm:$0x3] }
   0x7   :  { %822 = vmatpush3.bf16.msra.mxu0 %v881_v2  ;;  %830 = vmatpush3.bf16.msra.mxu1 %v883_v25 }
   0x8   :  { %v20_v3 = vld [vmem:[#allocation2] sm:$0x3]  ;;  %835 = vmatprep.subr.bf16.mxu0 %v950_v0  ;;  %v90_v12 = vld [vmem:[#allocation3] sm:$0x3]  ;;  %843 = vmatprep.subr.bf16.mxu1 %v950_v0 }
   0x9   :  { %v21_v4 = vpack.c.bf16 %v20_v3, %v20_v3 }
   0xb   :  { %824 = vmatmul.mubr.msk.bf16.vlgmr.msra.gmra.mxu0 %vm38_vm2, %v21_v4 }
   0xc   :  { %839 = vmatprep.mubr.msk.bf16.mxu0 %vm951_vm1, %v950_v0  ;;  %836 = vmatpush3.bf16.msra.mxu0 %v884_v51  ;;  %v780_v51 = vld [vmem:[%s1157_s0 + $0x8] sm:$0x3] }
   0xd   :  { %837 = vmatprep.subr.bf16.mxu0 %v950_v0 }
  0x10   :  { %838 = vmatpush3.bf16.msra.mxu0 %v885_v52 }
  0x11   :  { %851 = vmatprep.subr.bf16.mxu0 %v950_v0 }
  0xcb   :  { %v76_v6 = vpop.f32.mrf.mxu0 }
  0xcc   :  { %v82_v7 = vadd.f32 %v76_v6, %v19_v5 }
  0xcd   :  { %v825_v8 = vpop.f32.mrf.mxu0 }
  0xce   :  { %894 = vtanh.f32 %v82_v7  ;;  %v761_v13 = vmul.f32 -1.442695, %v82_v7 }
  0xcf   :  { %v79_v9 = vpop.f32.mrf.mxu0 }
  0xd0   :  { %896 = vpow2.f32 %v761_v13 }
  0xd1   :  { %v826_v10 = vpop.f32.mrf.mxu0 }
  0xdb   :  { %v895_v11 = vpop.eup %894 }
  0xdc   :  { %97 = vrot.lane.b32.xlu0 %v895_v11, %s952_s15 }
  0xdd   :  { %v897_v14 = vpop.eup %896 }
  0xde   :  { %v86_v15 = vadd.f32 1.0, %v897_v14 }
  0xe0   :  { %92 = vrot.lane.b32.xlu0 %v90_v12, %s953_s16  ;;  %898 = vrcp.f32 %v86_v15  ;;  %v886_v15 = vld [vmem:[%s1156_s1 + $0x8] sm:$0xff]  }
  0xed   :  { %v899_v16 = vpop.eup %898 }
 0x14e   :  { %v98_v17 = vpop.permute.xlu0 %97 }
 0x14f   :  { %v100_v18 = vmul.f32 %v899_v16, %v98_v17 }
 0x151   :  { %102 = vrot.lane.b32.xlu1 %v100_v18, %s953_s16 }
 0x152   :  { %v93_v19 = vpop.permute.xlu0 %92 }
 0x153   :  { %v95_v20 = vmul.f32 %v899_v16, %v93_v19 }
 0x1c3   :  { %v103_v21 = vpop.permute.xlu1 %102 }
 0x1c4   :  { %v105_v22 = vadd.f32 %v103_v21, %v95_v20 }
 0x1c6   :  { %900 = vtanh.f32 %v105_v22 }
 0x1d3   :  { %v901_v23 = vpop.eup %900 }
 0x1d4   :  { %108 = vrot.lane.b32.xlu1 %v901_v23, %s952_s15 }
 0x1d8   :  { %113 = vrot.lane.b32.xlu1 %v105_v22, %s954_s17 }
 0x246   :  { %v109_v26 = vpop.permute.xlu1 %108 }
 0x247   :  { %v111_v27 = vmul.f32 %v899_v16, %v109_v26  ;;  %v887_v16 = vld [vmem:[%s1156_s1] sm:$0xff]  }
 0x249   :  { %119 = vrot.lane.b32.xlu0 %v111_v27, %s953_s16 }
 0x24a   :  { %v114_v28 = vpop.permute.xlu1 %113 }
 0x24b   :  { %117 = vst.msk [vmem:[#allocation3] sm:$0x3] %vm16_vm0, %v114_v28 }
 0x252   :  { %v195_v29 = vld [vmem:[#allocation3] sm:$0x3] }
 0x253   :  { %197 = vrot.lane.b32.xlu1 %v195_v29, %s953_s16 }
 0x2bb   :  { %v120_v30 = vpop.permute.xlu0 %119 }
 0x2bc   :  { %122 = vst.msk [vmem:[#allocation2] sm:$0x3] %vm16_vm0, %v120_v30  ;;  %123 = vst.msk [vmem:[%s1158_s2] sm:$0x3] %vm16_vm0, %v120_v30 }
 0x2c3   :  { %v126_v31 = vld [vmem:[#allocation2] sm:$0x3] }
 0x2c4   :  { %v127_v32 = vpack.c.bf16 %v126_v31, %v126_v31 }
 0x2c5   :  { %v198_v46 = vpop.permute.xlu1 %197 }
 0x2c6   :  { %832 = vmatmul.mubr.msk.bf16.vlgmr.msra.gmra.mxu1 %vm38_vm2, %v127_v32 }
 0x2c7   :  { %847 = vmatprep.mubr.msk.bf16.mxu1 %vm951_vm1, %v950_v0  ;;  %844 = vmatpush3.bf16.msra.mxu1 %v886_v15  ;;  %v786_v15 = vld [vmem:[%s1157_s0 + $0xa] sm:$0x3] }
 0x2c8   :  { %845 = vmatprep.subr.bf16.mxu1 %v950_v0 }
 0x2cb   :  { %846 = vmatpush3.bf16.msra.mxu1 %v887_v16 }
 0x2cc   :  { %859 = vmatprep.subr.bf16.mxu1 %v950_v0 }
 0x386   :  { %v181_v34 = vpop.f32.mrf.mxu1 }
 0x387   :  { %v187_v35 = vadd.f32 %v762_v33, %v181_v34 }
 0x388   :  { %v833_v36 = vpop.f32.mrf.mxu1 }
 0x389   :  { %902 = vtanh.f32 %v187_v35  ;;  %v766_v40 = vmul.f32 -1.442695, %v187_v35 }
 0x38a   :  { %v184_v37 = vpop.f32.mrf.mxu1 }
 0x38b   :  { %904 = vpow2.f32 %v766_v40 }
 0x38c   :  { %v834_v38 = vpop.f32.mrf.mxu1 }
 0x396   :  { %v903_v39 = vpop.eup %902 }
 0x397   :  { %202 = vrot.lane.b32.xlu0 %v903_v39, %s952_s15 }
 0x398   :  { %v905_v41 = vpop.eup %904 }
 0x399   :  { %v191_v42 = vadd.f32 1.0, %v905_v41 }
 0x39b   :  { %906 = vrcp.f32 %v191_v42  ;;  %v888_v42 = vld [vmem:[%s1156_s1 + $0x8] sm:$0xff]  }
 0x3a8   :  { %v907_v43 = vpop.eup %906 }
 0x3a9   :  { %v200_v47 = vmul.f32 %v907_v43, %v198_v46 }
 0x409   :  { %v203_v44 = vpop.permute.xlu0 %202 }
 0x40a   :  { %v205_v45 = vmul.f32 %v907_v43, %v203_v44 }
 0x40c   :  { %207 = vrot.lane.b32.xlu0 %v205_v45, %s953_s16 }
 0x47e   :  { %v208_v48 = vpop.permute.xlu0 %207 }
 0x47f   :  { %v210_v49 = vadd.f32 %v208_v48, %v200_v47 }
 0x481   :  { %908 = vtanh.f32 %v210_v49 }
 0x48e   :  { %v909_v50 = vpop.eup %908 }
 0x48f   :  { %213 = vrot.lane.b32.xlu1 %v909_v50, %s952_s15 }
 0x493   :  { %218 = vrot.lane.b32.xlu1 %v210_v49, %s954_s17 }
 0x501   :  { %v214_v53 = vpop.permute.xlu1 %213 }
 0x502   :  { %v216_v54 = vmul.f32 %v907_v43, %v214_v53  ;;  %v889_v43 = vld [vmem:[%s1156_s1] sm:$0xff]  }
 0x504   :  { %223 = vrot.lane.b32.xlu0 %v216_v54, %s953_s16 }
 0x505   :  { %v219_v55 = vpop.permute.xlu1 %218 }
 0x506   :  { %221 = vst.msk [vmem:[#allocation3] sm:$0x3] %vm16_vm0, %v219_v55 }
 0x50d   :  { %v300_v56 = vld [vmem:[#allocation3] sm:$0x3] }
 0x50e   :  { %302 = vrot.lane.b32.xlu1 %v300_v56, %s953_s16 }
 0x576   :  { %v224_v57 = vpop.permute.xlu0 %223 }
 0x577   :  { %226 = vst.msk [vmem:[#allocation2] sm:$0x3] %vm16_vm0, %v224_v57  ;;  %767 = vst.msk [vmem:[%s1158_s2 + $0x2] sm:$0x3] %vm16_vm0, %v224_v57 }
 0x57e   :  { %v231_v58 = vld [vmem:[#allocation2] sm:$0x3] }
 0x57f   :  { %v232_v59 = vpack.c.bf16 %v231_v58, %v231_v58 }
 0x580   :  { %v303_v10 = vpop.permute.xlu1 %302 }
 0x581   :  { %840 = vmatmul.mubr.msk.bf16.vlgmr.msra.gmra.mxu0 %vm38_vm2, %v232_v59 }
 0x582   :  { %855 = vmatprep.mubr.msk.bf16.mxu0 %vm951_vm1, %v950_v0  ;;  %852 = vmatpush3.bf16.msra.mxu0 %v888_v42 }
 0x583   :  { %853 = vmatprep.subr.bf16.mxu0 %v950_v0 }
 0x586   :  { %854 = vmatpush3.bf16.msra.mxu0 %v889_v43 }
 0x587   :  { %867 = vmatprep.subr.bf16.mxu0 %v950_v0 }
 0x641   :  { %v286_v61 = vpop.f32.mrf.mxu0 }
 0x642   :  { %v292_v62 = vadd.f32 %v768_v60, %v286_v61 }
 0x643   :  { %v841_v63 = vpop.f32.mrf.mxu0 }
 0x644   :  { %910 = vtanh.f32 %v292_v62  ;;  %v772_v4 = vmul.f32 -1.442695, %v292_v62 }
 0x645   :  { %v289_v1 = vpop.f32.mrf.mxu0 }
 0x646   :  { %912 = vpow2.f32 %v772_v4 }
 0x647   :  { %v842_v2 = vpop.f32.mrf.mxu0 }
 0x651   :  { %v911_v3 = vpop.eup %910 }
 0x652   :  { %307 = vrot.lane.b32.xlu0 %v911_v3, %s952_s15 }
 0x653   :  { %v913_v5 = vpop.eup %912 }
 0x654   :  { %v296_v6 = vadd.f32 1.0, %v913_v5 }
 0x656   :  { %914 = vrcp.f32 %v296_v6  ;;  %v890_v6 = vld [vmem:[%s1156_s1 + $0x8] sm:$0xff]  }
 0x663   :  { %v915_v7 = vpop.eup %914 }
 0x664   :  { %v305_v11 = vmul.f32 %v915_v7, %v303_v10 }
 0x6c4   :  { %v308_v8 = vpop.permute.xlu0 %307 }
 0x6c5   :  { %v310_v9 = vmul.f32 %v915_v7, %v308_v8 }
 0x6c7   :  { %312 = vrot.lane.b32.xlu0 %v310_v9, %s953_s16 }
 0x739   :  { %v313_v12 = vpop.permute.xlu0 %312 }
 0x73a   :  { %v315_v13 = vadd.f32 %v313_v12, %v305_v11 }
 0x73c   :  { %916 = vtanh.f32 %v315_v13 }
 0x749   :  { %v917_v14 = vpop.eup %916 }
 0x74a   :  { %318 = vrot.lane.b32.xlu1 %v917_v14, %s952_s15 }
 0x74e   :  { %323 = vrot.lane.b32.xlu1 %v315_v13, %s954_s17 }
 0x7bc   :  { %v319_v17 = vpop.permute.xlu1 %318 }
 0x7bd   :  { %v321_v18 = vmul.f32 %v915_v7, %v319_v17  ;;  %v891_v7 = vld [vmem:[%s1156_s1] sm:$0xff]  }
 0x7bf   :  { %328 = vrot.lane.b32.xlu0 %v321_v18, %s953_s16 }
 0x7c0   :  { %v324_v19 = vpop.permute.xlu1 %323 }
 0x7c1   :  { %326 = vst.msk [vmem:[#allocation3] sm:$0x3] %vm16_vm0, %v324_v19 }
 0x7c8   :  { %v405_v20 = vld [vmem:[#allocation3] sm:$0x3] }
 0x7c9   :  { %407 = vrot.lane.b32.xlu1 %v405_v20, %s953_s16 }
 0x831   :  { %v329_v21 = vpop.permute.xlu0 %328 }
 0x832   :  { %331 = vst.msk [vmem:[#allocation2] sm:$0x3] %vm16_vm0, %v329_v21  ;;  %773 = vst.msk [vmem:[%s1158_s2 + $0x4] sm:$0x3] %vm16_vm0, %v329_v21 }
 0x839   :  { %v336_v22 = vld [vmem:[#allocation2] sm:$0x3] }
 0x83a   :  { %v337_v23 = vpack.c.bf16 %v336_v22, %v336_v22 }
 0x83b   :  { %v408_v37 = vpop.permute.xlu1 %407 }
 0x83c   :  { %848 = vmatmul.mubr.msk.bf16.vlgmr.msra.gmra.mxu1 %vm38_vm2, %v337_v23 }
 0x83d   :  { %863 = vmatprep.mubr.msk.bf16.mxu1 %vm951_vm1, %v950_v0  ;;  %860 = vmatpush3.bf16.msra.mxu1 %v890_v6 }
 0x83e   :  { %861 = vmatprep.subr.bf16.mxu1 %v950_v0 }
 0x841   :  { %862 = vmatpush3.bf16.msra.mxu1 %v891_v7 }
 0x8fc   :  { %v391_v25 = vpop.f32.mrf.mxu1 }
 0x8fd   :  { %v397_v26 = vadd.f32 %v774_v24, %v391_v25 }
 0x8fe   :  { %v849_v27 = vpop.f32.mrf.mxu1 }
 0x8ff   :  { %918 = vtanh.f32 %v397_v26  ;;  %v778_v31 = vmul.f32 -1.442695, %v397_v26 }
 0x900   :  { %v394_v28 = vpop.f32.mrf.mxu1 }
 0x901   :  { %920 = vpow2.f32 %v778_v31 }
 0x902   :  { %v850_v29 = vpop.f32.mrf.mxu1 }
 0x90c   :  { %v919_v30 = vpop.eup %918 }
 0x90d   :  { %412 = vrot.lane.b32.xlu0 %v919_v30, %s952_s15 }
 0x90e   :  { %v921_v32 = vpop.eup %920 }
 0x90f   :  { %v401_v33 = vadd.f32 1.0, %v921_v32 }
 0x911   :  { %922 = vrcp.f32 %v401_v33  ;;  %v892_v33 = vld [vmem:[%s1156_s1 + $0x8] sm:$0xff]  }
 0x91e   :  { %v923_v34 = vpop.eup %922 }
 0x91f   :  { %v410_v38 = vmul.f32 %v923_v34, %v408_v37 }
 0x97f   :  { %v413_v35 = vpop.permute.xlu0 %412 }
 0x980   :  { %v415_v36 = vmul.f32 %v923_v34, %v413_v35 }
 0x982   :  { %417 = vrot.lane.b32.xlu0 %v415_v36, %s953_s16 }
 0x9f4   :  { %v418_v39 = vpop.permute.xlu0 %417 }
 0x9f5   :  { %v420_v40 = vadd.f32 %v418_v39, %v410_v38 }
 0x9f7   :  { %924 = vtanh.f32 %v420_v40 }
 0xa04   :  { %v925_v41 = vpop.eup %924 }
 0xa05   :  { %423 = vrot.lane.b32.xlu1 %v925_v41, %s952_s15  ;;  %v792_v41 = vld [vmem:[%s1157_s0 + $0xc] sm:$0x3] }
 0xa09   :  { %428 = vrot.lane.b32.xlu1 %v420_v40, %s954_s17 }
 0xa77   :  { %v424_v44 = vpop.permute.xlu1 %423 }
 0xa78   :  { %v426_v45 = vmul.f32 %v923_v34, %v424_v44  ;;  %v893_v34 = vld [vmem:[%s1156_s1] sm:$0xff]  }
 0xa7a   :  { %433 = vrot.lane.b32.xlu0 %v426_v45, %s953_s16 }
 0xa7b   :  { %v429_v46 = vpop.permute.xlu1 %428 }
 0xa7c   :  { %431 = vst.msk [vmem:[#allocation3] sm:$0x3] %vm16_vm0, %v429_v46 }
 0xa83   :  { %v510_v47 = vld [vmem:[#allocation3] sm:$0x3] }
 0xa84   :  { %512 = vrot.lane.b32.xlu1 %v510_v47, %s953_s16 }
 0xaec   :  { %v434_v48 = vpop.permute.xlu0 %433 }
 0xaed   :  { %436 = vst.msk [vmem:[#allocation2] sm:$0x3] %vm16_vm0, %v434_v48  ;;  %779 = vst.msk [vmem:[%s1158_s2 + $0x6] sm:$0x3] %vm16_vm0, %v434_v48 }
 0xaf4   :  { %v441_v49 = vld [vmem:[#allocation2] sm:$0x3] }
 0xaf5   :  { %v442_v50 = vpack.c.bf16 %v441_v49, %v441_v49 }
 0xaf6   :  { %v513_v1 = vpop.permute.xlu1 %512 }
 0xaf7   :  { %856 = vmatmul.mubr.msk.bf16.vlgmr.msra.gmra.mxu0 %vm38_vm2, %v442_v50 }
 0xaf8   :  { %871 = vmatprep.mubr.msk.bf16.mxu0 %vm951_vm1, %v950_v0  ;;  %868 = vmatpush3.bf16.msra.mxu0 %v892_v33 }
 0xaf9   :  { %869 = vmatprep.subr.bf16.mxu0 %v950_v0 }
 0xafc   :  { %870 = vmatpush3.bf16.msra.mxu0 %v893_v34 }
 0xbb7   :  { %v496_v52 = vpop.f32.mrf.mxu0 }
 0xbb8   :  { %v502_v53 = vadd.f32 %v780_v51, %v496_v52 }
 0xbb9   :  { %v857_v54 = vpop.f32.mrf.mxu0 }
 0xbba   :  { %926 = vtanh.f32 %v502_v53  ;;  %v784_v58 = vmul.f32 -1.442695, %v502_v53 }
 0xbbb   :  { %v499_v55 = vpop.f32.mrf.mxu0 }
 0xbbc   :  { %928 = vpow2.f32 %v784_v58 }
 0xbbd   :  { %v858_v56 = vpop.f32.mrf.mxu0 }
 0xbc7   :  { %v927_v57 = vpop.eup %926 }
 0xbc8   :  { %517 = vrot.lane.b32.xlu0 %v927_v57, %s952_s15 }
 0xbc9   :  { %v929_v59 = vpop.eup %928 }
 0xbca   :  { %v506_v60 = vadd.f32 1.0, %v929_v59 }
 0xbcc   :  { %930 = vrcp.f32 %v506_v60 }
 0xbd9   :  { %v931_v61 = vpop.eup %930 }
 0xbda   :  { %v515_v2 = vmul.f32 %v931_v61, %v513_v1 }
 0xc3a   :  { %v518_v62 = vpop.permute.xlu0 %517 }
 0xc3b   :  { %v520_v63 = vmul.f32 %v931_v61, %v518_v62 }
 0xc3d   :  { %522 = vrot.lane.b32.xlu0 %v520_v63, %s953_s16 }
 0xcaf   :  { %v523_v3 = vpop.permute.xlu0 %522 }
 0xcb0   :  { %v525_v4 = vadd.f32 %v523_v3, %v515_v2 }
 0xcb2   :  { %932 = vtanh.f32 %v525_v4 }
 0xcbf   :  { %v933_v5 = vpop.eup %932 }
 0xcc0   :  { %528 = vrot.lane.b32.xlu1 %v933_v5, %s952_s15 }
 0xcc4   :  { %533 = vrot.lane.b32.xlu1 %v525_v4, %s954_s17 }
 0xd32   :  { %v529_v8 = vpop.permute.xlu1 %528 }
 0xd33   :  { %v531_v9 = vmul.f32 %v931_v61, %v529_v8 }
 0xd35   :  { %538 = vrot.lane.b32.xlu0 %v531_v9, %s953_s16 }
 0xd36   :  { %v534_v10 = vpop.permute.xlu1 %533 }
 0xd37   :  { %536 = vst.msk [vmem:[#allocation3] sm:$0x3] %vm16_vm0, %v534_v10 }
 0xd3e   :  { %v615_v11 = vld [vmem:[#allocation3] sm:$0x3] }
 0xd3f   :  { %617 = vrot.lane.b32.xlu1 %v615_v11, %s953_s16 }
 0xda7   :  { %v539_v12 = vpop.permute.xlu0 %538 }
 0xda8   :  { %541 = vst.msk [vmem:[#allocation2] sm:$0x3] %vm16_vm0, %v539_v12  ;;  %785 = vst.msk [vmem:[%s1158_s2 + $0x8] sm:$0x3] %vm16_vm0, %v539_v12 }
 0xdaf   :  { %v546_v13 = vld [vmem:[#allocation2] sm:$0x3] }
 0xdb0   :  { %v547_v14 = vpack.c.bf16 %v546_v13, %v546_v13 }
 0xdb1   :  { %v618_v28 = vpop.permute.xlu1 %617 }
 0xdb2   :  { %864 = vmatmul.mubr.msk.bf16.vlgmr.msra.gmra.mxu1 %vm38_vm2, %v547_v14 }
 0xe72   :  { %v601_v16 = vpop.f32.mrf.mxu1 }
 0xe73   :  { %v607_v17 = vadd.f32 %v786_v15, %v601_v16 }
 0xe74   :  { %v865_v18 = vpop.f32.mrf.mxu1 }
 0xe75   :  { %934 = vtanh.f32 %v607_v17  ;;  %v790_v22 = vmul.f32 -1.442695, %v607_v17 }
 0xe76   :  { %v604_v19 = vpop.f32.mrf.mxu1 }
 0xe77   :  { %936 = vpow2.f32 %v790_v22 }
 0xe78   :  { %v866_v20 = vpop.f32.mrf.mxu1 }
 0xe82   :  { %v935_v21 = vpop.eup %934 }
 0xe83   :  { %622 = vrot.lane.b32.xlu0 %v935_v21, %s952_s15 }
 0xe84   :  { %v937_v23 = vpop.eup %936 }
 0xe85   :  { %v611_v24 = vadd.f32 1.0, %v937_v23 }
 0xe87   :  { %938 = vrcp.f32 %v611_v24 }
 0xe94   :  { %v939_v25 = vpop.eup %938 }
 0xe95   :  { %v620_v29 = vmul.f32 %v939_v25, %v618_v28 }
 0xef5   :  { %v623_v26 = vpop.permute.xlu0 %622 }
 0xef6   :  { %v625_v27 = vmul.f32 %v939_v25, %v623_v26 }
 0xef8   :  { %627 = vrot.lane.b32.xlu0 %v625_v27, %s953_s16 }
 0xf6a   :  { %v628_v30 = vpop.permute.xlu0 %627 }
 0xf6b   :  { %v630_v31 = vadd.f32 %v628_v30, %v620_v29 }
 0xf6d   :  { %940 = vtanh.f32 %v630_v31 }
 0xf7a   :  { %v941_v32 = vpop.eup %940 }
 0xf7b   :  { %633 = vrot.lane.b32.xlu1 %v941_v32, %s952_s15 }
 0xf7f   :  { %638 = vrot.lane.b32.xlu1 %v630_v31, %s954_s17 }
 0xfed   :  { %v634_v35 = vpop.permute.xlu1 %633 }
 0xfee   :  { %v636_v36 = vmul.f32 %v939_v25, %v634_v35 }
 0xff0   :  { %643 = vrot.lane.b32.xlu0 %v636_v36, %s953_s16 }
 0xff1   :  { %v639_v37 = vpop.permute.xlu1 %638 }
 0xff2   :  { %641 = vst.msk [vmem:[#allocation3] sm:$0x3] %vm16_vm0, %v639_v37 }
 0xff9   :  { %v720_v38 = vld [vmem:[#allocation3] sm:$0x3] }
 0xffa   :  { %722 = vrot.lane.b32.xlu1 %v720_v38, %s953_s16 }
0x1062   :  { %v644_v39 = vpop.permute.xlu0 %643 }
0x1063   :  { %646 = vst.msk [vmem:[#allocation2] sm:$0x3] %vm16_vm0, %v644_v39  ;;  %791 = vst.msk [vmem:[%s1158_s2 + $0xa] sm:$0x3] %vm16_vm0, %v644_v39 }
0x106a   :  { %v651_v0 = vld [vmem:[#allocation2] sm:$0x3] }
0x106b   :  { %v652_v40 = vpack.c.bf16 %v651_v0, %v651_v0 }
0x106c   :  { %v723_v54 = vpop.permute.xlu1 %722 }
0x106d   :  { %872 = vmatmul.mubr.msk.bf16.vlgmr.msra.gmra.mxu0 %vm38_vm2, %v652_v40 }
0x112d   :  { %v706_v42 = vpop.f32.mrf.mxu0 }
0x112e   :  { %v712_v43 = vadd.f32 %v792_v41, %v706_v42 }
0x112f   :  { %v873_v44 = vpop.f32.mrf.mxu0 }
0x1130   :  { %942 = vtanh.f32 %v712_v43  ;;  %v796_v48 = vmul.f32 -1.442695, %v712_v43 }
0x1131   :  { %v709_v45 = vpop.f32.mrf.mxu0 }
0x1132   :  { %944 = vpow2.f32 %v796_v48 }
0x1133   :  { %v874_v46 = vpop.f32.mrf.mxu0 }
0x113d   :  { %v943_v47 = vpop.eup %942 }
0x113e   :  { %727 = vrot.lane.b32.xlu0 %v943_v47, %s952_s15 }
0x113f   :  { %v945_v49 = vpop.eup %944 }
0x1140   :  { %v716_v50 = vadd.f32 1.0, %v945_v49 }
0x1142   :  { %946 = vrcp.f32 %v716_v50 }
0x114f   :  { %v947_v51 = vpop.eup %946 }
0x1150   :  { %v725_v55 = vmul.f32 %v947_v51, %v723_v54 }
0x11b0   :  { %v728_v52 = vpop.permute.xlu0 %727 }
0x11b1   :  { %v730_v53 = vmul.f32 %v947_v51, %v728_v52 }
0x11b3   :  { %732 = vrot.lane.b32.xlu0 %v730_v53, %s953_s16 }
0x1225   :  { %v733_v56 = vpop.permute.xlu0 %732 }
0x1226   :  { %v735_v57 = vadd.f32 %v733_v56, %v725_v55 }
0x1228   :  { %948 = vtanh.f32 %v735_v57  ;;  %743 = vrot.lane.b32.xlu0 %v735_v57, %s954_s17 }
0x1235   :  { %v949_v58 = vpop.eup %948 }
0x1236   :  { %738 = vrot.lane.b32.xlu1 %v949_v58, %s952_s15 }
0x129a   :  { %v744_v59 = vpop.permute.xlu0 %743 }
0x129b   :  { %746 = vst.msk [vmem:[#allocation3] sm:$0x3] %vm16_vm0, %v744_v59 }
0x12a8   :  { %v739_v60 = vpop.permute.xlu1 %738 }
0x12a9   :  { %v741_v61 = vmul.f32 %v947_v51, %v739_v60 }
0x12ab   :  { %748 = vrot.lane.b32.xlu1 %v741_v61, %s953_s16 }
0x131d   :  { %v749_v62 = vpop.permute.xlu1 %748 }
0x131e   :  { %751 = vst.msk [vmem:[#allocation2] sm:$0x3] %vm16_vm0, %v749_v62  ;;  %797 = vst.msk [vmem:[%s1158_s2 + $0xc] sm:$0x3] %vm16_vm0, %v749_v62 }

// kernel: transducer_forward.11
= control target key start
LH: loop header
LB: loop body
LE: loop exit
PB: predicated region body
PF: predicated region fallthrough
CT: control target
= control target key end

     0   :  { %s4440_s27 = smov 0   ;;  %s4442_s28 = smov 0   ;;  %s5648_s0 = inlined_call_operand.vmem [shape: bf16[2,8,64], index: 0, kind: input, shape index: {}]   ;;  %s5649_s1 = inlined_call_operand.vmem [shape: bf16[2,7,64], index: 1, kind: input, shape index: {}]   ;;  %s5650_s2 = inlined_call_operand.vmem [shape: bf16[2,7,64], index: 2, kind: input, shape index: {}]   ;;  %s5651_s3 = inlined_call_operand.vmem [shape: f32[2,1,7], index: 3, kind: input, shape index: {}]   ;;  %s5652_s4 = inlined_call_operand.vmem [shape: f32[1,64], index: 4, kind: input, shape index: {}]   ;;  %s5653_s5 = inlined_call_operand.vmem [shape: bf16[64,32], index: 5, kind: input, shape index: {}]   ;;  %s5654_s6 = inlined_call_operand.vmem [shape: f32[1,32], index: 6, kind: input, shape index: {}]   ;;  %s5655_s7 = inlined_call_operand.vmem [shape: f32[2,8,7], index: 7, kind: output, shape index: {0}]   ;;  %s5656_s8 = inlined_call_operand.vmem [shape: f32[2,8,7], index: 8, kind: output, shape index: {1}]  }
   0x1   :  { %s4444_s29 = smov 0  }
   0x2 LB: > { %s34_s30 = sadd.s32 1, %s4387_s28  ;;  %p4120_p0 = scmp.ge.s32.totalorder %s4391_s29, 1  ;;  %s4391_s29 = sphi %s4444_s29, %s19_s29   ;;  %s4387_s28 = sphi %s4442_s28, %s5890_s28   ;;  %s4383_s27 = sphi %s4440_s27, %s5889_s27  }
   0x3   : > { %p36_p1 = scmp.ge.s32.totalorder %s34_s30, 2  ;;  %p337_p2 = scmp.lt.s32.totalorder %s4391_s29, 3 }
   0x5   : > { %s5892_s30 = smov (%p36_p1, %s34_s30), 0  ;;  %p338_p3 = pnand %p4120_p0, %p337_p2 }
   0x7   : > { %341 = sbr.rel (%p338_p3) target bundleno = 872 (0x368), region = 48 }
   0xc   : > { %v4221_v0 = vld [vmem:[%s5653_s5 + $0x18] sm:$0xff]   ;;  %p408_p4 = scmp.lt.s32.totalorder %s4383_s27, 1  ;;  %v4222_v1 = vld [vmem:[%s5653_s5 + $0x10] sm:$0xff]   ;;  %v5657_v2 = vlaneseq  ;;  %v4223_v3 = vld [vmem:[%s5653_s5 + $0x8] sm:$0xff]   ;;  %v4393_v4 = vmov 1966171168  }
   0xd   : > { %4169 = vmatprep.subr.bf16.mxu0 %v4221_v0  ;;  %4185 = vmatprep.subr.bf16.mxu1 %v4221_v0  ;;  %v463_v5 = vunpack.c.l.s4 %v4393_v4  ;;  %v4224_v10 = vld [vmem:[%s5653_s5] sm:$0xff]   ;;  %vm1083_vm0 = vcmask 523264   ;;  %vm1958_vm1 = vcmask 260096   ;;  %vm3812_vm2 = vcmask 522240  }
   0xe   : > { %s5894_s27 = smov (!%p408_p4, %s4383_s27), 1  ;;  %4170 = vmatpush3.bf16.msra.mxu0 %v4221_v0  ;;  %4189 = vmatpush3.bf16.msra.mxu1 %v4221_v0  ;;  %v4477_v6 = vshrl.u32 %v5657_v2, 7  ;;  %v4126_v25 = vld [vmem:[%s5652_s4] ss:$0 sm:$0xff]  ;;  %vm3777_vm3 = vcmask 1041409   ;;  %vm3779_vm4 = vcmask 1042434  }
   0xf   : > { %4171 = vmatprep.subr.bf16.mxu0 %v4222_v1  ;;  %4186 = vmatprep.subr.bf16.mxu1 %v4222_v1  ;;  %s4470_s15 = sshll.u32 %s5894_s27, 2  ;;  %v464_v9 = vunpack.c.0.s8 %v463_v5  ;;  %vm3781_vm5 = vcmask 1043459   ;;  %vm3783_vm6 = vcmask 1044484   ;;  %vm3785_vm7 = vcmask 1045509   ;;  %s4124_s16 = sshll.u32 %s5894_s27, 3 }
  0x10   : > { %s414_s18 = scalar_lea.vmem %s5648_s0, %s4470_s15  ;;  %5738 = vst [vmem:[#allocation2_spill] sm:$0xff] %v4477_v6  ;;  %s421_s21 = scalar_lea.vmem %s5649_s1, %s4470_s15  ;;  %v4491_v15 = vsub.s32 0, %v4477_v6  ;;  %vm3787_vm8 = vcmask 1046534   ;;  %vm3789_vm9 = vcmask 1047559   ;;  %vm3792_vm10 = vcmask 56320  }
  0x11   : > { %v456_v7 = vld [vmem:[%s414_s18] sm:$0xf]  ;;  %v4487_v13 = vsub.s32 %v464_v9, %v4477_v6  ;;  %s428_s12 = scalar_lea.vmem %s5650_s2, %s4470_s15  ;;  %s434_s15 = scalar_lea.vmem %s5651_s3, %s5894_s27 }
  0x12   : > { %4172 = vmatpush3.bf16.msra.mxu0 %v4222_v1  ;;  %4190 = vmatpush3.bf16.msra.mxu1 %v4222_v1  ;;  %v457_v8 = vunpack.c.l.bf16 %v456_v7  ;;  %v458_v11 = vld [vmem:[%s421_s21] sm:$0xf]  ;;  %5740 = vst [vmem:[#allocation4_spill] sm:$0xff] %v4491_v15  ;;  %s444_s27 = scalar_lea.vmem %s5655_s7, %s4124_s16  ;;  %s454_s21 = scalar_lea.vmem %s5656_s8, %s4124_s16 }
  0x13   : > { %4173 = vmatprep.subr.bf16.mxu0 %v4223_v3  ;;  %4187 = vmatprep.subr.bf16.mxu1 %v4223_v3  ;;  %5739 = vst [vmem:[#allocation3_spill] sm:$0xff] %v4487_v13  ;;  %v459_v17 = vunpack.c.l.bf16 %v458_v11 }
  0x14   : > { %v461_v12 = vcombine.high %v457_v8, %v457_v8  ;;  %v468_v14 = vrot.slane %v457_v8, %v4487_v13 }
  0x16   : > { %4174 = vmatpush3.bf16.msra.mxu0 %v4223_v3  ;;  %4191 = vmatpush3.bf16.msra.mxu1 %v4223_v3  ;;  %v475_v16 = vrot.slane %v461_v12, %v4487_v13  ;;  %v476_v18 = vcombine.high %v468_v14, %v468_v14  ;;  %v484_v19 = vrot.slane %v468_v14, %v4487_v13 }
  0x17   : > { %4175 = vmatprep.subr.bf16.mxu0 %v4224_v10  ;;  %4188 = vmatprep.subr.bf16.mxu1 %v4224_v10 }
  0x18   : > { %v491_v20 = vrot.slane %v475_v16, %v4487_v13  ;;  %v477_v21 = vcombine.high %v475_v16, %v475_v16  ;;  %v498_v22 = vrot.slane %v476_v18, %v4487_v13  ;;  %v506_v23 = vcombine.high %v484_v19, %v484_v19 }
  0x19   : > { %v513_v24 = vrot.slane %v484_v19, %v4491_v15 }
  0x1a   : > { %4176 = vmatpush3.bf16.msra.mxu0 %v4224_v10  ;;  %4192 = vmatpush3.bf16.msra.mxu1 %v4224_v10  ;;  %v529_v26 = vrot.slane %v491_v20, %v4491_v15  ;;  %v505_v27 = vrot.slane %v477_v21, %v4487_v13  ;;  %v508_v28 = vcombine.high %v498_v22, %v498_v22 }
  0x1b   : > { %v517_v29 = vrot.slane %v498_v22, %v4491_v15  ;;  %v521_v30 = vrot.slane %v506_v23, %v4491_v15  ;;  %v550_v31 = vadd.f32 %v513_v24, %v459_v17  ;;  %v507_v39 = vcombine.high %v491_v20, %v491_v20 }
  0x1c   : > { %v554_v32 = vadd.f32 %v529_v26, %v459_v17  ;;  %v533_v33 = vrot.slane %v505_v27, %v4491_v15  ;;  %v525_v37 = vrot.slane %v508_v28, %v4491_v15  ;;  %v509_v44 = vcombine.high %v505_v27, %v505_v27 }
  0x1d   : > { %v551_v34 = vadd.f32 %v517_v29, %v459_v17  ;;  %v552_v35 = vadd.f32 %v521_v30, %v459_v17  ;;  %v565_v36 = vadd.f32 %v4126_v25, %v550_v31  ;;  %v537_v47 = vrot.slane %v507_v39, %v4491_v15 }
  0x1e   : > { %v569_v38 = vadd.f32 %v4126_v25, %v554_v32  ;;  %v555_v40 = vadd.f32 %v533_v33, %v459_v17  ;;  %v553_v43 = vadd.f32 %v525_v37, %v459_v17  ;;  %v541_v48 = vrot.slane %v509_v44, %v4491_v15 }
  0x1f   : > { %v566_v41 = vadd.f32 %v4126_v25, %v551_v34  ;;  %v567_v42 = vadd.f32 %v4126_v25, %v552_v35  ;;  %4225 = vtanh.f32 %v565_v36  ;;  %v556_v49 = vadd.f32 %v537_v47, %v459_v17 }
  0x20   : > { %4227 = vtanh.f32 %v569_v38  ;;  %v570_v45 = vadd.f32 %v4126_v25, %v555_v40  ;;  %v568_v46 = vadd.f32 %v4126_v25, %v553_v43  ;;  %v557_v50 = vadd.f32 %v541_v48, %v459_v17 }
  0x21   : > { %4229 = vtanh.f32 %v566_v41  ;;  %v571_v51 = vadd.f32 %v4126_v25, %v556_v49 }
  0x22   : > { %4231 = vtanh.f32 %v567_v42  ;;  %v572_v53 = vadd.f32 %v4126_v25, %v557_v50 }
  0x23   : > { %4233 = vtanh.f32 %v568_v46 }
  0x24   : > { %4235 = vtanh.f32 %v570_v45 }
  0x25   : > { %4237 = vtanh.f32 %v571_v51 }
  0x26   : > { %4239 = vtanh.f32 %v572_v53 }
  0x2c   : > { %v4226_v52 = vpop.eup %4225 }
  0x2d   : > { %v4228_v54 = vpop.eup %4227  ;;  %v4509_v55 = vpack.c.bf16 %v4226_v52, %v4226_v52 }
  0x2e   : > { %v4230_v56 = vpop.eup %4229  ;;  %v4511_v57 = vpack.c.bf16 %v4228_v54, %v4228_v54 }
  0x2f   : > { %5741 = vst [vmem:[#allocation5_spill] sm:$0xff] %v4509_v55  ;;  %v4232_v58 = vpop.eup %4231  ;;  %v4513_v59 = vpack.c.bf16 %v4230_v56, %v4230_v56  ;;  %v603_v60 = vrot.slane %v4509_v55, %v4487_v13 }
  0x30   : > { %5742 = vst [vmem:[#allocation6_spill] sm:$0xff] %v4511_v57  ;;  %v4234_v61 = vpop.eup %4233  ;;  %v4517_v62 = vpack.c.bf16 %v4232_v58, %v4232_v58  ;;  %v699_v63 = vrot.slane %v4511_v57, %v4487_v13 }
  0x31   : > { %5743 = vst [vmem:[#allocation7_spill] sm:$0xff] %v4513_v59  ;;  %v4236_v0 = vpop.eup %4235  ;;  %v604_v1 = vcombine.high %v603_v60, %v603_v60  ;;  %v611_v3 = vrot.slane %v603_v60, %v4487_v13  ;;  %v627_v4 = vrot.slane %v4513_v59, %v4487_v13  ;;  %v4524_v5 = vpack.c.bf16 %v4234_v61, %v4234_v61 }
  0x32   : > { %5744 = vst [vmem:[#allocation8_spill] sm:$0xff] %v4517_v62  ;;  %v651_v7 = vrot.slane %v4517_v62, %v4487_v13  ;;  %v700_v8 = vcombine.high %v699_v63, %v699_v63  ;;  %v4529_v9 = vrot.slane %v699_v63, %v4487_v13  ;;  %v4531_v10 = vpack.c.bf16 %v4236_v0, %v4236_v0  ;;  %v4238_v49 = vpop.eup %4237 }
  0x33   : > { %5745 = vst [vmem:[#allocation9_spill] sm:$0xff] %v4524_v5  ;;  %v618_v11 = vrot.slane %v604_v1, %v4487_v13  ;;  %v619_v12 = vcombine.high %v611_v3, %v611_v3  ;;  %v628_v14 = vcombine.high %v627_v4, %v627_v4  ;;  %v635_v16 = vrot.slane %v627_v4, %v4487_v13  ;;  %v4240_v54 = vpop.eup %4239 }
  0x34   : > { %5746 = vst [vmem:[#allocation10_spill] sm:$0xff] %v4531_v10  ;;  %v652_v17 = vcombine.high %v651_v7, %v651_v7  ;;  %v659_v18 = vrot.slane %v651_v7, %v4487_v13  ;;  %v675_v19 = vrot.slane %v4524_v5, %v4487_v13  ;;  %v4539_v20 = vrot.slane %v700_v8, %v4487_v13 }
  0x35   : > { %v620_v21 = vcombine.high %v618_v11, %v618_v11  ;;  %v642_v22 = vrot.slane %v628_v14, %v4487_v13  ;;  %v643_v23 = vcombine.high %v635_v16, %v635_v16  ;;  %v797_v24 = vunpack.i.h.s16 %v635_v16 }
  0x36   : > { %v667_v25 = vcombine.high %v659_v18, %v659_v18  ;;  %v888_v26 = vcombine.low %v611_v3, %v618_v11  ;;  %v666_v27 = vrot.slane %v652_v17, %v4487_v13  ;;  %v676_v28 = vcombine.high %v675_v19, %v675_v19 }
  0x37   : > { %v644_v29 = vcombine.high %v642_v22, %v642_v22  ;;  %v799_v30 = vunpack.i.h.s16 %v642_v22  ;;  %v801_v31 = vunpack.i.h.s16 %v643_v23  ;;  %v4128_v32 = vpack.i.b16 %v635_v16, %v620_v21 }
  0x38   : > { %v4129_v33 = vpack.i.b16 %v642_v22, %v797_v24  ;;  %v898_v34 = vrot.slane %v888_v26, %v4487_v13  ;;  %v668_v35 = vcombine.high %v666_v27, %v666_v27  ;;  %v683_v36 = vrot.slane %v675_v19, %v4487_v13 }
  0x39   : > { %v4130_v37 = vpack.i.b16 %v643_v23, %v799_v30  ;;  %v4131_v38 = vpack.i.b16 %v644_v29, %v801_v31  ;;  %v889_v39 = vcombine.low %v619_v12, %v4128_v32  ;;  %v690_v40 = vrot.slane %v676_v28, %v4487_v13 }
  0x3a   : > { %v691_v41 = vcombine.high %v683_v36, %v683_v36  ;;  %v811_v42 = vunpack.i.h.s16 %v683_v36  ;;  %v4132_v43 = vpack.i.b16 %v683_v36, %v668_v35  ;;  %v937_v44 = vcombine.low %v666_v27, %v667_v25 }
  0x3b   : > { %v890_v45 = vcombine.low %v4129_v33, %v4130_v37  ;;  %v891_v46 = vcombine.low %v4131_v38, %v659_v18  ;;  %v905_v47 = vrot.slane %v889_v39, %v4487_v13  ;;  %v692_v48 = vcombine.high %v690_v40, %v690_v40 }
  0x3c   : > { %v813_v50 = vunpack.i.h.s16 %v690_v40  ;;  %v815_v51 = vunpack.i.h.s16 %v691_v41  ;;  %v4133_v52 = vpack.i.b16 %v690_v40, %v811_v42  ;;  %v940_v53 = vcombine.low %v4529_v9, %v4539_v20 }
  0x3d   : > { %v912_v56 = vrot.slane %v890_v45, %v4487_v13  ;;  %v919_v58 = vrot.slane %v891_v46, %v4487_v13  ;;  %v920_v60 = vcombine.low %v898_v34, %v905_v47  ;;  %v947_v1 = vrot.slane %v937_v44, %v4487_v13 }
  0x3e   : > { %v4134_v61 = vpack.i.b16 %v691_v41, %v813_v50  ;;  %v4135_v63 = vpack.i.b16 %v692_v48, %v815_v51  ;;  %v938_v0 = vcombine.low %v4132_v43, %v4133_v52  ;;  %v968_v7 = vrot.slane %v940_v53, %v4487_v13 }
  0x3f   : > { %v921_v3 = vcombine.low %v912_v56, %v919_v58  ;;  %v928_v4 = vrot.slane %v920_v60, %v4487_v13  ;;  %v4554_v8 = vpack.c.bf16 %v4238_v49, %v4238_v49  ;;  %v715_v14 = vcombine.high %v4529_v9, %v4529_v9 }
  0x40   : > { %v939_v11 = vcombine.low %v4134_v61, %v4135_v63  ;;  %v954_v12 = vrot.slane %v938_v0, %v4487_v13  ;;  %v723_v16 = vrot.slane %v4531_v10, %v4487_v13  ;;  %v716_v18 = vcombine.high %v4539_v20, %v4539_v20 }
  0x41   : > { %5747 = vst [vmem:[#allocation11_spill] sm:$0xff] %v4554_v8  ;;  %v935_v17 = vrot.slane %v921_v3, %v4487_v13  ;;  %v747_v19 = vrot.slane %v4554_v8, %v4487_v13  ;;  %v4566_v21 = vpack.c.bf16 %v4240_v54, %v4240_v54 }
  0x42   : > { %v961_v22 = vrot.slane %v939_v11, %v4487_v13  ;;  %v969_v23 = vcombine.low %v947_v1, %v954_v12  ;;  %v724_v24 = vcombine.high %v723_v16, %v723_v16  ;;  %v731_v25 = vrot.slane %v723_v16, %v4487_v13 }
  0x43   : > { %5748 = vst [vmem:[#allocation12_spill] sm:$0xff] %v4566_v21  ;;  %v936_v9 = vcombine.low %v928_v4, %v935_v17  ;;  %v748_v26 = vcombine.high %v747_v19, %v747_v19  ;;  %v755_v27 = vrot.slane %v747_v19, %v4487_v13  ;;  %v771_v28 = vrot.slane %v4566_v21, %v4487_v13 }
  0x44   : > { %v970_v29 = vcombine.low %v961_v22, %v968_v7  ;;  %v977_v20 = vrot.slane %v969_v23, %v4487_v13  ;;  %v738_v30 = vrot.slane %v724_v24, %v4487_v13  ;;  %v739_v31 = vcombine.high %v731_v25, %v731_v25 }
  0x45   : > { %4177 = vmatprep.mubr.msk.bf16.mxu0 %vm1083_vm0, %v936_v9  ;;  %v762_v32 = vrot.slane %v748_v26, %v4487_v13  ;;  %v763_v33 = vcombine.high %v755_v27, %v755_v27  ;;  %v825_v34 = vunpack.i.h.s16 %v731_v25  ;;  %v4136_v35 = vpack.i.b16 %v731_v25, %v716_v18  ;;  %v4595_v9 = vld [vmem:[%s5654_s6] ss:$0 sm:$0xff] }
  0x46   : > { %v984_v36 = vrot.slane %v970_v29, %v4487_v13  ;;  %v740_v37 = vcombine.high %v738_v30, %v738_v30  ;;  %v827_v38 = vunpack.i.h.s16 %v738_v30  ;;  %v829_v39 = vunpack.i.h.s16 %v739_v31 }
  0x47   : > { %v764_v40 = vcombine.high %v762_v32, %v762_v32  ;;  %v4137_v41 = vpack.i.b16 %v738_v30, %v825_v34  ;;  %v986_v42 = vcombine.low %v715_v14, %v4136_v35  ;;  %v989_v43 = vcombine.low %v762_v32, %v763_v33 }
  0x48   : > { %v985_v44 = vcombine.low %v977_v20, %v984_v36  ;;  %v4138_v45 = vpack.i.b16 %v739_v31, %v827_v38  ;;  %v4139_v46 = vpack.i.b16 %v740_v37, %v829_v39  ;;  %v772_v47 = vcombine.high %v771_v28, %v771_v28 }
  0x49   : > { %v996_v48 = vrot.slane %v986_v42, %v4487_v13  ;;  %v779_v49 = vrot.slane %v771_v28, %v4487_v13  ;;  %v1017_v52 = vrot.slane %v989_v43, %v4487_v13 }
  0x4a   : > { %4178 = vmatmul.mubr.msk.bf16.vlgmr.msra.gmra.mxu0 %vm1083_vm0, %v985_v44  ;;  %v987_v50 = vcombine.low %v4137_v41, %v4138_v45  ;;  %v988_v51 = vcombine.low %v4139_v46, %v755_v27  ;;  %v786_v53 = vrot.slane %v772_v47, %v4487_v13 }
  0x4b   : > { %v787_v54 = vcombine.high %v779_v49, %v779_v49  ;;  %v839_v56 = vunpack.i.h.s16 %v779_v49  ;;  %v4140_v58 = vpack.i.b16 %v779_v49, %v764_v40 }
  0x4c   : > { %v1003_v60 = vrot.slane %v987_v50, %v4487_v13  ;;  %v1010_v61 = vrot.slane %v988_v51, %v4487_v13  ;;  %v788_v63 = vcombine.high %v786_v53, %v786_v53  ;;  %v841_v0 = vunpack.i.h.s16 %v786_v53 }
  0x4d   : > { %v843_v1 = vunpack.i.h.s16 %v787_v54  ;;  %v4141_v3 = vpack.i.b16 %v786_v53, %v839_v56 }
  0x4e   : > { %v1018_v4 = vcombine.low %v996_v48, %v1003_v60  ;;  %v1019_v7 = vcombine.low %v1010_v61, %v1017_v52  ;;  %v4142_v11 = vpack.i.b16 %v787_v54, %v841_v0 }
  0x4f   : > { %v4143_v12 = vpack.i.b16 %v788_v63, %v843_v1  ;;  %v1035_v14 = vcombine.low %v4140_v58, %v4141_v3 }
  0x50   : > { %v1026_v16 = vrot.slane %v1018_v4, %v4487_v13  ;;  %v1033_v17 = vrot.slane %v1019_v7, %v4487_v13 }
  0x51   : > { %v1036_v18 = vcombine.low %v4142_v11, %v4143_v12  ;;  %v1043_v19 = vrot.slane %v1035_v14, %v4487_v13 }
  0x52   : > { %v1034_v22 = vcombine.low %v1026_v16, %v1033_v17 }
  0x53   : > { %v1050_v23 = vrot.slane %v1036_v18, %v4487_v13 }
  0x54   : > { %4181 = vmatprep.mubr.msk.bf16.mxu1 %vm1083_vm0, %v1034_v22 }
  0x55   : > { %v1051_v24 = vcombine.low %v1043_v19, %v1050_v23 }
  0x57   : > { %v1058_v25 = vrot.slane %v1051_v24, %v4487_v13 }
  0x59   : > { %4182 = vmatmul.mubr.msk.bf16.vlgmr.msra.gmra.mxu1 %vm1083_vm0, %v1058_v25 }
 0x10a   : > { %v4179_v26 = vpop.f32.mrf.mxu0 }
 0x10b   : > { %v1139_v27 = vadd.f32 %v4179_v26, %v4595_v9 }
 0x10c   : > { %v1130_v28 = vpop.f32.mrf.mxu0 }
 0x10d   : > { %v1265_v29 = vcombine.high %v1139_v27, %v1139_v27  ;;  %v1131_v20 = vadd.f32 %v4595_v9, %v1130_v28  ;;  %v1272_v33 = vrot.slane %v1139_v27, %v4487_v13 }
 0x10e   : > { %v4180_v30 = vpop.f32.mrf.mxu0 }
 0x10f   : > { %v1279_v31 = vrot.slane %v1265_v29, %v4487_v13  ;;  %v1167_v32 = vcombine.high %v1131_v20, %v1131_v20  ;;  %v1142_v34 = vadd.f32 %v4180_v30, %v4595_v9  ;;  %v1174_v37 = vrot.slane %v1131_v20, %v4487_v13 }
 0x110   : > { %v1133_v35 = vpop.f32.mrf.mxu0  ;;  %v1280_v43 = vcombine.high %v1272_v33, %v1272_v33  ;;  %v4618_v52 = vrot.slane %v1272_v33, %v4487_v13 }
 0x111   : > { %v1281_v36 = vcombine.high %v1279_v31, %v1279_v31  ;;  %v1181_v38 = vrot.slane %v1167_v32, %v4487_v13  ;;  %v1314_v39 = vcombine.high %v1142_v34, %v1142_v34  ;;  %v4605_v40 = vrot.slane %v1279_v31, %v4487_v13 }
 0x112   : > { %v1321_v41 = vrot.slane %v1142_v34, %v4487_v13  ;;  %v1134_v42 = vadd.f32 %v4595_v9, %v1133_v35  ;;  %v1182_v49 = vcombine.high %v1174_v37, %v1174_v37  ;;  %5752 = vst [vmem:[#allocation16_spill] sm:$0xff] %v4618_v52  ;;  %v4628_v56 = vrot.slane %v1280_v43, %v4487_v13 }
 0x113   : > { %5749 = vst [vmem:[#allocation13_spill] sm:$0xff] %v4605_v40  ;;  %v4610_v44 = vrot.slane %v1281_v36, %v4487_v13  ;;  %v1328_v45 = vrot.slane %v1314_v39, %v4487_v13  ;;  %v1183_v50 = vcombine.high %v1181_v38, %v1181_v38  ;;  %v4625_v54 = vcombine.high %v4605_v40, %v4605_v40 }
 0x114   : > { %v1329_v46 = vcombine.high %v1321_v41, %v1321_v41  ;;  %v4614_v47 = vrot.slane %v1321_v41, %v4487_v13  ;;  %v1216_v48 = vcombine.high %v1134_v42, %v1134_v42  ;;  %v1223_v51 = vrot.slane %v1134_v42, %v4487_v13  ;;  %5755 = vst [vmem:[#allocation19_spill] sm:$0xff] %v4628_v56 }
 0x115   : > { %5750 = vst [vmem:[#allocation14_spill] sm:$0xff] %v4610_v44  ;;  %5754 = vst [vmem:[#allocation18_spill] sm:$0xff] %v4625_v54  ;;  %v4631_v58 = vrot.slane %v1174_v37, %v4487_v13  ;;  %v4639_v61 = vcombine.high %v4610_v44, %v4610_v44  ;;  %v4642_v0 = vrot.slane %v1181_v38, %v4487_v13 }
 0x116   : > { %5751 = vst [vmem:[#allocation15_spill] sm:$0xff] %v4614_v47  ;;  %v4621_v53 = vrot.slane %v1329_v46, %v4487_v13  ;;  %v4635_v60 = vcombine.high %v4614_v47, %v4614_v47  ;;  %v1330_v1 = vcombine.high %v1328_v45, %v1328_v45  ;;  %v1230_v3 = vrot.slane %v1216_v48, %v4487_v13 }
 0x117   : > { %5756 = vst [vmem:[#allocation20_spill] sm:$0xff] %v4631_v58  ;;  %5758 = vst [vmem:[#allocation22_spill] sm:$0xff] %v4639_v61  ;;  %v1231_v4 = vcombine.high %v1223_v51, %v1223_v51  ;;  %v4647_v11 = vrot.slane %v1182_v49, %v4487_v13  ;;  %v4650_v12 = vrot.slane %v1183_v50, %v4487_v13 }
 0x118   : > { %5753 = vst [vmem:[#allocation17_spill] sm:$0xff] %v4621_v53  ;;  %5757 = vst [vmem:[#allocation21_spill] sm:$0xff] %v4635_v60  ;;  %v4653_v14 = vrot.slane %v1328_v45, %v4487_v13  ;;  %v4656_v17 = vrot.slane %v1223_v51, %v4487_v13  ;;  %v4660_v18 = vcombine.high %v4621_v53, %v4621_v53 }
 0x119   : > { %v4183_v63 = vpop.f32.mrf.mxu1  ;;  %5759 = vst [vmem:[#allocation23_spill] sm:$0xff] %v4642_v0  ;;  %5760 = vst [vmem:[#allocation24_spill] sm:$0xff] %v4647_v11  ;;  %v1710_v19 = vcombine.low %v4610_v44, %v4625_v54  ;;  %v1711_v22 = vcombine.low %v4639_v61, %v4614_v47  ;;  %v1712_v26 = vcombine.low %v4621_v53, %v4635_v60 }
 0x11a   : > { %v1155_v7 = vadd.f32 %v4183_v63, %v4595_v9  ;;  %5761 = vst [vmem:[#allocation25_spill] sm:$0xff] %v4650_v12  ;;  %5762 = vst [vmem:[#allocation26_spill] sm:$0xff] %v4653_v14  ;;  %v4671_v27 = vrot.slane %v1330_v1, %v4487_v13  ;;  %v1232_v29 = vcombine.high %v1230_v3, %v1230_v3 }
 0x11b   : > { %v1146_v16 = vpop.f32.mrf.mxu1  ;;  %5763 = vst [vmem:[#allocation27_spill] sm:$0xff] %v4656_v17  ;;  %5764 = vst [vmem:[#allocation28_spill] sm:$0xff] %v4660_v18  ;;  %v4674_v20 = vrot.slane %v1230_v3, %v4487_v13  ;;  %v4677_v30 = vrot.slane %v1231_v4, %v4487_v13  ;;  %v1726_v34 = vrot.slane %v1711_v22, %v4487_v13 }
 0x11c   : > { %v1461_v23 = vcombine.high %v1155_v7, %v1155_v7  ;;  %v1468_v24 = vrot.slane %v1155_v7, %v4487_v13  ;;  %v1147_v25 = vadd.f32 %v4595_v9, %v1146_v16  ;;  %5765 = vst [vmem:[#allocation29_spill] sm:$0xff] %v4671_v27  ;;  %v4687_v37 = vcombine.high %v4656_v17, %v4656_v17 }
 0x11d   : > { %v4184_v28 = vpop.f32.mrf.mxu1  ;;  %5766 = vst [vmem:[#allocation30_spill] sm:$0xff] %v4674_v20  ;;  %5767 = vst [vmem:[#allocation31_spill] sm:$0xff] %v4677_v30  ;;  %v1719_v39 = vrot.slane %v1710_v19, %v4487_v13  ;;  %v1733_v43 = vrot.slane %v1712_v26, %v4487_v13  ;;  %v1740_v45 = vrot.slane %v4660_v18, %v4487_v13 }
 0x11e   : > { %v1475_v31 = vrot.slane %v1461_v23, %v4487_v13  ;;  %v1476_v32 = vcombine.high %v1468_v24, %v1468_v24  ;;  %v1363_v33 = vcombine.high %v1147_v25, %v1147_v25  ;;  %v4682_v35 = vrot.slane %v1468_v24, %v4487_v13  ;;  %5769 = vst [vmem:[#allocation33_spill] sm:$0xff] %v4687_v37 }
 0x11f   : > { %v1370_v36 = vrot.slane %v1147_v25, %v4487_v13  ;;  %v1149_v38 = vpop.f32.mrf.mxu1  ;;  %v4705_v63 = vrot.slane %v1232_v29, %v4487_v13  ;;  %v4709_v1 = vcombine.high %v4677_v30, %v4677_v30  ;;  %v1741_v3 = vcombine.low %v1719_v39, %v1726_v34 }
 0x120   : > { %5768 = vst [vmem:[#allocation32_spill] sm:$0xff] %v4682_v35  ;;  %v1477_v41 = vcombine.high %v1475_v31, %v1475_v31  ;;  %v4691_v42 = vrot.slane %v1475_v31, %v4487_v13  ;;  %v4697_v46 = vrot.slane %v1476_v32, %v4487_v13  ;;  %v1377_v48 = vrot.slane %v1363_v33, %v4487_v13 }
 0x121   : > { %v1378_v49 = vcombine.high %v1370_v36, %v1370_v36  ;;  %v1150_v50 = vadd.f32 %v4595_v9, %v1149_v38  ;;  %v4702_v51 = vrot.slane %v1370_v36, %v4487_v13  ;;  %5772 = vst [vmem:[#allocation36_spill] sm:$0xff] %v4705_v63  ;;  %5773 = vst [vmem:[#allocation37_spill] sm:$0xff] %v4709_v1 }
 0x122   : > { %5770 = vst [vmem:[#allocation34_spill] sm:$0xff] %v4697_v46  ;;  %v4712_v4 = vrot.slane %v1477_v41, %v4487_v13  ;;  %v4716_v7 = vcombine.high %v4682_v35, %v4682_v35  ;;  %v1379_v16 = vcombine.high %v1377_v48, %v1377_v48  ;;  %v4719_v9 = vrot.slane %v1377_v48, %v4487_v13 }
 0x123   : > { %5771 = vst [vmem:[#allocation35_spill] sm:$0xff] %v4702_v51  ;;  %v4722_v19 = vrot.slane %v1378_v49, %v4487_v13  ;;  %v1412_v22 = vcombine.high %v1150_v50, %v1150_v50  ;;  %v1419_v23 = vrot.slane %v1150_v50, %v4487_v13  ;;  %v1742_v24 = vcombine.low %v1733_v43, %v1740_v45 }
 0x124   : > { %5774 = vst [vmem:[#allocation38_spill] sm:$0xff] %v4712_v4  ;;  %5775 = vst [vmem:[#allocation39_spill] sm:$0xff] %v4716_v7  ;;  %v4727_v25 = vcombine.high %v4691_v42, %v4691_v42  ;;  %v4731_v26 = vcombine.high %v4697_v46, %v4697_v46  ;;  %v1749_v28 = vrot.slane %v1741_v3, %v4487_v13 }
 0x125   : > { %5776 = vst [vmem:[#allocation40_spill] sm:$0xff] %v4719_v9  ;;  %5777 = vst [vmem:[#allocation41_spill] sm:$0xff] %v4722_v19  ;;  %v4736_v29 = vcombine.high %v4642_v0, %v4642_v0  ;;  %v4740_v31 = vcombine.high %v4702_v51, %v4702_v51  ;;  %v1426_v32 = vrot.slane %v1412_v22, %v4487_v13 }
 0x126   : > { %5778 = vst [vmem:[#allocation42_spill] sm:$0xff] %v4727_v25  ;;  %v1427_v33 = vcombine.high %v1419_v23, %v1419_v23  ;;  %v1756_v34 = vrot.slane %v1742_v24, %v4487_v13  ;;  %v4745_v36 = vrot.slane %v1379_v16, %v4487_v13  ;;  %v1566_v38 = vcombine.low %v4631_v58, %v4647_v11 }
 0x127   : > { %5779 = vst [vmem:[#allocation43_spill] sm:$0xff] %v4736_v29  ;;  %5780 = vst [vmem:[#allocation44_spill] sm:$0xff] %v4740_v31  ;;  %v4152_v39 = vcombine.high %v4631_v58, %v4647_v11  ;;  %v1568_v41 = vcombine.low %v4642_v0, %v4650_v12  ;;  %v4755_v43 = vcombine.high %v4719_v9, %v4719_v9 }
 0x128   : > { %5781 = vst [vmem:[#allocation45_spill] sm:$0xff] %v4745_v36  ;;  %v4759_v45 = vcombine.high %v4722_v19, %v4722_v19  ;;  %v1428_v48 = vcombine.high %v1426_v32, %v1426_v32  ;;  %v1596_v49 = vrot.slane %v4736_v29, %v4487_v13  ;;  %v1757_v50 = vcombine.low %v1749_v28, %v1756_v34 }
 0x129   : > { %5782 = vst [vmem:[#allocation46_spill] sm:$0xff] %v4755_v43  ;;  %v1575_v3 = vrot.slane %v1566_v38, %v4487_v13  ;;  %v1582_v16 = vrot.slane %v4152_v39, %v4487_v13  ;;  %v1589_v22 = vrot.slane %v1568_v41, %v4487_v13  ;;  %v4767_v24 = vrot.slane %v1419_v23, %v4487_v13 }
 0x12a   : > { %5783 = vst [vmem:[#allocation47_spill] sm:$0xff] %v4759_v45  ;;  %v4770_v2 = vrot.slane %v1426_v32, %v4487_v13  ;;  %v4773_v21 = vrot.slane %v1427_v33, %v4487_v13  ;;  %v4153_v8 = vcombine.high %v4674_v20, %v4705_v63  ;;  %v1968_v28 = vsel %vm1958_vm1, %v1757_v50, -inf }
 0x12b   : > { %5784 = vst [vmem:[#allocation48_spill] sm:$0xff] %v4767_v24  ;;  %v1597_v34 = vcombine.low %v1575_v3, %v1582_v16  ;;  %v1598_v38 = vcombine.low %v1589_v22, %v1596_v49  ;;  %v1663_v39 = vcombine.low %v4618_v52, %v4628_v56  ;;  %v4781_v41 = vrot.slane %v1428_v48, %v4487_v13 }
 0x12c   : > { %5785 = vst [vmem:[#allocation49_spill] sm:$0xff] %v4770_v2  ;;  %1969 = vmax.xlane.f32.xlu1 %v1968_v28  ;;  %v4154_v23 = vcombine.high %v4618_v52, %v4628_v56  ;;  %v1671_v32 = vrot.slane %v4153_v8, %v4487_v13  ;;  %v1692_v33 = vrot.slane %v4605_v40, %v4487_v13 }
 0x12d   : > { %v1605_v10 = vrot.slane %v1597_v34, %v4487_v13  ;;  %v1612_v50 = vrot.slane %v1598_v38, %v4487_v13  ;;  %v1678_v49 = vrot.slane %v1663_v39, %v4487_v13  ;;  %v4793_v3 = vcombine.high %v4650_v12, %v4650_v12 }
 0x12e   : > { %v1685_v48 = vrot.slane %v4154_v23, %v4487_v13  ;;  %v1615_v16 = vcombine.low %v4677_v30, %v4687_v37  ;;  %v1616_v8 = vcombine.low %v4709_v1, %v4674_v20  ;;  %v1644_v22 = vrot.slane %v4705_v63, %v4487_v13 }
 0x12f   : > { %5786 = vst [vmem:[#allocation50_spill] sm:$0xff] %v4793_v3  ;;  %v1613_v28 = vcombine.low %v1605_v10, %v1612_v50  ;;  %v1693_v34 = vcombine.low %v1671_v32, %v1678_v49  ;;  %v1614_v38 = vcombine.low %v4793_v3, %v4656_v17  ;;  %v1758_v39 = vcombine.low %v4653_v14, %v4671_v27 }
 0x130   : > { %v1694_v5 = vcombine.low %v1685_v48, %v1692_v33  ;;  %v1630_v23 = vrot.slane %v1615_v16, %v4487_v13  ;;  %v1637_v59 = vrot.slane %v1616_v8, %v4487_v13  ;;  %v4155_v57 = vcombine.high %v4653_v14, %v4671_v27 }
 0x131   : > { %v1959_v62 = vsel %vm1958_vm1, %v1613_v28, -inf  ;;  %v1701_v40 = vrot.slane %v1693_v34, %v4487_v13  ;;  %v1623_v10 = vrot.slane %v1614_v38, %v4487_v13  ;;  %v1760_v32 = vcombine.low %v4702_v51, %v4722_v19 }
 0x132   : > { %1960 = vmax.xlane.f32.xlu0 %v1959_v62  ;;  %v1708_v50 = vrot.slane %v1694_v5, %v4487_v13  ;;  %v1646_v33 = vcombine.low %v1637_v59, %v1644_v22  ;;  %v1767_v49 = vrot.slane %v1758_v39, %v4487_v13  ;;  %v1774_v48 = vrot.slane %v4155_v57, %v4487_v13 }
 0x133   : > { %v1645_v16 = vcombine.low %v1623_v10, %v1630_v23  ;;  %v1781_v8 = vrot.slane %v1760_v32, %v4487_v13  ;;  %v1788_v28 = vrot.slane %v4740_v31, %v4487_v13  ;;  %v4823_v34 = vcombine.high %v4745_v36, %v4745_v36 }
 0x134   : > { %v1709_v38 = vcombine.low %v1701_v40, %v1708_v50  ;;  %v1660_v62 = vrot.slane %v1646_v33, %v4487_v13  ;;  %v1789_v55 = vcombine.low %v1767_v49, %v1774_v48  ;;  %v1806_v59 = vcombine.low %v4759_v45, %v4719_v9 }
 0x135   : > { %5787 = vst [vmem:[#allocation51_spill] sm:$0xff] %v4823_v34  ;;  %v1653_v5 = vrot.slane %v1645_v16, %v4487_v13  ;;  %v1790_v57 = vcombine.low %v1781_v8, %v1788_v28  ;;  %v1807_v22 = vcombine.low %v4745_v36, %v4755_v43  ;;  %v1808_v39 = vcombine.low %v4823_v34, %v4767_v24 }
 0x136   : > { %v1965_v23 = vsel %vm1958_vm1, %v1709_v38, -inf  ;;  %v1797_v10 = vrot.slane %v1789_v55, %v4487_v13  ;;  %v1815_v40 = vrot.slane %v1806_v59, %v4487_v13  ;;  %v1836_v32 = vrot.slane %v4773_v21, %v4487_v13 }
 0x137   : > { %1966 = vmax.xlane.f32.xlu1 %v1965_v23  ;;  %v1661_v50 = vcombine.low %v1653_v5, %v1660_v62  ;;  %v1804_v33 = vrot.slane %v1790_v57, %v4487_v13  ;;  %v1822_v49 = vrot.slane %v1807_v22, %v4487_v13  ;;  %v1829_v48 = vrot.slane %v1808_v39, %v4487_v13 }
 0x138   : > { %v4156_v16 = vcombine.high %v4767_v24, %v4773_v21  ;;  %v1855_v8 = vcombine.low %v4770_v2, %v4781_v41  ;;  %v4157_v55 = vcombine.high %v4770_v2, %v4781_v41  ;;  %v1884_v28 = vrot.slane %v4682_v35, %v4487_v13 }
 0x139   : > { %v1962_v38 = vsel %vm1958_vm1, %v1661_v50, -inf  ;;  %v1805_v62 = vcombine.low %v1797_v10, %v1804_v33  ;;  %v1837_v59 = vcombine.low %v1815_v40, %v1822_v49  ;;  %v1838_v5 = vcombine.low %v1829_v48, %v1836_v32 }
 0x13a   : > { %1963 = vmax.xlane.f32.xlu0 %v1962_v38  ;;  %v1863_v57 = vrot.slane %v4156_v16, %v4487_v13  ;;  %v1870_v22 = vrot.slane %v1855_v8, %v4487_v13  ;;  %v1877_v39 = vrot.slane %v4157_v55, %v4487_v13  ;;  %v4855_v23 = vcombine.high %v4712_v4, %v4712_v4 }
 0x13b   : > { %v1845_v31 = vrot.slane %v1837_v59, %v4487_v13  ;;  %v1852_v35 = vrot.slane %v1838_v5, %v4487_v13  ;;  %v1902_v10 = vcombine.low %v4697_v46, %v4716_v7  ;;  %v1903_v50 = vcombine.low %v4731_v26, %v4691_v42 }
 0x13c   : > { %5788 = vst [vmem:[#allocation52_spill] sm:$0xff] %v4855_v23  ;;  %v1885_v40 = vcombine.low %v1863_v57, %v1870_v22  ;;  %v1886_v32 = vcombine.low %v1877_v39, %v1884_v28  ;;  %v1904_v33 = vcombine.low %v4712_v4, %v4727_v25  ;;  %v1971_v49 = vsel %vm1958_vm1, %v1805_v62, -inf }
 0x13d   : > { %v1853_v48 = vcombine.low %v1845_v31, %v1852_v35  ;;  %v1911_v16 = vrot.slane %v1902_v10, %v4487_v13  ;;  %v1932_v8 = vrot.slane %v4855_v23, %v4487_v13  ;;  %v1918_v28 = vrot.slane %v1903_v50, %v4487_v13 }
 0x13e   : > { %1972 = vmax.xlane.f32.xlu0 %v1971_v49  ;;  %v1893_v55 = vrot.slane %v1885_v40, %v4487_v13  ;;  %v1900_v38 = vrot.slane %v1886_v32, %v4487_v13  ;;  %v1925_v59 = vrot.slane %v1904_v33, %v4487_v13  ;;  %v4879_v32 = vsub.s32 1, %v4477_v6 }
 0x13f   : > { %v1974_v5 = vsel %vm1958_vm1, %v1853_v48, -inf  ;;  %v1933_v62 = vcombine.low %v1911_v16, %v1918_v28  ;;  %v4882_v50 = vsub.s32 2, %v4477_v6  ;;  %v4885_v33 = vsub.s32 3, %v4477_v6 }
 0x140   : > { %1975 = vmax.xlane.f32.xlu1 %v1974_v5  ;;  %v1901_v57 = vcombine.low %v1893_v55, %v1900_v38  ;;  %v1934_v35 = vcombine.low %v1925_v59, %v1932_v8  ;;  %5789 = vst [vmem:[#allocation53_spill] sm:$0xff] %v4879_v32  ;;  %v4888_v49 = vsub.s32 4, %v4477_v6  ;;  %v4891_v48 = vsub.s32 5, %v4477_v6 }
 0x141   : > { %v1941_v22 = vrot.slane %v1933_v62, %v4487_v13  ;;  %5790 = vst [vmem:[#allocation54_spill] sm:$0xff] %v4882_v50  ;;  %5791 = vst [vmem:[#allocation55_spill] sm:$0xff] %v4885_v33  ;;  %v4919_v23 = vcombine.high %v4647_v11, %v4647_v11 }
 0x142   : > { %v1977_v31 = vsel %vm1958_vm1, %v1901_v57, -inf  ;;  %v1948_v39 = vrot.slane %v1934_v35, %v4487_v13  ;;  %v4915_v13 = vcombine.high %v4631_v58, %v4631_v58 }
 0x143   : > { %1978 = vmax.xlane.f32.xlu0 %v1977_v31  ;;  %5794 = vst [vmem:[#allocation58_spill] sm:$0xff] %v4919_v23 }
 0x144   : > { %v1949_v10 = vcombine.low %v1941_v22, %v1948_v39  ;;  %5793 = vst [vmem:[#allocation57_spill] sm:$0xff] %v4915_v13 }
 0x146   : > { %v1980_v40 = vsel %vm1958_vm1, %v1949_v10, -inf }
 0x147   : > { %1981 = vmax.xlane.f32.xlu1 %v1980_v40 }
 0x1b5   : > { %v4893_v16 = vpop.xlane.xlu1 %1969 }
 0x1b6   : > { %5792 = vst [vmem:[#allocation56_spill] sm:$0xff] %v4893_v16  ;;  %v2078_v8 = vrot.slane %v4893_v16, %v4491_v15  ;;  %v2082_v55 = vrot.slane %v4893_v16, %v4879_v32  ;;  %v2086_v38 = vrot.slane %v4893_v16, %v4882_v50  ;;  %v2090_v28 = vrot.slane %v4893_v16, %v4885_v33 }
 0x1b7   : > { %v2094_v59 = vrot.slane %v4893_v16, %v4888_v49  ;;  %v2098_v5 = vrot.slane %v4893_v16, %v4891_v48 }
 0x1b8   : > { %v2292_v57 = vsub.f32 %v4610_v44, %v2078_v8  ;;  %v2293_v62 = vsub.f32 %v4625_v54, %v2082_v55  ;;  %v2294_v35 = vsub.f32 %v4639_v61, %v2086_v38  ;;  %v2295_v31 = vsub.f32 %v4614_v47, %v2090_v28 }
 0x1b9   : > { %v2296_v22 = vsub.f32 %v4621_v53, %v2094_v59  ;;  %v2297_v39 = vsub.f32 %v4635_v60, %v2098_v5  ;;  %v4941_v47 = vcombine.high %v4618_v52, %v4618_v52 }
 0x1ba   : > { %v2369_v10 = vmul.f32 1.442695, %v2292_v57  ;;  %v2371_v40 = vmul.f32 1.442695, %v2293_v62  ;;  %v2373_v8 = vmul.f32 1.442695, %v2294_v35 }
 0x1bb   : > { %v4921_v55 = vpop.xlane.xlu0 %1960  ;;  %v2375_v38 = vmul.f32 1.442695, %v2295_v31  ;;  %v2377_v61 = vmul.f32 1.442695, %v2296_v22  ;;  %v2379_v35 = vmul.f32 1.442695, %v2297_v39 }
 0x1bc   : > { %5795 = vst [vmem:[#allocation59_spill] sm:$0xff] %v4921_v55  ;;  %v1994_v28 = vrot.slane %v4921_v55, %v4491_v15  ;;  %v1998_v59 = vrot.slane %v4921_v55, %v4879_v32  ;;  %4241 = vpow2.f32 %v2369_v10  ;;  %v2002_v5 = vrot.slane %v4921_v55, %v4882_v50  ;;  %5796 = vst [vmem:[#allocation60_spill] sm:$0xff] %v4941_v47 }
 0x1bd   : > { %v2006_v57 = vrot.slane %v4921_v55, %v4885_v33  ;;  %v2010_v62 = vrot.slane %v4921_v55, %v4888_v49  ;;  %4243 = vpow2.f32 %v2371_v40  ;;  %v2014_v31 = vrot.slane %v4921_v55, %v4891_v48 }
 0x1be   : > { %v2271_v22 = vsub.f32 %v4631_v58, %v1994_v28  ;;  %4245 = vpow2.f32 %v2373_v8  ;;  %v2272_v60 = vsub.f32 %v4647_v11, %v1998_v59  ;;  %v2273_v10 = vsub.f32 %v4915_v13, %v2002_v5 }
 0x1bf   : > { %v2274_v53 = vsub.f32 %v4919_v23, %v2006_v57  ;;  %v4945_v40 = vcombine.high %v4674_v20, %v4674_v20  ;;  %4247 = vpow2.f32 %v2375_v38  ;;  %v2275_v39 = vsub.f32 %v4642_v0, %v2010_v62 }
 0x1c0   : > { %v4948_v54 = vpop.xlane.xlu1 %1966  ;;  %4249 = vpow2.f32 %v2377_v61  ;;  %v2276_v8 = vsub.f32 %v4650_v12, %v2014_v31  ;;  %v2327_v28 = vmul.f32 1.442695, %v2271_v22  ;;  %v2329_v59 = vmul.f32 1.442695, %v2272_v60 }
 0x1c1   : > { %5797 = vst [vmem:[#allocation61_spill] sm:$0xff] %v4945_v40  ;;  %v4953_v5 = vcombine.high %v4705_v63, %v4705_v63  ;;  %4251 = vpow2.f32 %v2379_v35  ;;  %v2331_v57 = vmul.f32 1.442695, %v2273_v10  ;;  %v2050_v44 = vrot.slane %v4948_v54, %v4491_v15 }
 0x1c2   : > { %v2333_v23 = vmul.f32 1.442695, %v2274_v53  ;;  %v2335_v38 = vmul.f32 1.442695, %v2275_v39  ;;  %v2054_v62 = vrot.slane %v4948_v54, %v4879_v32  ;;  %v2058_v61 = vrot.slane %v4948_v54, %v4882_v50 }
 0x1c3   : > { %5798 = vst [vmem:[#allocation62_spill] sm:$0xff] %v4953_v5  ;;  %4253 = vpow2.f32 %v2327_v28  ;;  %v2062_v60 = vrot.slane %v4948_v54, %v4885_v33  ;;  %v2066_v31 = vrot.slane %v4948_v54, %v4888_v49  ;;  %v2070_v35 = vrot.slane %v4948_v54, %v4891_v48  ;;  %v4975_v0 = vpop.xlane.xlu0 %1963 }
 0x1c4   : > { %4255 = vpow2.f32 %v2329_v59  ;;  %v2337_v22 = vmul.f32 1.442695, %v2276_v8  ;;  %v2285_v53 = vsub.f32 %v4945_v40, %v2050_v44  ;;  %v2286_v10 = vsub.f32 %v4953_v5, %v2054_v62  ;;  %5800 = vst [vmem:[#allocation64_spill] sm:$0xff] %v4975_v0 }
 0x1c5   : > { %v4971_v39 = vcombine.high %v4628_v56, %v4628_v56  ;;  %4257 = vpow2.f32 %v2331_v57  ;;  %v2287_v28 = vsub.f32 %v4618_v52, %v2058_v61  ;;  %v2288_v12 = vsub.f32 %v4628_v56, %v2062_v60 }
 0x1c6   : > { %4259 = vpow2.f32 %v2333_v23  ;;  %v2289_v13 = vsub.f32 %v4941_v47, %v2066_v31  ;;  %v2355_v59 = vmul.f32 1.442695, %v2285_v53  ;;  %v2357_v8 = vmul.f32 1.442695, %v2286_v10 }
 0x1c7   : > { %5799 = vst [vmem:[#allocation63_spill] sm:$0xff] %v4971_v39  ;;  %4261 = vpow2.f32 %v2335_v38  ;;  %v2290_v44 = vsub.f32 %v4971_v39, %v2070_v35  ;;  %v2359_v62 = vmul.f32 1.442695, %v2287_v28  ;;  %v2361_v5 = vmul.f32 1.442695, %v2288_v12 }
 0x1c8   : > { %4263 = vpow2.f32 %v2337_v22  ;;  %v2022_v57 = vrot.slane %v4975_v0, %v4491_v15  ;;  %v2026_v61 = vrot.slane %v4975_v0, %v4879_v32  ;;  %v2030_v23 = vrot.slane %v4975_v0, %v4882_v50 }
 0x1c9   : > { %v4979_v40 = vpop.eup %4241  ;;  %4265 = vpow2.f32 %v2355_v59  ;;  %v2363_v38 = vmul.f32 1.442695, %v2289_v13  ;;  %v2034_v31 = vrot.slane %v4975_v0, %v4885_v33  ;;  %v2038_v12 = vrot.slane %v4975_v0, %v4888_v49  ;;  %v4999_v59 = vpop.xlane.xlu0 %1972 }
 0x1ca   : > { %v4987_v60 = vpop.eup %4243  ;;  %v2042_v35 = vrot.slane %v4975_v0, %v4891_v48  ;;  %4267 = vpow2.f32 %v2357_v8  ;;  %v2365_v53 = vmul.f32 1.442695, %v2290_v44  ;;  %v2278_v10 = vsub.f32 %v4793_v3, %v2022_v57  ;;  %5801 = vst [vmem:[#allocation65_spill] sm:$0xff] %v4999_v59  ;;  %v5043_v3 = vpop.xlane.xlu1 %1975 }
 0x1cb   : > { %v4995_v22 = vpop.eup %4245  ;;  %v2279_v28 = vsub.f32 %v4656_v17, %v2026_v61  ;;  %v5004_v39 = vsub.s32 6, %v4477_v6  ;;  %4269 = vpow2.f32 %v2359_v62  ;;  %v2280_v47 = vsub.f32 %v4677_v30, %v2030_v23  ;;  %5804 = vst [vmem:[#allocation68_spill] sm:$0xff] %v5043_v3 }
 0x1cc   : > { %v5001_v13 = vpop.eup %4247  ;;  %v2281_v56 = vsub.f32 %v4687_v37, %v2034_v31  ;;  %4271 = vpow2.f32 %v2361_v5  ;;  %v2282_v44 = vsub.f32 %v4709_v1, %v2038_v12  ;;  %v2283_v8 = vsub.f32 %v4674_v20, %v2042_v35 }
 0x1cd   : > { %v5008_v52 = vpop.eup %4249  ;;  %v2341_v57 = vmul.f32 1.442695, %v2278_v10  ;;  %v5016_v17 = vcombine.high %v4653_v14, %v4653_v14  ;;  %4273 = vpow2.f32 %v2363_v38  ;;  %v2343_v62 = vmul.f32 1.442695, %v2279_v28 }
 0x1ce   : > { %v5012_v61 = vpop.eup %4251  ;;  %v2106_v23 = vrot.slane %v4999_v59, %v4491_v15  ;;  %v5022_v31 = vcombine.high %v4671_v27, %v4671_v27  ;;  %4275 = vpow2.f32 %v2365_v53  ;;  %v2345_v5 = vmul.f32 1.442695, %v2280_v47 }
 0x1cf   : > { %5802 = vst [vmem:[#allocation66_spill] sm:$0xff] %v5016_v17  ;;  %v2347_v12 = vmul.f32 1.442695, %v2281_v56  ;;  %4277 = vpow2.f32 %v2341_v57  ;;  %v2110_v10 = vrot.slane %v4999_v59, %v4879_v32  ;;  %v2114_v38 = vrot.slane %v4999_v59, %v4882_v50 }
 0x1d0   : > { %5803 = vst [vmem:[#allocation67_spill] sm:$0xff] %v5022_v31  ;;  %v5024_v35 = vpop.eup %4253  ;;  %v2118_v28 = vrot.slane %v4999_v59, %v4885_v33  ;;  %v2349_v20 = vmul.f32 1.442695, %v2282_v44  ;;  %v2351_v1 = vmul.f32 1.442695, %v2283_v8  ;;  %v2122_v47 = vrot.slane %v4999_v59, %v4888_v49 }
 0x1d1   : > { %v5032_v6 = vpop.eup %4255  ;;  %v2126_v56 = vrot.slane %v4999_v59, %v4891_v48  ;;  %4279 = vpow2.f32 %v2343_v62  ;;  %v2299_v57 = vsub.f32 %v4653_v14, %v2106_v23  ;;  %v2300_v37 = vsub.f32 %v4671_v27, %v2110_v10 }
 0x1d2   : > { %v5038_v53 = vpop.eup %4257  ;;  %v2301_v30 = vsub.f32 %v5016_v17, %v2114_v38  ;;  %v5049_v44 = vcombine.high %v4767_v24, %v4767_v24  ;;  %4281 = vpow2.f32 %v2345_v5  ;;  %v2302_v8 = vsub.f32 %v5022_v31, %v2118_v28 }
 0x1d3   : > { %v5045_v11 = vpop.eup %4259  ;;  %v2303_v58 = vsub.f32 %v4702_v51, %v2122_v47  ;;  %v2102_v23 = vrot.slane %v4893_v16, %v5004_v39  ;;  %4283 = vpow2.f32 %v2347_v12  ;;  %v2304_v10 = vsub.f32 %v4722_v19, %v2126_v56 }
 0x1d4   : > { %5805 = vst [vmem:[#allocation69_spill] sm:$0xff] %v5049_v44  ;;  %v5053_v62 = vpop.eup %4261  ;;  %v2383_v38 = vmul.f32 1.442695, %v2299_v57  ;;  %v2018_v27 = vrot.slane %v4921_v55, %v5004_v39  ;;  %4285 = vpow2.f32 %v2349_v20  ;;  %v2385_v5 = vmul.f32 1.442695, %v2300_v37 }
 0x1d5   : > { %v5058_v17 = vpop.eup %4263  ;;  %v2134_v28 = vrot.slane %v5043_v3, %v4491_v15  ;;  %4287 = vpow2.f32 %v2351_v1  ;;  %v2387_v51 = vmul.f32 1.442695, %v2301_v30  ;;  %v2389_v31 = vmul.f32 1.442695, %v2302_v8 }
 0x1d6   : > { %v5064_v47 = vpop.eup %4265  ;;  %v2138_v12 = vrot.slane %v5043_v3, %v4879_v32  ;;  %v2391_v56 = vmul.f32 1.442695, %v2303_v58  ;;  %v2142_v57 = vrot.slane %v5043_v3, %v4882_v50  ;;  %v2146_v19 = vrot.slane %v5043_v3, %v4885_v33 }
 0x1d7   : > { %5806 = vst [vmem:[#allocation70_spill] sm:$0xff] %v5064_v47  ;;  %v2150_v20 = vrot.slane %v5043_v3, %v4888_v49  ;;  %v5074_v37 = vpop.eup %4267  ;;  %4289 = vpow2.f32 %v2383_v38  ;;  %v2393_v1 = vmul.f32 1.442695, %v2304_v10  ;;  %v2154_v30 = vrot.slane %v5043_v3, %v4891_v48  ;;  %v5084_v47 = vpop.xlane.xlu0 %1978 }
 0x1d8   : > { %5807 = vst [vmem:[#allocation71_spill] sm:$0xff] %v5074_v37  ;;  %v2306_v8 = vsub.f32 %v4759_v45, %v2134_v28  ;;  %v5079_v58 = vpop.eup %4269  ;;  %4291 = vpow2.f32 %v2385_v5  ;;  %v2307_v14 = vsub.f32 %v4719_v9, %v2138_v12  ;;  %v2308_v16 = vsub.f32 %v4745_v36, %v2142_v57 }
 0x1d9   : > { %v2309_v55 = vsub.f32 %v4755_v43, %v2146_v19  ;;  %v5086_v37 = vpop.eup %4271  ;;  %v5090_v10 = vcombine.high %v4773_v21, %v4773_v21  ;;  %v2298_v38 = vsub.f32 %v4660_v18, %v2102_v23  ;;  %4293 = vpow2.f32 %v2387_v51 }
 0x1da   : > { %v2310_v28 = vsub.f32 %v4823_v34, %v2150_v20  ;;  %v5094_v5 = vpop.eup %4273  ;;  %4295 = vpow2.f32 %v2389_v31  ;;  %v2311_v19 = vsub.f32 %v4767_v24, %v2154_v30  ;;  %v2397_v12 = vmul.f32 1.442695, %v2306_v8 }
 0x1db   : > { %5808 = vst [vmem:[#allocation72_spill] sm:$0xff] %v5090_v10  ;;  %5809 = vst [vmem:[#allocation73_spill] sm:$0xff] %v5094_v5  ;;  %v2399_v57 = vmul.f32 1.442695, %v2307_v14  ;;  %v5101_v43 = vpop.eup %4275  ;;  %v2277_v36 = vsub.f32 %v4736_v29, %v2018_v27  ;;  %4297 = vpow2.f32 %v2391_v56  ;;  %v2401_v23 = vmul.f32 1.442695, %v2308_v16 }
 0x1dc   : > { %5810 = vst [vmem:[#allocation74_spill] sm:$0xff] %v5101_v43  ;;  %v2162_v51 = vrot.slane %v5084_v47, %v4491_v15  ;;  %v5106_v20 = vpop.eup %4277  ;;  %4299 = vpow2.f32 %v2393_v1  ;;  %v2403_v34 = vmul.f32 1.442695, %v2309_v55  ;;  %v2166_v31 = vrot.slane %v5084_v47, %v4879_v32  ;;  %v3794_v56 = vld [vmem:[%s428_s12] sm:$0xf] }
 0x1dd   : > { %v2170_v30 = vrot.slane %v5084_v47, %v4882_v50  ;;  %v2046_v14 = vrot.slane %v4975_v0, %v5004_v39  ;;  %v2130_v27 = vrot.slane %v4999_v59, %v5004_v39  ;;  %4301 = vpow2.f32 %v2397_v12 }
 0x1de   : > { %v2405_v16 = vmul.f32 1.442695, %v2310_v28  ;;  %v5116_v8 = vpop.eup %4279  ;;  %4303 = vpow2.f32 %v2399_v57  ;;  %v2407_v1 = vmul.f32 1.442695, %v2311_v19  ;;  %v2313_v55 = vsub.f32 %v5049_v44, %v2162_v51  ;;  %v5133_v57 = vpop.xlane.xlu1 %1981 }
 0x1df   : > { %v2314_v24 = vsub.f32 %v5090_v10, %v2166_v31  ;;  %v5120_v9 = vpop.eup %4281  ;;  %v5124_v45 = vcombine.high %v4770_v2, %v4770_v2  ;;  %v5128_v0 = vcombine.high %v4781_v41, %v4781_v41  ;;  %4305 = vpow2.f32 %v2401_v23  ;;  %5811 = vst [vmem:[#allocation75_spill] sm:$0xff] %v5133_v57  ;;  %v5812_v31 = vld [vmem:[#allocation5_spill] sm:$0xff] }
 0x1e0   : > { %v2315_v28 = vsub.f32 %v4770_v2, %v2170_v30  ;;  %v5131_v12 = vpop.eup %4283  ;;  %4307 = vpow2.f32 %v2403_v34  ;;  %v2411_v19 = vmul.f32 1.442695, %v2313_v55  ;;  %v5135_v51 = vunpack.c.l.bf16 %v3794_v56  ;;  %v5813_v2 = vld [vmem:[#allocation44_spill] sm:$0xff] }
 0x1e1   : > { %v5138_v44 = vpop.eup %4285  ;;  %v5140_v18 = vmul.f32 1.442695, %v2298_v38  ;;  %v2339_v59 = vmul.f32 1.442695, %v2277_v36  ;;  %4309 = vpow2.f32 %v2405_v16  ;;  %v2413_v29 = vmul.f32 1.442695, %v2314_v24 }
 0x1e2   : > { %v5142_v23 = vpop.eup %4287  ;;  %v2284_v30 = vsub.f32 %v4705_v63, %v2046_v14  ;;  %v2305_v34 = vsub.f32 %v5813_v2, %v2130_v27  ;;  %v2158_v55 = vrot.slane %v5043_v3, %v5004_v39  ;;  %4311 = vpow2.f32 %v2407_v1 }
 0x1e3   : > { %v2415_v56 = vmul.f32 1.442695, %v2315_v28  ;;  %v2190_v10 = vrot.slane %v5133_v57, %v4491_v15  ;;  %v2194_v38 = vrot.slane %v5133_v57, %v4879_v32  ;;  %v2198_v36 = vrot.slane %v5133_v57, %v4882_v50 }
 0x1e4   : > { %v5154_v24 = vpop.eup %4289  ;;  %4313 = vpow2.f32 %v2411_v19  ;;  %v2202_v14 = vrot.slane %v5133_v57, %v4885_v33  ;;  %v2206_v27 = vrot.slane %v5133_v57, %v4888_v49  ;;  %v2210_v16 = vrot.slane %v5133_v57, %v4891_v48 }
 0x1e5   : > { %v5162_v1 = vpop.eup %4291  ;;  %v2174_v28 = vrot.slane %v5084_v47, %v4885_v33  ;;  %4315 = vpow2.f32 %v2413_v29  ;;  %v2320_v63 = vsub.f32 %v4697_v46, %v2190_v10  ;;  %v2321_v2 = vsub.f32 %v4716_v7, %v2194_v38 }
 0x1e6   : > { %v5168_v19 = vpop.eup %4293  ;;  %v2214_v3 = vrot.slane %v5133_v57, %v5004_v39  ;;  %v2322_v50 = vsub.f32 %v4731_v26, %v2198_v36  ;;  %v2323_v32 = vsub.f32 %v4691_v42, %v2202_v14  ;;  %v2324_v15 = vsub.f32 %v4712_v4, %v2206_v27  ;;  %v5814_v27 = vld [vmem:[#allocation52_spill] sm:$0xff] }
 0x1e7   : > { %v5175_v5 = vpop.eup %4295  ;;  %v2312_v33 = vsub.f32 %v4773_v21, %v2158_v55  ;;  %4317 = vpow2.f32 %v2415_v56  ;;  %v2325_v29 = vsub.f32 %v4727_v25, %v2210_v16  ;;  %v2425_v10 = vmul.f32 1.442695, %v2320_v63 }
 0x1e8   : > { %v5179_v38 = vpop.eup %4297  ;;  %v2427_v7 = vmul.f32 1.442695, %v2321_v2  ;;  %v2429_v46 = vmul.f32 1.442695, %v2322_v50  ;;  %v2431_v43 = vmul.f32 1.442695, %v2323_v32  ;;  %4319 = vpow2.f32 %v2339_v59 }
 0x1e9   : > { %v5181_v57 = vpop.eup %4299  ;;  %v2178_v36 = vrot.slane %v5084_v47, %v4888_v49  ;;  %v2182_v14 = vrot.slane %v5084_v47, %v4891_v48  ;;  %4321 = vpow2.f32 %v2425_v10  ;;  %v2433_v55 = vmul.f32 1.442695, %v2324_v15 }
 0x1ea   : > { %v5187_v56 = vpop.eup %4301  ;;  %v2316_v63 = vsub.f32 %v4781_v41, %v2174_v28  ;;  %v2326_v16 = vsub.f32 %v5814_v27, %v2214_v3  ;;  %4323 = vpow2.f32 %v2427_v7  ;;  %v2435_v2 = vmul.f32 1.442695, %v2325_v29 }
 0x1eb   : > { %v5191_v32 = vpop.eup %4303  ;;  %v2074_v50 = vrot.slane %v4948_v54, %v5004_v39  ;;  %v2353_v59 = vmul.f32 1.442695, %v2284_v30  ;;  %4325 = vpow2.f32 %v2429_v46  ;;  %v2495_v25 = vcombine.low %v5024_v35, %v5032_v6 }
 0x1ec   : > { %v5197_v10 = vpop.eup %4305  ;;  %v2395_v15 = vmul.f32 1.442695, %v2305_v34  ;;  %v2409_v4 = vmul.f32 1.442695, %v2312_v33  ;;  %4327 = vpow2.f32 %v2431_v43  ;;  %v2496_v3 = vcombine.low %v5038_v53, %v5045_v11  ;;  %v5815_v11 = vld [vmem:[#allocation3_spill] sm:$0xff] }
 0x1ed   : > { %v5201_v7 = vpop.eup %4307  ;;  %v2186_v28 = vrot.slane %v5084_v47, %v5004_v39  ;;  %v2317_v29 = vsub.f32 %v5124_v45, %v2178_v36  ;;  %v2318_v46 = vsub.f32 %v5128_v0, %v2182_v14  ;;  %4329 = vpow2.f32 %v2433_v55 }
 0x1ee   : > { %v5207_v30 = vpop.eup %4309  ;;  %v2417_v6 = vmul.f32 1.442695, %v2316_v63  ;;  %4331 = vpow2.f32 %v2435_v2  ;;  %v2437_v35 = vmul.f32 1.442695, %v2326_v16  ;;  %v2497_v43 = vcombine.low %v5053_v62, %v5058_v17 }
 0x1ef   : > { %v5211_v33 = vpop.eup %4311  ;;  %v2504_v53 = vrot.slane %v2495_v25, %v5815_v11  ;;  %4333 = vpow2.f32 %v5140_v18  ;;  %v2639_v34 = vcombine.low %v4979_v40, %v4987_v60  ;;  %v2640_v36 = vcombine.low %v4995_v22, %v5001_v13  ;;  %v5816_v25 = vld [vmem:[#allocation13_spill] sm:$0xff]  ;;  %v5817_v40 = vld [vmem:[#allocation32_spill] sm:$0xff] }
 0x1f0   : > { %v2511_v14 = vrot.slane %v2496_v3, %v5815_v11  ;;  %4335 = vpow2.f32 %v2353_v59  ;;  %v2543_v55 = vcombine.low %v5106_v20, %v5116_v8  ;;  %v2544_v17 = vcombine.low %v5120_v9, %v5131_v12 }
 0x1f1   : > { %v5224_v62 = vpop.eup %4313  ;;  %v2291_v63 = vsub.f32 %v5816_v25, %v2074_v50  ;;  %v2419_v18 = vmul.f32 1.442695, %v2317_v29  ;;  %4337 = vpow2.f32 %v2395_v15  ;;  %v2319_v60 = vsub.f32 %v5817_v40, %v2186_v28 }
 0x1f2   : > { %v5227_v16 = vpop.eup %4315  ;;  %v2421_v22 = vmul.f32 1.442695, %v2318_v46  ;;  %4339 = vpow2.f32 %v2409_v4  ;;  %v5818_v13 = vunpack.c.l.bf16 %v5812_v31  ;;  %v2518_v9 = vrot.slane %v2497_v43, %v5815_v11 }
 0x1f3   : > { %4341 = vpow2.f32 %v2417_v6  ;;  %v2648_v20 = vrot.slane %v2639_v34, %v5815_v11  ;;  %v2655_v8 = vrot.slane %v2640_v36, %v5815_v11  ;;  %v2526_v50 = vcombine.low %v2504_v53, %v2511_v14 }
 0x1f4   : > { %v5233_v2 = vmul.f32 %v5818_v13, %v5135_v51  ;;  %v5238_v12 = vpop.eup %4317  ;;  %v2552_v59 = vrot.slane %v2543_v55, %v5815_v11  ;;  %v2559_v15 = vrot.slane %v2544_v17, %v5815_v11  ;;  %4343 = vpow2.f32 %v2437_v35 }
 0x1f5   : > { %v4320_v4 = vpop.eup %4319  ;;  %v2367_v3 = vmul.f32 1.442695, %v2291_v63  ;;  %4345 = vpow2.f32 %v2419_v18  ;;  %v2687_v31 = vcombine.low %v5154_v24, %v5162_v1  ;;  %v2688_v28 = vcombine.low %v5168_v19, %v5175_v5 }
 0x1f6   : > { %v4322_v29 = vpop.eup %4321  ;;  %4347 = vpow2.f32 %v2421_v22  ;;  %v2423_v46 = vmul.f32 1.442695, %v2319_v60  ;;  %v2525_v6 = vrot.slane %v4320_v4, %v5815_v11  ;;  %v2641_v43 = vcombine.low %v5008_v52, %v5012_v61 }
 0x1f7   : > { %v4324_v53 = vpop.eup %4323  ;;  %v2670_v34 = vcombine.low %v2648_v20, %v2655_v8  ;;  %v2545_v35 = vcombine.low %v5138_v44, %v5142_v23  ;;  %v2735_v36 = vcombine.low %v5187_v56, %v5191_v32  ;;  %v2736_v24 = vcombine.low %v5197_v10, %v5201_v7 }
 0x1f8   : > { %v4326_v5 = vpop.eup %4325  ;;  %v2527_v1 = vcombine.low %v2518_v9, %v2525_v6  ;;  %v2534_v19 = vrot.slane %v2526_v50, %v5815_v11  ;;  %v2574_v14 = vcombine.low %v2552_v59, %v2559_v15  ;;  %v2689_v55 = vcombine.low %v5179_v38, %v5181_v57 }
 0x1f9   : > { %v4328_v52 = vpop.eup %4327  ;;  %v2696_v61 = vrot.slane %v2687_v31, %v5815_v11  ;;  %v2703_v17 = vrot.slane %v2688_v28, %v5815_v11  ;;  %v2737_v44 = vcombine.low %v5207_v30, %v5211_v33  ;;  %4349 = vpow2.f32 %v2367_v3 }
 0x1fa   : > { %v4330_v23 = vpop.eup %4329  ;;  %v2541_v56 = vrot.slane %v2527_v1, %v5815_v11  ;;  %v2662_v32 = vrot.slane %v2641_v43, %v5815_v11  ;;  %v2831_v10 = vcombine.low %v4322_v29, %v4324_v53  ;;  %v2832_v7 = vcombine.low %v4326_v5, %v4328_v52 }
 0x1fb   : > { %v4332_v63 = vpop.eup %4331  ;;  %v2678_v18 = vrot.slane %v2670_v34, %v5815_v11  ;;  %v2566_v57 = vrot.slane %v2545_v35, %v5815_v11  ;;  %v2744_v38 = vrot.slane %v2735_v36, %v5815_v11  ;;  %v2751_v60 = vrot.slane %v2736_v24, %v5815_v11  ;;  %v5819_v34 = vld [vmem:[#allocation71_spill] sm:$0xff]  ;;  %v5820_v35 = vld [vmem:[#allocation70_spill] sm:$0xff] }
 0x1fc   : > { %v4334_v22 = vpop.eup %4333  ;;  %v2542_v13 = vcombine.low %v2534_v19, %v2541_v56  ;;  %v2582_v30 = vrot.slane %v2574_v14, %v5815_v11  ;;  %v2710_v33 = vrot.slane %v2689_v55, %v5815_v11  ;;  %v2833_v9 = vcombine.low %v4330_v23, %v4332_v63 }
 0x1fd   : > { %v4336_v20 = vpop.eup %4335  ;;  %v2669_v8 = vrot.slane %v4334_v22, %v5815_v11  ;;  %v2718_v50 = vcombine.low %v2696_v61, %v2703_v17  ;;  %v2758_v59 = vrot.slane %v2737_v44, %v5815_v11  ;;  %4351 = vpow2.f32 %v2423_v46  ;;  %v5821_v17 = vld [vmem:[#allocation74_spill] sm:$0xff]  ;;  %v5822_v44 = vld [vmem:[#allocation73_spill] sm:$0xff] }
 0x1fe   : > { %v4338_v15 = vpop.eup %4337  ;;  %v2887_v4 = vsel %vm1958_vm1, %v2542_v13, 0.0  ;;  %v2573_v3 = vrot.slane %v4336_v20, %v5815_v11  ;;  %v2840_v31 = vrot.slane %v2831_v10, %v5815_v11  ;;  %v2847_v28 = vrot.slane %v2832_v7, %v5815_v11 }
 0x1ff   : > { %v4340_v29 = vpop.eup %4339  ;;  %2888 = vadd.xlane.f32.xlu0 %v2887_v4  ;;  %v2671_v6 = vcombine.low %v2662_v32, %v2669_v8  ;;  %v2717_v43 = vrot.slane %v4338_v15, %v5815_v11  ;;  %v2766_v53 = vcombine.low %v2744_v38, %v2751_v60  ;;  %v2591_v36 = vcombine.low %v5820_v35, %v5819_v34  ;;  %v5823_v60 = vld [vmem:[#allocation8_spill] sm:$0xff]  ;;  %v5824_v35 = vld [vmem:[#allocation6_spill] sm:$0xff] }
 0x200   : > { %v4342_v46 = vpop.eup %4341  ;;  %v2575_v24 = vcombine.low %v2566_v57, %v2573_v3  ;;  %v2765_v5 = vrot.slane %v4340_v29, %v5815_v11  ;;  %v2854_v1 = vrot.slane %v2833_v9, %v5815_v11  ;;  %v2592_v19 = vcombine.low %v5079_v58, %v5086_v37 }
 0x201   : > { %v4344_v14 = vpop.eup %4343  ;;  %v2685_v55 = vrot.slane %v2671_v6, %v5815_v11  ;;  %v2719_v52 = vcombine.low %v2710_v33, %v2717_v43  ;;  %v2726_v61 = vrot.slane %v2718_v50, %v5815_v11  ;;  %v2593_v23 = vcombine.low %v5822_v44, %v5821_v17 }
 0x202   : > { %v4346_v56 = vpop.eup %4345  ;;  %v2589_v32 = vrot.slane %v2575_v24, %v5815_v11  ;;  %v2767_v10 = vcombine.low %v2758_v59, %v2765_v5  ;;  %v2861_v7 = vrot.slane %v4344_v14, %v5815_v11  ;;  %v2862_v63 = vcombine.low %v2840_v31, %v2847_v28 }
 0x203   : > { %v4348_v57 = vpop.eup %4347  ;;  %v2686_v38 = vcombine.low %v2678_v18, %v2685_v55  ;;  %v2733_v37 = vrot.slane %v2719_v52, %v5815_v11  ;;  %v2774_v58 = vrot.slane %v2766_v53, %v5815_v11  ;;  %v3798_v22 = vunpack.c.l.bf16 %v5823_v60 }
 0x204   : > { %v2590_v13 = vcombine.low %v2582_v30, %v2589_v32  ;;  %v2781_v33 = vrot.slane %v2767_v10, %v5815_v11  ;;  %v2863_v9 = vcombine.low %v2854_v1, %v2861_v7  ;;  %v2600_v20 = vrot.slane %v2591_v36, %v5815_v11 }
 0x205   : > { %v2896_v8 = vsel %vm1958_vm1, %v2686_v38, 0.0  ;;  %v2734_v50 = vcombine.low %v2726_v61, %v2733_v37  ;;  %v2607_v59 = vrot.slane %v2592_v19, %v5815_v11  ;;  %v2614_v15 = vrot.slane %v2593_v23, %v5815_v11 }
 0x206   : > { %v4350_v18 = vpop.eup %4349  ;;  %2897 = vadd.xlane.f32.xlu1 %v2896_v8  ;;  %v2870_v4 = vrot.slane %v2862_v63, %v5815_v11  ;;  %v2783_v3 = vcombine.low %v5224_v62, %v5227_v16  ;;  %v2784_v30 = vcombine.low %v5238_v12, %v4342_v46  ;;  %v2785_v31 = vcombine.low %v4346_v56, %v4348_v57  ;;  %v5825_v46 = vld [vmem:[#allocation7_spill] sm:$0xff]  ;;  %v5826_v56 = vld [vmem:[#allocation9_spill] sm:$0xff] }
 0x207   : > { %v2890_v28 = vsel %vm1958_vm1, %v2590_v13, 0.0  ;;  %v2899_v29 = vsel %vm1958_vm1, %v2734_v50, 0.0  ;;  %v2782_v6 = vcombine.low %v2774_v58, %v2781_v33  ;;  %v2877_v43 = vrot.slane %v2863_v9, %v5815_v11  ;;  %v5827_v33 = vld [vmem:[#allocation10_spill] sm:$0xff] }
 0x208   : > { %2900 = vadd.xlane.f32.xlu0 %v2899_v29  ;;  %v3813_v53 = vsel %vm3812_vm2, %v5233_v2, 0.0  ;;  %v3806_v34 = vmul.f32 %v3798_v22, %v5135_v51  ;;  %v3800_v36 = vunpack.c.l.bf16 %v5824_v35  ;;  %v2621_v62 = vrot.slane %v4350_v18, %v5815_v11 }
 0x209   : > { %v2622_v12 = vcombine.low %v2600_v20, %v2607_v59  ;;  %v3797_v24 = vunpack.c.l.bf16 %v5825_v46  ;;  %v2792_v5 = vrot.slane %v2783_v3, %v5815_v11  ;;  %v2799_v1 = vrot.slane %v2784_v30, %v5815_v11  ;;  %v5828_v20 = vld [vmem:[#allocation11_spill] sm:$0xff] }
 0x20a   : > { %v4352_v16 = vpop.eup %4351  ;;  %2891 = vadd.xlane.f32.xlu1 %v2890_v28  ;;  %v2902_v19 = vsel %vm1958_vm1, %v2782_v6, 0.0  ;;  %v2878_v14 = vcombine.low %v2870_v4, %v2877_v43  ;;  %v2623_v55 = vcombine.low %v2614_v15, %v2621_v62  ;;  %v2806_v2 = vrot.slane %v2785_v31, %v5815_v11  ;;  %v5829_v4 = vld [vmem:[#allocation12_spill] sm:$0xff] }
 0x20b   : > { %v3819_v52 = vsel %vm3812_vm2, %v3806_v34, 0.0  ;;  %v3808_v61 = vmul.f32 %v3800_v36, %v5135_v51  ;;  %v2813_v17 = vrot.slane %v4352_v16, %v5815_v11  ;;  %v2630_v44 = vrot.slane %v2622_v12, %v5815_v11 }
 0x20c   : > { %3814 = vadd.xlane.f32.xlu0 %v3813_v53  ;;  %v3805_v23 = vmul.f32 %v3797_v24, %v5135_v51  ;;  %v3799_v32 = vunpack.c.l.bf16 %v5826_v56  ;;  %v2908_v10 = vsel %vm1958_vm1, %v2878_v14, 0.0  ;;  %v2637_v7 = vrot.slane %v2623_v55, %v5815_v11  ;;  %v4158_v53 = vld [vmem:[%s434_s15] ss:$0 sm:$0xff]  ;;  %v5831_v55 = vld [vmem:[#allocation4_spill] sm:$0xff] }
 0x20d   : > { %v2814_v63 = vcombine.low %v2792_v5, %v2799_v1  ;;  %v2815_v57 = vcombine.low %v2806_v2, %v2813_v17  ;;  %v3825_v38 = vsel %vm3812_vm2, %v3808_v61, 0.0  ;;  %v3801_v9 = vunpack.c.l.bf16 %v5827_v33  ;;  %v5830_v5 = vld [vmem:[#allocation59_spill] sm:$0xff]  ;;  %v5833_v17 = vld [vmem:[#allocation54_spill] sm:$0xff] }
 0x20e   : > { %2903 = vadd.xlane.f32.xlu1 %v2902_v19  ;;  %v3816_v37 = vsel %vm3812_vm2, %v3805_v23, 0.0  ;;  %v3807_v58 = vmul.f32 %v3799_v32, %v5135_v51  ;;  %v2638_v60 = vcombine.low %v2630_v44, %v2637_v7  ;;  %v3802_v8 = vunpack.c.l.bf16 %v5828_v20  ;;  %v5834_v23 = vld [vmem:[#allocation55_spill] sm:$0xff]  ;;  %v5838_v33 = vld [vmem:[#allocation58_spill] sm:$0xff] }
 0x20f   : > { %v2822_v22 = vrot.slane %v2814_v63, %v5815_v11  ;;  %v2829_v13 = vrot.slane %v2815_v57, %v5815_v11  ;;  %v3809_v18 = vmul.f32 %v3801_v9, %v5135_v51  ;;  %v3803_v3 = vunpack.c.l.bf16 %v5829_v4 }
 0x210   : > { %3820 = vadd.xlane.f32.xlu0 %v3819_v52  ;;  %v3822_v50 = vsel %vm3812_vm2, %v3807_v58, 0.0  ;;  %v2893_v59 = vsel %vm1958_vm1, %v2638_v60, 0.0  ;;  %v3810_v30 = vmul.f32 %v3802_v8, %v5135_v51  ;;  %v4394_v34 = vmov 0   ;;  %v5832_v52 = vld [vmem:[#allocation53_spill] sm:$0xff]  ;;  %v5836_v58 = vld [vmem:[#allocation24_spill] sm:$0xff]  ;;  %v5839_v8 = vld [vmem:[#allocation23_spill] sm:$0xff] }
 0x211   : > { %v2830_v15 = vcombine.low %v2822_v22, %v2829_v13  ;;  %v3828_v28 = vsel %vm3812_vm2, %v3809_v18, 0.0  ;;  %v3811_v29 = vmul.f32 %v3803_v3, %v5135_v51  ;;  %4220 = vset.pattern.permute.xlu1 %v4394_v34  ;;  %4219 = vset.pattern.permute.xlu0 %v4394_v34  ;;  %v5837_v22 = vld [vmem:[#allocation57_spill] sm:$0xff]  ;;  %v5841_v18 = vld [vmem:[#allocation43_spill] sm:$0xff] }
 0x212   : > { %2909 = vadd.xlane.f32.xlu1 %v2908_v10  ;;  %v3831_v6 = vsel %vm3812_vm2, %v3810_v30, 0.0 }
 0x213   : > { %v2905_v31 = vsel %vm1958_vm1, %v2830_v15, 0.0  ;;  %v3834_v43 = vsel %vm3812_vm2, %v3811_v29, 0.0 }
 0x214   : > { %3826 = vadd.xlane.f32.xlu0 %v3825_v38  ;;  %v5835_v38 = vld [vmem:[#allocation20_spill] sm:$0xff] }
 0x216   : > { %3817 = vadd.xlane.f32.xlu1 %v3816_v37 }
 0x218   : > { %2894 = vadd.xlane.f32.xlu0 %v2893_v59  ;;  %v5840_v59 = vld [vmem:[#allocation25_spill] sm:$0xff] }
 0x21a   : > { %3823 = vadd.xlane.f32.xlu1 %v3822_v50 }
 0x21c   : > { %2906 = vadd.xlane.f32.xlu0 %v2905_v31 }
 0x21e   : > { %3829 = vadd.xlane.f32.xlu1 %v3828_v28  ;;  %v5842_v28 = vld [vmem:[#allocation56_spill] sm:$0xff] }
 0x220   : > { %3832 = vadd.xlane.f32.xlu0 %v3831_v6 }
 0x222   : > { %3835 = vadd.xlane.f32.xlu1 %v3834_v43 }
 0x236   : > { %3844 = vbcast.lane.b32.xlu0 %v4158_v53, 256 }
 0x288   : > { %v2889_v35 = vpop.xlane.xlu0 %2888 }
 0x289   : > { %4353 = vlog2.f32 %v2889_v35 }
 0x28f   : > { %v2898_v51 = vpop.xlane.xlu1 %2897 }
 0x290   : > { %4355 = vlog2.f32 %v2898_v51 }
 0x291   : > { %v2901_v36 = vpop.xlane.xlu0 %2900 }
 0x292   : > { %4357 = vlog2.f32 %v2901_v36 }
 0x293   : > { %v2892_v62 = vpop.xlane.xlu1 %2891 }
 0x294   : > { %4359 = vlog2.f32 %v2892_v62 }
 0x295   : > { %v5343_v16 = vpop.xlane.xlu0 %3814 }
 0x296   : > { %v4354_v12 = vpop.eup %4353 }
 0x297   : > { %v2912_v46 = vmul.f32 0.6931472, %v4354_v12  ;;  %v2904_v24 = vpop.xlane.xlu1 %2903 }
 0x298   : > { %4361 = vlog2.f32 %v2904_v24 }
 0x299   : > { %v5346_v1 = vadd.f32 %v2912_v46, %v5830_v5  ;;  %v5348_v19 = vpop.xlane.xlu0 %3820 }
 0x29b   : > { %v2910_v14 = vpop.xlane.xlu1 %2909  ;;  %v2946_v2 = vrot.slane %v5346_v1, %v5831_v55  ;;  %v2950_v61 = vrot.slane %v5346_v1, %v5832_v52  ;;  %v2954_v44 = vrot.slane %v5346_v1, %v5833_v17  ;;  %v2958_v56 = vrot.slane %v5346_v1, %v5834_v23 }
 0x29c   : > { %4363 = vlog2.f32 %v2910_v14  ;;  %v2962_v32 = vrot.slane %v5346_v1, %v4888_v49  ;;  %v2966_v10 = vrot.slane %v5346_v1, %v4891_v48  ;;  %v2970_v7 = vrot.slane %v5346_v1, %v5004_v39 }
 0x29d   : > { %v4356_v63 = vpop.eup %4355  ;;  %v5364_v57 = vpop.xlane.xlu0 %3826  ;;  %v3223_v37 = vsub.f32 %v5835_v38, %v2946_v2  ;;  %v3224_v60 = vsub.f32 %v5836_v58, %v2950_v61  ;;  %v3225_v13 = vsub.f32 %v5837_v22, %v2954_v44  ;;  %v3226_v9 = vsub.f32 %v5838_v33, %v2958_v56  ;;  %v5843_v61 = vld [vmem:[#allocation65_spill] sm:$0xff] }
 0x29e   : > { %v2918_v20 = vmul.f32 0.6931472, %v4356_v63  ;;  %v3227_v50 = vsub.f32 %v5839_v8, %v2962_v32  ;;  %v3228_v15 = vsub.f32 %v5840_v59, %v2966_v10  ;;  %v3229_v4 = vsub.f32 %v5841_v18, %v2970_v7  ;;  %v5844_v10 = vld [vmem:[#allocation14_spill] sm:$0xff] }
 0x29f   : > { %v4358_v3 = vpop.eup %4357  ;;  %v3335_v30 = vcombine.low %v3223_v37, %v3224_v60  ;;  %v3336_v31 = vcombine.low %v3225_v13, %v3226_v9  ;;  %v3818_v62 = vpop.xlane.xlu1 %3817  ;;  %v5845_v37 = vld [vmem:[#allocation18_spill] sm:$0xff]  ;;  %v5847_v13 = vld [vmem:[#allocation15_spill] sm:$0xff]  ;;  %v5848_v9 = vld [vmem:[#allocation17_spill] sm:$0xff] }
 0x2a0   : > { %v5374_v29 = vadd.f32 %v2918_v20, %v5842_v28  ;;  %v2920_v6 = vmul.f32 0.6931472, %v4358_v3  ;;  %v3337_v34 = vcombine.low %v3227_v50, %v3228_v15  ;;  %v3365_v51 = vrot.slane %v3229_v4, %v5815_v11  ;;  %v5846_v60 = vld [vmem:[#allocation22_spill] sm:$0xff]  ;;  %v5849_v50 = vld [vmem:[#allocation21_spill] sm:$0xff]  ;;  %v5850_v15 = vld [vmem:[#allocation28_spill] sm:$0xff] }
 0x2a1   : > { %v4360_v43 = vpop.eup %4359  ;;  %v2895_v53 = vpop.xlane.xlu0 %2894  ;;  %v3344_v35 = vrot.slane %v3335_v30, %v5815_v11  ;;  %v3351_v46 = vrot.slane %v3336_v31, %v5815_v11  ;;  %v5851_v28 = vld [vmem:[#allocation64_spill] sm:$0xff] }
 0x2a2   : > { %v2914_v36 = vmul.f32 0.6931472, %v4360_v43  ;;  %4365 = vlog2.f32 %v2895_v53  ;;  %v3030_v12 = vrot.slane %v5374_v29, %v5831_v55  ;;  %v3034_v24 = vrot.slane %v5374_v29, %v5832_v52  ;;  %v5852_v43 = vld [vmem:[#allocation68_spill] sm:$0xff] }
 0x2a3   : > { %v3038_v5 = vrot.slane %v5374_v29, %v5833_v17  ;;  %v3042_v14 = vrot.slane %v5374_v29, %v5834_v23  ;;  %v3046_v2 = vrot.slane %v5374_v29, %v4888_v49  ;;  %v5390_v44 = vadd.f32 %v2920_v6, %v5843_v61 }
 0x2a4   : > { %v3050_v56 = vrot.slane %v5374_v29, %v4891_v48  ;;  %v3054_v32 = vrot.slane %v5374_v29, %v5004_v39  ;;  %v3244_v7 = vsub.f32 %v5844_v10, %v3030_v12  ;;  %v3245_v58 = vsub.f32 %v5845_v37, %v3034_v24  ;;  %v3824_v12 = vpop.xlane.xlu1 %3823 }
 0x2a5   : > { %v4362_v63 = vpop.eup %4361  ;;  %v2907_v38 = vpop.xlane.xlu0 %2906  ;;  %v3246_v22 = vsub.f32 %v5846_v60, %v3038_v5  ;;  %v3247_v33 = vsub.f32 %v5847_v13, %v3042_v14  ;;  %v3248_v20 = vsub.f32 %v5848_v9, %v3046_v2  ;;  %v3358_v30 = vrot.slane %v3337_v34, %v5815_v11 }
 0x2a6   : > { %v2922_v8 = vmul.f32 0.6931472, %v4362_v63  ;;  %4367 = vlog2.f32 %v2907_v38  ;;  %v3249_v59 = vsub.f32 %v5849_v50, %v3050_v56  ;;  %v3250_v18 = vsub.f32 %v5850_v15, %v3054_v32 }
 0x2a7   : > { %v3479_v4 = vcombine.low %v3244_v7, %v3245_v58  ;;  %v3480_v3 = vcombine.low %v3246_v22, %v3247_v33  ;;  %v3366_v31 = vcombine.low %v3344_v35, %v3351_v46  ;;  %v5405_v6 = vadd.f32 %v2914_v36, %v5851_v28 }
 0x2a8   : > { %v5408_v53 = vadd.f32 %v2922_v8, %v5852_v43  ;;  %v3481_v24 = vcombine.low %v3248_v20, %v3249_v59  ;;  %v3367_v56 = vcombine.low %v3358_v30, %v3365_v51  ;;  %v3509_v36 = vrot.slane %v3250_v18, %v5815_v11  ;;  %v5853_v51 = vld [vmem:[#allocation75_spill] sm:$0xff]  ;;  %v3830_v50 = vpop.xlane.xlu1 %3829 }
 0x2a9   : > { %v4364_v5 = vpop.eup %4363  ;;  %v5410_v14 = vpop.xlane.xlu0 %3832  ;;  %v3488_v2 = vrot.slane %v3479_v4, %v5815_v11  ;;  %v3495_v61 = vrot.slane %v3480_v3, %v5815_v11  ;;  %v3374_v32 = vrot.slane %v3366_v31, %v5815_v11  ;;  %v3058_v46 = vrot.slane %v5390_v44, %v5831_v55  ;;  %v5854_v4 = vld [vmem:[#allocation26_spill] sm:$0xff] }
 0x2aa   : > { %v2926_v34 = vmul.f32 0.6931472, %v4364_v5  ;;  %v3502_v35 = vrot.slane %v3481_v24, %v5815_v11  ;;  %v3381_v7 = vrot.slane %v3367_v56, %v5815_v11  ;;  %v3062_v63 = vrot.slane %v5390_v44, %v5832_v52  ;;  %v5855_v24 = vld [vmem:[#allocation29_spill] sm:$0xff] }
 0x2ab   : > { %v3510_v10 = vcombine.low %v3488_v2, %v3495_v61  ;;  %v3066_v38 = vrot.slane %v5390_v44, %v5833_v17  ;;  %v3070_v60 = vrot.slane %v5390_v44, %v5834_v23  ;;  %v3074_v22 = vrot.slane %v5390_v44, %v4888_v49 }
 0x2ac   : > { %v5425_v37 = vadd.f32 %v2926_v34, %v5853_v51  ;;  %v3511_v58 = vcombine.low %v3502_v35, %v3509_v36  ;;  %v5434_v9 = vcombine.low %v3374_v32, %v3381_v7  ;;  %v3078_v20 = vrot.slane %v5390_v44, %v4891_v48  ;;  %v5856_v35 = vld [vmem:[#allocation66_spill] sm:$0xff] }
 0x2ad   : > { %v5431_v13 = vpop.permute.xlu0 %3844  ;;  %v3518_v33 = vrot.slane %v3510_v10, %v5815_v11  ;;  %v3082_v8 = vrot.slane %v5390_v44, %v5004_v39  ;;  %v3251_v3 = vsub.f32 %v5854_v4, %v3058_v46  ;;  %v3252_v5 = vsub.f32 %v5855_v24, %v3062_v63  ;;  %v5858_v10 = vld [vmem:[#allocation35_spill] sm:$0xff] }
 0x2ae   : > { %v3847_v59 = vadd.f32 %v5431_v13, %v5343_v16  ;;  %v3850_v15 = vadd.f32 %v5431_v13, %v3824_v12  ;;  %v3851_v18 = vadd.f32 %v5431_v13, %v5364_v57  ;;  %v3852_v31 = vadd.f32 %v5431_v13, %v3830_v50 }
 0x2af   : > { %v4366_v30 = vpop.eup %4365  ;;  %v3848_v28 = vadd.f32 %v5431_v13, %v3818_v62  ;;  %v3525_v43 = vrot.slane %v3511_v58, %v5815_v11  ;;  %v3849_v12 = vadd.f32 %v5431_v13, %v5348_v19  ;;  %v3253_v36 = vsub.f32 %v5856_v35, %v3066_v38  ;;  %v5859_v19 = vld [vmem:[#allocation41_spill] sm:$0xff] }
 0x2b0   : > { %v2916_v2 = vmul.f32 0.6931472, %v4366_v30  ;;  %v3855_v61 = vsub.f32 %v3847_v59, %v5346_v1  ;;  %v3858_v16 = vsub.f32 %v3850_v15, %v5374_v29  ;;  %v3859_v57 = vsub.f32 %v3851_v18, %v5390_v44  ;;  %v5857_v1 = vld [vmem:[#allocation67_spill] sm:$0xff]  ;;  %v5860_v44 = vld [vmem:[#allocation44_spill] sm:$0xff] }
 0x2b1   : > { %v3860_v56 = vsub.f32 %v3852_v31, %v5408_v53  ;;  %v3856_v32 = vsub.f32 %v3848_v28, %v5405_v6  ;;  %v3526_v34 = vcombine.low %v3518_v33, %v3525_v43  ;;  %v3254_v46 = vsub.f32 %v5857_v1, %v3070_v60  ;;  %v5862_v1 = vld [vmem:[#allocation72_spill] sm:$0xff] }
 0x2b2   : > { %v5458_v62 = vadd.f32 %v2916_v2, %v4948_v54  ;;  %3872 = vperm.xlu0 %4219, %v3855_v61   ;;  %3881 = vperm.xlu1 %4220, %v3858_v16   ;;  %v3255_v7 = vsub.f32 %v5858_v10, %v3074_v22  ;;  %v3256_v63 = vsub.f32 %v5859_v19, %v3078_v20 }
 0x2b3   : > { %v4368_v29 = vpop.eup %4367  ;;  %v3257_v51 = vsub.f32 %v5860_v44, %v3082_v8  ;;  %v3527_v58 = vcombine.low %v3251_v3, %v3252_v5  ;;  %v3528_v59 = vcombine.low %v3253_v36, %v3254_v46  ;;  %v3086_v54 = vrot.slane %v5408_v53, %v5831_v55 }
 0x2b4   : > { %v2924_v50 = vmul.f32 0.6931472, %v4368_v29  ;;  %v3857_v33 = vsub.f32 %v3849_v12, %v5458_v62  ;;  %v3529_v15 = vcombine.low %v3255_v7, %v3256_v63  ;;  %v3090_v22 = vrot.slane %v5408_v53, %v5832_v52  ;;  %v5863_v29 = vld [vmem:[#allocation49_spill] sm:$0xff] }
 0x2b5   : > { %v3536_v38 = vrot.slane %v3527_v58, %v5815_v11  ;;  %v3557_v60 = vrot.slane %v3257_v51, %v5815_v11  ;;  %v3543_v8 = vrot.slane %v3528_v59, %v5815_v11  ;;  %v3094_v18 = vrot.slane %v5408_v53, %v5833_v17 }
 0x2b6   : > { %v5473_v20 = vadd.f32 %v2924_v50, %v5084_v47  ;;  %3884 = vperm.xlu0 %4219, %v3859_v57   ;;  %3887 = vperm.xlu1 %4220, %v3860_v56   ;;  %v3550_v4 = vrot.slane %v3529_v15, %v5815_v11  ;;  %v3098_v3 = vrot.slane %v5408_v53, %v5834_v23  ;;  %v5861_v56 = vld [vmem:[#allocation69_spill] sm:$0xff] }
 0x2b7   : > { %v3102_v30 = vrot.slane %v5408_v53, %v4888_v49  ;;  %v3106_v31 = vrot.slane %v5408_v53, %v4891_v48  ;;  %v3558_v47 = vcombine.low %v3536_v38, %v3543_v8  ;;  %v3110_v44 = vrot.slane %v5408_v53, %v5004_v39  ;;  %v5865_v38 = vld [vmem:[#allocation40_spill] sm:$0xff]  ;;  %v5867_v53 = vld [vmem:[#allocation46_spill] sm:$0xff] }
 0x2b8   : > { %v3114_v28 = vrot.slane %v5473_v20, %v5831_v55  ;;  %v3118_v43 = vrot.slane %v5473_v20, %v5832_v52  ;;  %v3122_v24 = vrot.slane %v5473_v20, %v5833_v17  ;;  %v3559_v5 = vcombine.low %v3550_v4, %v3557_v60  ;;  %v5866_v60 = vld [vmem:[#allocation45_spill] sm:$0xff] }
 0x2b9   : > { %v3126_v2 = vrot.slane %v5473_v20, %v5834_v23  ;;  %v3130_v61 = vrot.slane %v5473_v20, %v4888_v49  ;;  %v3134_v16 = vrot.slane %v5473_v20, %v4891_v48  ;;  %v3566_v12 = vrot.slane %v3558_v47, %v5815_v11 }
 0x2ba   : > { %3878 = vperm.xlu0 %4219, %v3857_v33   ;;  %3875 = vperm.xlu1 %4220, %v3856_v32   ;;  %v3138_v57 = vrot.slane %v5473_v20, %v5004_v39  ;;  %v3265_v35 = vsub.f32 %v5861_v56, %v3114_v28  ;;  %v3573_v36 = vrot.slane %v3559_v5, %v5815_v11  ;;  %v5864_v33 = vld [vmem:[#allocation47_spill] sm:$0xff] }
 0x2bb   : > { %v3266_v46 = vsub.f32 %v5862_v1, %v3118_v43  ;;  %v3267_v10 = vsub.f32 %v5863_v29, %v3122_v24  ;;  %v3268_v7 = vsub.f32 %v4781_v41, %v3126_v2  ;;  %v3269_v19 = vsub.f32 %v5124_v45, %v3130_v61  ;;  %v5868_v28 = vld [vmem:[#allocation51_spill] sm:$0xff] }
 0x2bc   : > { %v3270_v63 = vsub.f32 %v5128_v0, %v3134_v16  ;;  %v3271_v32 = vsub.f32 %v5817_v40, %v3138_v57  ;;  %v3574_v51 = vcombine.low %v3566_v12, %v3573_v36  ;;  %v3258_v59 = vsub.f32 %v5864_v33, %v3086_v54  ;;  %v5872_v33 = vld [vmem:[#allocation38_spill] sm:$0xff] }
 0x2bd   : > { %v3623_v58 = vcombine.low %v3265_v35, %v3266_v46  ;;  %v3624_v50 = vcombine.low %v3267_v10, %v3268_v7  ;;  %v3259_v45 = vsub.f32 %v5865_v38, %v3090_v22  ;;  %v3260_v8 = vsub.f32 %v5866_v60, %v3094_v18  ;;  %v5870_v10 = vld [vmem:[#allocation34_spill] sm:$0xff] }
 0x2be   : > { %3729 = vperm.xlu0 %4219, %v3526_v34   ;;  %3720 = vperm.xlu1 %4220, %v5434_v9   ;;  %v3625_v15 = vcombine.low %v3269_v19, %v3270_v63  ;;  %v3653_v41 = vrot.slane %v3271_v32, %v5815_v11  ;;  %v3261_v4 = vsub.f32 %v5867_v53, %v3098_v3  ;;  %v5869_v34 = vld [vmem:[#allocation48_spill] sm:$0xff]  ;;  %v5871_v32 = vld [vmem:[#allocation39_spill] sm:$0xff] }
 0x2bf   : > { %v3632_v0 = vrot.slane %v3623_v58, %v5815_v11  ;;  %v3639_v40 = vrot.slane %v3624_v50, %v5815_v11  ;;  %v3262_v54 = vsub.f32 %v5868_v28, %v3102_v30  ;;  %v3263_v43 = vsub.f32 %v5869_v34, %v3106_v31 }
 0x2c0   : > { %v3646_v47 = vrot.slane %v3625_v15, %v5815_v11  ;;  %v3264_v9 = vsub.f32 %v4773_v21, %v3110_v44  ;;  %v3575_v5 = vcombine.low %v3258_v59, %v3259_v45  ;;  %v3576_v2 = vcombine.low %v3260_v8, %v3261_v4  ;;  %v5873_v15 = vld [vmem:[#allocation42_spill] sm:$0xff] }
 0x2c1   : > { %v3654_v24 = vcombine.low %v3632_v0, %v3639_v40  ;;  %v3142_v22 = vrot.slane %v5425_v37, %v5831_v55  ;;  %v3577_v16 = vcombine.low %v3262_v54, %v3263_v43  ;;  %v3146_v3 = vrot.slane %v5425_v37, %v5832_v52 }
 0x2c2   : > { %3732 = vperm.xlu1 %4220, %v3574_v51   ;;  %v3655_v61 = vcombine.low %v3646_v47, %v3653_v41  ;;  %v3605_v18 = vrot.slane %v3264_v9, %v5815_v11  ;;  %v3584_v31 = vrot.slane %v3575_v5, %v5815_v11  ;;  %v3591_v21 = vrot.slane %v3576_v2, %v5815_v11  ;;  %v5875_v2 = vld [vmem:[#allocation27_spill] sm:$0xff] }
 0x2c3   : > { %v3662_v30 = vrot.slane %v3654_v24, %v5815_v11  ;;  %v3150_v12 = vrot.slane %v5425_v37, %v5833_v17  ;;  %v3598_v56 = vrot.slane %v3577_v16, %v5815_v11  ;;  %v3154_v35 = vrot.slane %v5425_v37, %v5834_v23  ;;  %v5874_v24 = vld [vmem:[#allocation50_spill] sm:$0xff] }
 0x2c4   : > { %v3669_v57 = vrot.slane %v3655_v61, %v5815_v11  ;;  %v3158_v36 = vrot.slane %v5425_v37, %v4888_v49  ;;  %v3606_v1 = vcombine.low %v3584_v31, %v3591_v21  ;;  %v3162_v46 = vrot.slane %v5425_v37, %v4891_v48  ;;  %v5876_v61 = vld [vmem:[#allocation31_spill] sm:$0xff]  ;;  %v5878_v21 = vld [vmem:[#allocation37_spill] sm:$0xff] }
 0x2c5   : > { %v3166_v29 = vrot.slane %v5425_v37, %v5004_v39  ;;  %v3272_v7 = vsub.f32 %v5870_v10, %v3142_v22  ;;  %v3607_v63 = vcombine.low %v3598_v56, %v3605_v18  ;;  %v3273_v44 = vsub.f32 %v5871_v32, %v3146_v3 }
 0x2c6   : > { %v3670_v19 = vcombine.low %v3662_v30, %v3669_v57  ;;  %v3274_v51 = vsub.f32 %v4731_v26, %v3150_v12  ;;  %v3614_v58 = vrot.slane %v3606_v1, %v5815_v11  ;;  %v3275_v50 = vsub.f32 %v4691_v42, %v3154_v35  ;;  %v5877_v30 = vld [vmem:[#allocation33_spill] sm:$0xff]  ;;  %v5879_v57 = vld [vmem:[#allocation30_spill] sm:$0xff]  ;;  %v5880_v35 = vld [vmem:[#allocation36_spill] sm:$0xff] }
 0x2c7   : > { %v3276_v59 = vsub.f32 %v5872_v33, %v3158_v36  ;;  %v3277_v41 = vsub.f32 %v5873_v15, %v3162_v46  ;;  %v3621_v38 = vrot.slane %v3607_v63, %v5815_v11  ;;  %v3278_v45 = vsub.f32 %v5814_v27, %v3166_v29  ;;  %v5881_v15 = vld [vmem:[#allocation61_spill] sm:$0xff] }
 0x2c8   : > { %3738 = vperm.xlu0 %4219, %v3670_v19   ;;  %v3671_v0 = vcombine.low %v3272_v7, %v3273_v44  ;;  %v2974_v40 = vrot.slane %v5405_v6, %v5831_v55  ;;  %v3672_v60 = vcombine.low %v3274_v51, %v3275_v50  ;;  %v2978_v26 = vrot.slane %v5405_v6, %v5832_v52 }
 0x2c9   : > { %v3673_v8 = vcombine.low %v3276_v59, %v3277_v41  ;;  %v2982_v42 = vrot.slane %v5405_v6, %v5833_v17  ;;  %v3622_v53 = vcombine.low %v3614_v58, %v3621_v38  ;;  %v3701_v47 = vrot.slane %v3278_v45, %v5815_v11  ;;  %v5882_v38 = vld [vmem:[#allocation62_spill] sm:$0xff] }
 0x2ca   : > { %v3680_v4 = vrot.slane %v3671_v0, %v5815_v11  ;;  %v2986_v27 = vrot.slane %v5405_v6, %v5834_v23  ;;  %v3687_v28 = vrot.slane %v3672_v60, %v5815_v11  ;;  %v2990_v34 = vrot.slane %v5405_v6, %v4888_v49  ;;  %v5883_v0 = vld [vmem:[#allocation16_spill] sm:$0xff] }
 0x2cb   : > { %v3694_v54 = vrot.slane %v3673_v8, %v5815_v11  ;;  %v2994_v43 = vrot.slane %v5405_v6, %v4891_v48  ;;  %3735 = vperm.xlu1 %4220, %v3622_v53   ;;  %v2998_v9 = vrot.slane %v5405_v6, %v5004_v39  ;;  %v3230_v5 = vsub.f32 %v5874_v24, %v2974_v40 }
 0x2cc   : > { %v3231_v22 = vsub.f32 %v5875_v2, %v2978_v26  ;;  %v3232_v16 = vsub.f32 %v5876_v61, %v2982_v42  ;;  %v3702_v18 = vcombine.low %v3680_v4, %v3687_v28  ;;  %v3233_v31 = vsub.f32 %v5877_v30, %v2986_v27  ;;  %v5886_v42 = vld [vmem:[#allocation63_spill] sm:$0xff]  ;;  %v3836_v61 = vpop.xlane.xlu1 %3835 }
 0x2cd   : > { %v3703_v3 = vcombine.low %v3694_v54, %v3701_v47  ;;  %v3234_v12 = vsub.f32 %v5878_v21, %v2990_v34  ;;  %v3235_v56 = vsub.f32 %v5879_v57, %v2994_v43  ;;  %v3236_v36 = vsub.f32 %v5880_v35, %v2998_v9 }
 0x2ce   : > { %v3383_v1 = vcombine.low %v3230_v5, %v3231_v22  ;;  %v3002_v6 = vrot.slane %v5458_v62, %v5831_v55  ;;  %v3710_v46 = vrot.slane %v3702_v18, %v5815_v11  ;;  %v3384_v10 = vcombine.low %v3232_v16, %v3233_v31 }
 0x2cf   : > { %v3717_v29 = vrot.slane %v3703_v3, %v5815_v11  ;;  %v3006_v7 = vrot.slane %v5458_v62, %v5832_v52  ;;  %v3385_v19 = vcombine.low %v3234_v12, %v3235_v56  ;;  %v3413_v32 = vrot.slane %v3236_v36, %v5815_v11 }
 0x2d0   : > { %v3392_v63 = vrot.slane %v3383_v1, %v5815_v11  ;;  %v3010_v44 = vrot.slane %v5458_v62, %v5833_v17  ;;  %v3399_v58 = vrot.slane %v3384_v10, %v5815_v11  ;;  %v3014_v55 = vrot.slane %v5458_v62, %v5834_v23  ;;  %v5884_v23 = vld [vmem:[#allocation19_spill] sm:$0xff] }
 0x2d1   : > { %v3718_v51 = vcombine.low %v3710_v46, %v3717_v29  ;;  %v3018_v50 = vrot.slane %v5458_v62, %v4888_v49  ;;  %v3406_v33 = vrot.slane %v3385_v19, %v5815_v11  ;;  %v3022_v52 = vrot.slane %v5458_v62, %v4891_v48  ;;  %v5885_v49 = vld [vmem:[#allocation60_spill] sm:$0xff] }
 0x2d2   : > { %v3026_v59 = vrot.slane %v5458_v62, %v5004_v39  ;;  %v3237_v41 = vsub.f32 %v5881_v15, %v3002_v6  ;;  %v3414_v17 = vcombine.low %v3392_v63, %v3399_v58  ;;  %v3238_v45 = vsub.f32 %v5882_v38, %v3006_v7 }
 0x2d3   : > { %3741 = vperm.xlu0 %4219, %v3718_v51   ;;  %v3239_v40 = vsub.f32 %v5883_v0, %v3010_v44  ;;  %v3240_v60 = vsub.f32 %v5884_v23, %v3014_v55  ;;  %v3415_v8 = vcombine.low %v3406_v33, %v3413_v32  ;;  %v3241_v26 = vsub.f32 %v5885_v49, %v3018_v50 }
 0x2d4   : > { %v3242_v53 = vsub.f32 %v5886_v42, %v3022_v52  ;;  %v3243_v48 = vsub.f32 %v5816_v25, %v3026_v59  ;;  %v3422_v4 = vrot.slane %v3414_v17, %v5815_v11  ;;  %v3431_v39 = vcombine.low %v3237_v41, %v3238_v45 }
 0x2d5   : > { %v3432_v62 = vcombine.low %v3239_v40, %v3240_v60  ;;  %v3429_v47 = vrot.slane %v3415_v8, %v5815_v11  ;;  %v3853_v16 = vadd.f32 %v5431_v13, %v5410_v14  ;;  %v3854_v18 = vadd.f32 %v5431_v13, %v3836_v61  ;;  %v5888_v14 = vld [vmem:[#allocation2_spill] sm:$0xff] }
 0x2d6   : > { %v3433_v27 = vcombine.low %v3241_v26, %v3242_v53  ;;  %v3440_v28 = vrot.slane %v3431_v39, %v5815_v11  ;;  %v3461_v9 = vrot.slane %v3243_v48, %v5815_v11  ;;  %v5887_v36 = vlaneseq }
 0x2d7   : > { %v3447_v54 = vrot.slane %v3432_v62, %v5815_v11  ;;  %v3430_v34 = vcombine.low %v3422_v4, %v3429_v47  ;;  %v3861_v3 = vsub.f32 %v3853_v16, %v5473_v20  ;;  %v3862_v30 = vsub.f32 %v3854_v18, %v5425_v37 }
 0x2d8   : > { %v3454_v43 = vrot.slane %v3433_v27, %v5815_v11  ;;  %v3744_v1 = vand.u32 127, %v5887_v36 }
 0x2d9   : > { %v3462_v24 = vcombine.low %v3440_v28, %v3447_v54  ;;  %3723 = vperm.xlu1 %4220, %v3430_v34  }
 0x2da   : > { %v3463_v5 = vcombine.low %v3454_v43, %v3461_v9  ;;  %v3747_v29 = vsub.s32 %v3744_v1, %v5888_v14 }
 0x2db   : > { %v3470_v25 = vrot.slane %v3462_v24, %v5815_v11 }
 0x2dc   : > { %v3477_v2 = vrot.slane %v3463_v5, %v5815_v11 }
 0x2de   : > { %v3478_v22 = vcombine.low %v3470_v25, %v3477_v2 }
 0x2e0   : > { %3726 = vperm.xlu1 %4220, %v3478_v22  }
 0x2e4   : > { %3890 = vperm.xlu1 %4220, %v3861_v3  }
 0x2e8   : > { %3893 = vperm.xlu1 %4220, %v3862_v30  }
 0x32d   : > { %v3882_v31 = vpop.permute.xlu1 %3881  ;;  %v3873_v57 = vpop.permute.xlu0 %3872 }
 0x32e   : > { %v3898_v7 = vrot.slane %v3873_v57, %v3747_v29  ;;  %v3910_v55 = vrot.slane %v3882_v31, %v3747_v29 }
 0x331   : > { %v3888_v21 = vpop.permute.xlu1 %3887  ;;  %v3885_v11 = vpop.permute.xlu0 %3884 }
 0x332   : > { %v3914_v38 = vrot.slane %v3885_v11, %v3747_v29  ;;  %v3918_v53 = vrot.slane %v3888_v21, %v3747_v29 }
 0x335   : > { %v3876_v12 = vpop.permute.xlu1 %3875  ;;  %v3879_v6 = vpop.permute.xlu0 %3878 }
 0x336   : > { %v3902_v13 = vrot.slane %v3876_v12, %v3747_v29  ;;  %v3906_v37 = vrot.slane %v3879_v6, %v3747_v29 }
 0x338   : > { %v3927_v19 = vsel %vm3777_vm3, %v3902_v13, %v3898_v7 }
 0x339   : > { %v3721_v56 = vpop.permute.xlu1 %3720  ;;  %v3730_v10 = vpop.permute.xlu0 %3729  ;;  %v3928_v44 = vsel %vm3779_vm4, %v3906_v37, %v3927_v19 }
 0x33a   : > { %v3748_v51 = vrot.slane %v3721_v56, %v3747_v29  ;;  %v3760_v33 = vrot.slane %v3730_v10, %v3747_v29  ;;  %v3929_v59 = vsel %vm3781_vm5, %v3910_v55, %v3928_v44 }
 0x33b   : > { %v3930_v26 = vsel %vm3783_vm6, %v3914_v38, %v3929_v59 }
 0x33c   : > { %v3931_v62 = vsel %vm3785_vm7, %v3918_v53, %v3930_v26 }
 0x33d   : > { %v3733_v35 = vpop.permute.xlu1 %3732 }
 0x33e   : > { %v3764_v15 = vrot.slane %v3733_v35, %v3747_v29 }
 0x343   : > { %v3739_v63 = vpop.permute.xlu0 %3738 }
 0x344   : > { %v3772_v23 = vrot.slane %v3739_v63, %v3747_v29 }
 0x346   : > { %v3736_v46 = vpop.permute.xlu1 %3735 }
 0x347   : > { %v3768_v45 = vrot.slane %v3736_v46, %v3747_v29 }
 0x34e   : > { %v3742_v41 = vpop.permute.xlu0 %3741 }
 0x34f   : > { %v3776_v8 = vrot.slane %v3742_v41, %v3747_v29 }
 0x354   : > { %v3724_v20 = vpop.permute.xlu1 %3723 }
 0x355   : > { %v3752_v32 = vrot.slane %v3724_v20, %v3747_v29 }
 0x357   : > { %v3778_v52 = vsel %vm3777_vm3, %v3752_v32, %v3748_v51 }
 0x35b   : > { %v3727_v58 = vpop.permute.xlu1 %3726 }
 0x35c   : > { %v3756_v50 = vrot.slane %v3727_v58, %v3747_v29 }
 0x35e   : > { %v3780_v17 = vsel %vm3779_vm4, %v3756_v50, %v3778_v52 }
 0x35f   : > { %v3782_v0 = vsel %vm3781_vm5, %v3760_v33, %v3780_v17  ;;  %v3891_v40 = vpop.permute.xlu1 %3890 }
 0x360   : > { %v3784_v60 = vsel %vm3783_vm6, %v3764_v15, %v3782_v0  ;;  %v3922_v42 = vrot.slane %v3891_v40, %v3747_v29 }
 0x361   : > { %v3786_v49 = vsel %vm3785_vm7, %v3768_v45, %v3784_v60 }
 0x362   : > { %v3788_v48 = vsel %vm3787_vm8, %v3772_v23, %v3786_v49  ;;  %v3932_v27 = vsel %vm3787_vm8, %v3922_v42, %v3931_v62 }
 0x363   : > { %v3790_v4 = vsel %vm3789_vm9, %v3776_v8, %v3788_v48  ;;  %v3894_v39 = vpop.permute.xlu1 %3893 }
 0x364   : > { %3793 = vst.msk [vmem:[%s444_s27] sm:$0xff] %vm3792_vm10, %v3790_v4  ;;  %v3926_v47 = vrot.slane %v3894_v39, %v3747_v29 }
 0x366   : > { %v3933_v28 = vsel %vm3789_vm9, %v3926_v47, %v3932_v27 }
 0x367   : > { %3935 = vst.msk [vmem:[%s454_s21] sm:$0xff] %vm3792_vm10, %v3933_v28 }
 0x368 PF: > { %s19_s29 = sadd.s32 1, %s4391_s29   ;;  %s5889_s27 = smov %s4387_s28 }
 0x369   : > { %p16_p5 = scmp.ge.s32.totalorder %s19_s29, 4   ;;  %s5890_s28 = smov %s5892_s30 }
 0x36b   :  { %18 = sbr.rel (!%p16_p5) target bundleno = 2 (0x2), region = 99 }

</bundles_post_ra>
